<compile_context>
chip_gen: v7x
topology: tpu7x:2x2x1
jax: 0.10.0
libtpu: 0.0.40
codegen_flags: <defaults>
</compile_context>

<pallas_src>
import numpy as np

import jax
import jax.numpy as jnp
from jax.experimental import pallas as pl


def _round_up(v, m):
    return (v + m - 1) // m * m


# ----------------------------------------------------------------------------
# Single fused kernel (no grid): stem conv -> downsample conv ->
# bottleneck(+residual) -> detect head -> sigmoid -> anchor decode.
# All operands are whole-array VMEM blocks; batch is folded into rows.
# ----------------------------------------------------------------------------
def _yolov5n_fused_kernel(x_ref, g1_ref, w1_ref, g2_ref, w2_ref,
                          w3_ref, w4_ref, bias_ref, dec_ref, o_ref):
    f32, bf16 = jnp.float32, jnp.bfloat16

    BM1 = g1_ref.shape[0] // 9          # B * H1 * W1  (stem output rows)
    BM2 = g2_ref.shape[0] // 9          # B * H2 * W2  (head rows)
    CH = w3_ref.shape[0]                # padded channel width (c1p == c2)

    bias = bias_ref[...]                # (8, CH) f32: rows 0/1/2 = b1/b2/b3
    dec = dec_ref[...]                  # (3*BM2 + 8, 128) f32 decode constants

    def silu(v):                        # f32 VPU/EUP path (v5e-safe)
        return v * jax.nn.sigmoid(v)

    def conv3x3_s2(g_ref, xin_b, w_ref, brow, bm):
        # 3x3/s2 conv as TWO matmuls:
        #   gath[t*bm + r, :]          = input row at tap-t shifted position
        #                                (all-zero rows implement zero padding)
        #   wide[t*bm + r, s*CH + c]   = (tap-t gathered row) @ (tap-s weights)
        # The true conv output is the tap-diagonal sum_t wide[t-block, t-block],
        # reduced with 8 static VPU slice-adds (no extra MXU pushes).
        gath = jnp.dot(g_ref[...], xin_b, preferred_element_type=f32)
        # each gather row has at most one 1 -> bf16 round-trip is exact
        wide = jnp.dot(gath.astype(bf16), w_ref[...], preferred_element_type=f32)
        acc = wide[0:bm, 0:CH]
        for t in range(1, 9):           # static unroll; cheap vreg slice + add
            acc = acc + wide[t * bm:(t + 1) * bm, t * CH:(t + 1) * CH]
        return silu(acc + brow)

    # ---- layer 1: stem 3x3/s2 conv + SiLU (im2col happens in-kernel) -------
    y1 = conv3x3_s2(g1_ref, x_ref[...], w1_ref, bias[0:1, :], BM1)  # (BM1, CH)
    y1b = y1.astype(bf16)

    # ---- layer 2: 3x3/s2 downsample conv + SiLU ----------------------------
    y2 = conv3x3_s2(g2_ref, y1b, w2_ref, bias[1:2, :], BM2)         # (BM2, CH)
    y2b = y2.astype(bf16)

    # ---- layer 3: 1x1 bottleneck conv + SiLU + fused residual add ----------
    t3 = jnp.dot(y2b, w3_ref[...], preferred_element_type=f32) + bias[2:3, :]
    y3 = y2 + silu(t3)
    y3b = y3.astype(bf16)

    # ---- layer 4: detect head (N padded to 128 lanes) + sigmoid + decode ---
    b4 = dec[3 * BM2:3 * BM2 + 1, :]
    h = jnp.dot(y3b, w4_ref[...], preferred_element_type=f32) + b4
    s = jax.nn.sigmoid(h)                                           # (BM2, 128)
    a1 = dec[0:BM2, :]
    a2 = dec[BM2:2 * BM2, :]
    cb = dec[2 * BM2:3 * BM2, :]
    # xy lanes: 2*stride*s + (grid-0.5)*stride ; wh lanes: 4*anchor*s^2 ; rest: s
    o_ref[...] = (s * (a1 + a2 * s) + cb).astype(o_ref.dtype)


# ----------------------------------------------------------------------------
# Tiny YOLOv5-N style model (stand-in for the stub reference module).
# ----------------------------------------------------------------------------
class YoloV5N:
    def __init__(self, num_classes, anchors, in_channels=4, key=None):
        self.nc = num_classes
        self.anchors = np.asarray(anchors, dtype=np.float32).reshape(-1, 2)
        self.na = self.anchors.shape[0]
        self.no = num_classes + 5
        self.nl = self.na * self.no       # real head width (e.g. 24)
        self.nlp = 128                    # lane-dense head width
        self.cin = in_channels
        self.cinp = _round_up(in_channels, 8)

        c1, c2 = 8, 16
        self.c1, self.c2 = c1, c2
        self.ch = 16                      # padded channel width (c1 -> 16, c2 = 16)

        key = jax.random.PRNGKey(0) if key is None else key
        ks = jax.random.split(key, 8)

        def winit(k, shape, scale=0.1):
            return scale * jax.random.normal(k, shape, dtype=jnp.float32)

        # Conv + (folded) BN + SiLU stem, k=3 s=2
        self.w_stem = winit(ks[0], (3, 3, in_channels, c1))
        self.b_stem = winit(ks[1], (c1,), 0.01)
        # downsample conv, k=3 s=2
        self.w_down = winit(ks[2], (3, 3, c1, c2))
        self.b_down = winit(ks[3], (c2,), 0.01)
        # C3-lite bottleneck: 1x1 conv with residual
        self.w_bott = winit(ks[4], (1, 1, c2, c2))
        self.b_bott = winit(ks[5], (c2,), 0.01)
        # Detect head: 1x1 conv -> na * (5 + nc)
        self.w_head = winit(ks[6], (1, 1, c2, self.nl))
        self.b_head = winit(ks[7], (self.nl,), 0.01)

        # --- pack weights once for the fused kernel -------------------------
        ch, cinp = self.ch, self.cinp

        # w1cat: (CinP, 9*CH) -- per-tap stem weights concatenated along N
        w1 = np.zeros((cinp, 9 * ch), np.float32)
        ws = np.asarray(self.w_stem)
        for t in range(9):
            i, j = t // 3, t % 3
            w1[:in_channels, t * ch:t * ch + c1] = ws[i, j]
        self.w1cat = jnp.asarray(w1, jnp.bfloat16)

        # w2cat: (CH, 9*CH) -- per-tap downsample weights concatenated along N
        w2 = np.zeros((ch, 9 * ch), np.float32)
        wd = np.asarray(self.w_down)
        for t in range(9):
            i, j = t // 3, t % 3
            w2[:c1, t * ch:t * ch + c2] = wd[i, j]
        self.w2cat = jnp.asarray(w2, jnp.bfloat16)

        self.w3m = jnp.asarray(np.asarray(self.w_bott).reshape(c2, c2),
                               jnp.bfloat16)

        # head weight padded to 128 lanes (lane-dense output / MXU columns)
        w4 = np.zeros((ch, self.nlp), np.float32)
        w4[:c2, :self.nl] = np.asarray(self.w_head).reshape(c2, self.nl)
        self.w4m = jnp.asarray(w4, jnp.bfloat16)

        # b1/b2/b3 consolidated into one tiny (8, CH) operand
        bias = np.zeros((8, ch), np.float32)
        bias[0, :c1] = np.asarray(self.b_stem)
        bias[1, :c2] = np.asarray(self.b_down)
        bias[2, :c2] = np.asarray(self.b_bott)
        self.biasm = jnp.asarray(bias)

        self._geom_cache = {}

    # Geometry-dependent host constants (built once per (batch, input size)).
    def _geometry(self, B, H, W):
        cache_key = (B, H, W)
        if cache_key in self._geom_cache:
            return self._geom_cache[cache_key]

        H1, W1 = (H - 1) // 2 + 1, (W - 1) // 2 + 1      # k=3, s=2, p=1
        H2, W2 = (H1 - 1) // 2 + 1, (W1 - 1) // 2 + 1
        M1, M2 = H1 * W1, H2 * W2

        def gather(Hi, Wi, Ho, Wo, Mi, Mo):
            # 0/1 gather (9*B*Mo, B*Mi): row [t, b, p] selects the tap-t
            # shifted input row for output pixel p of image b (zero rows
            # implement the conv zero-padding; batch is block-diagonal).
            G = np.zeros((9 * B * Mo, B * Mi), np.float32)
            for t in range(9):
                i, j = t // 3, t % 3
                for b in range(B):
                    for ho in range(Ho):
                        for wo in range(Wo):
                            r, c = 2 * ho + i - 1, 2 * wo + j - 1
                            if 0 <= r < Hi and 0 <= c < Wi:
                                G[t * B * Mo + b * Mo + ho * Wo + wo,
                                  b * Mi + r * Wi + c] = 1.0
            return jnp.asarray(G, jnp.bfloat16)

        g1 = gather(H, W, H1, W1, H * W, M1)      # stem im2col (in-kernel)
        g2 = gather(H1, W1, H2, W2, M1, M2)       # downsample im2col

        # Decode constants + head bias packed lane-dense:
        #   out = s*(A1 + A2*s) + Bc
        #   xy lanes: A1 = 2*stride, Bc = (grid-0.5)*stride
        #   wh lanes: A2 = 4*anchor (i.e. 4*anchor*s^2)
        #   obj/cls : A1 = 1
        # TODO(synk): verify anchor/stride convention against the intended
        #             YOLOv5 anchor_grid definition (reference is a stub).
        stride = H // H2
        BM2 = B * M2
        A1 = np.ones((BM2, self.nlp), np.float32)
        A2 = np.zeros((BM2, self.nlp), np.float32)
        Bc = np.zeros((BM2, self.nlp), np.float32)
        for b in range(B):
            for p in range(M2):
                row = b * M2 + p
                ho, wo = p // W2, p % W2
                for l in range(self.nl):
                    a, c = l // self.no, l % self.no
                    if c == 0:
                        A1[row, l] = 2.0 * stride
                        Bc[row, l] = (wo - 0.5) * stride
                    elif c == 1:
                        A1[row, l] = 2.0 * stride
                        Bc[row, l] = (ho - 0.5) * stride
                    elif c == 2:
                        A1[row, l] = 0.0
                        A2[row, l] = 4.0 * self.anchors[a, 0]
                    elif c == 3:
                        A1[row, l] = 0.0
                        A2[row, l] = 4.0 * self.anchors[a, 1]
        dec = np.zeros((3 * BM2 + 8, self.nlp), np.float32)
        dec[0:BM2] = A1
        dec[BM2:2 * BM2] = A2
        dec[2 * BM2:3 * BM2] = Bc
        dec[3 * BM2, :self.nl] = np.asarray(self.b_head)   # head bias row

        geom = (H1, W1, H2, W2, g1, g2, jnp.asarray(dec))
        self._geom_cache[cache_key] = geom
        return geom

    def forward(self, x_nchw):
        B, Cin, H, W = x_nchw.shape
        H1, W1, H2, W2, g1, g2, dec = self._geometry(B, H, W)
        M2 = H2 * W2

        # Minimal host-side layout only: NCHW -> (B*H*W, CinP) bf16 rows.
        # The 3x3 im2col itself is done inside the kernel (gather matmul),
        # so no 9x HBM copy of the input is ever materialized.
        x_rows = jnp.transpose(x_nchw, (0, 2, 3, 1)).astype(jnp.float32)
        x_rows = x_rows.reshape(B * H * W, Cin)
        x_rows = jnp.pad(x_rows, ((0, 0), (0, self.cinp - Cin))
                         ).astype(jnp.bfloat16)

        # Single fused invocation: no grid, no per-step overhead, constants
        # are single-buffered whole-array VMEM blocks, output is lane-dense
        # (B*M2, 128) f32.
        out = pl.pallas_call(
            _yolov5n_fused_kernel,
            out_shape=jax.ShapeDtypeStruct((B * M2, self.nlp), jnp.float32),
        )(x_rows, g1, self.w1cat, g2, self.w2cat,
          self.w3m, self.w4m, self.biasm, dec)

        # Slice real head lanes and present the Detect layout.
        # (kept for API consistency; fold into the consumer at real scale)
        p = out[:, :self.nl].reshape(B, H2, W2, self.na, self.no)
        return jnp.transpose(p, (0, 3, 1, 2, 4))

    def __call__(self, x):
        return self.forward(x)


if __name__ == "__main__":
    key = jax.random.PRNGKey(0)
    k_in, k_model = jax.random.split(key)

    num_classes = 3
    anchors = [10, 13, 16, 30, 33, 23]          # one detection level, 3 anchors
    model = YoloV5N(num_classes, anchors, in_channels=4, key=k_model)

    x = jax.random.normal(k_in, (2, 4, 16, 16), dtype=jnp.float32)      # NCHW
    out = jax.block_until_ready(model(x))

    assert out.shape == (2, 3, 4, 4, num_classes + 5), out.shape
    assert bool(jnp.all(jnp.isfinite(out)))
    print("KERNEL_OK")
</pallas_src>

<mosaic_0001>
module attributes {stable_mosaic.version = 11 : i64} {
  func.func @_yolov5n_fused_kernel(%arg0: memref<512x8xbf16, #tpu.memory_space<vmem>>, %arg1: memref<1152x512xbf16, #tpu.memory_space<vmem>>, %arg2: memref<8x144xbf16, #tpu.memory_space<vmem>>, %arg3: memref<288x128xbf16, #tpu.memory_space<vmem>>, %arg4: memref<16x144xbf16, #tpu.memory_space<vmem>>, %arg5: memref<16x16xbf16, #tpu.memory_space<vmem>>, %arg6: memref<16x128xbf16, #tpu.memory_space<vmem>>, %arg7: memref<8x16xf32, #tpu.memory_space<vmem>>, %arg8: memref<104x128xf32, #tpu.memory_space<vmem>>, %arg9: memref<32x128xf32, #tpu.memory_space<vmem>>) attributes {dimension_semantics = [], scalar_prefetch = 0 : i64, scratch_operands = 0 : i64, tpu.core_type = #tpu.core_type<tc>} {
    %c0 = arith.constant 0 : index
    %c0_0 = arith.constant 0 : index
    %0 = vector.load %arg7[%c0, %c0_0] : memref<8x16xf32, #tpu.memory_space<vmem>>, vector<8x16xf32>
    %c0_1 = arith.constant 0 : index
    %c0_2 = arith.constant 0 : index
    %1 = vector.load %arg8[%c0_1, %c0_2] : memref<104x128xf32, #tpu.memory_space<vmem>>, vector<104x128xf32>
    %c0_3 = arith.constant 0 : index
    %c0_4 = arith.constant 0 : index
    %2 = vector.load %arg0[%c0_3, %c0_4] : memref<512x8xbf16, #tpu.memory_space<vmem>>, vector<512x8xbf16>
    %3 = vector.extract_strided_slice %0 {offsets = [0, 0], sizes = [1, 16], strides = [1, 1]} : vector<8x16xf32> to vector<1x16xf32>
    %c0_5 = arith.constant 0 : index
    %c0_6 = arith.constant 0 : index
    %4 = vector.load %arg1[%c0_5, %c0_6] : memref<1152x512xbf16, #tpu.memory_space<vmem>>, vector<1152x512xbf16>
    %cst = arith.constant dense<0.000000e+00> : vector<1152x8xf32>
    %5 = tpu.matmul %4, %2, %cst {dimension_numbers = #tpu.dot_dimension_numbers<[1], [0], [0], [1], [0, 0, 1, 1], [], []>} : vector<1152x512xbf16>, vector<512x8xbf16>, vector<1152x8xf32> -> vector<1152x8xf32>
    %6 = arith.truncf %5 : vector<1152x8xf32> to vector<1152x8xbf16>
    %c0_7 = arith.constant 0 : index
    %c0_8 = arith.constant 0 : index
    %7 = vector.load %arg2[%c0_7, %c0_8] : memref<8x144xbf16, #tpu.memory_space<vmem>>, vector<8x144xbf16>
    %cst_9 = arith.constant dense<0.000000e+00> : vector<1152x144xf32>
    %8 = tpu.matmul %6, %7, %cst_9 {dimension_numbers = #tpu.dot_dimension_numbers<[1], [0], [0], [1], [0, 0, 1, 1], [], []>} : vector<1152x8xbf16>, vector<8x144xbf16>, vector<1152x144xf32> -> vector<1152x144xf32>
    %9 = vector.extract_strided_slice %8 {offsets = [0, 0], sizes = [128, 16], strides = [1, 1]} : vector<1152x144xf32> to vector<128x16xf32>
    %10 = vector.extract_strided_slice %8 {offsets = [128, 16], sizes = [128, 16], strides = [1, 1]} : vector<1152x144xf32> to vector<128x16xf32>
    %11 = arith.addf %9, %10 : vector<128x16xf32>
    %12 = vector.extract_strided_slice %8 {offsets = [256, 32], sizes = [128, 16], strides = [1, 1]} : vector<1152x144xf32> to vector<128x16xf32>
    %13 = arith.addf %11, %12 : vector<128x16xf32>
    %14 = vector.extract_strided_slice %8 {offsets = [384, 48], sizes = [128, 16], strides = [1, 1]} : vector<1152x144xf32> to vector<128x16xf32>
    %15 = arith.addf %13, %14 : vector<128x16xf32>
    %16 = vector.extract_strided_slice %8 {offsets = [512, 64], sizes = [128, 16], strides = [1, 1]} : vector<1152x144xf32> to vector<128x16xf32>
    %17 = arith.addf %15, %16 : vector<128x16xf32>
    %18 = vector.extract_strided_slice %8 {offsets = [640, 80], sizes = [128, 16], strides = [1, 1]} : vector<1152x144xf32> to vector<128x16xf32>
    %19 = arith.addf %17, %18 : vector<128x16xf32>
    %20 = vector.extract_strided_slice %8 {offsets = [768, 96], sizes = [128, 16], strides = [1, 1]} : vector<1152x144xf32> to vector<128x16xf32>
    %21 = arith.addf %19, %20 : vector<128x16xf32>
    %22 = vector.extract_strided_slice %8 {offsets = [896, 112], sizes = [128, 16], strides = [1, 1]} : vector<1152x144xf32> to vector<128x16xf32>
    %23 = arith.addf %21, %22 : vector<128x16xf32>
    %24 = vector.extract_strided_slice %8 {offsets = [1024, 128], sizes = [128, 16], strides = [1, 1]} : vector<1152x144xf32> to vector<128x16xf32>
    %25 = arith.addf %23, %24 : vector<128x16xf32>
    %26 = vector.broadcast %3 : vector<1x16xf32> to vector<128x16xf32>
    %27 = arith.addf %25, %26 : vector<128x16xf32>
    %28 = arith.negf %27 : vector<128x16xf32>
    %29 = math.exp %28 : vector<128x16xf32>
    %cst_10 = arith.constant 1.000000e+00 : f32
    %30 = vector.broadcast %cst_10 : f32 to vector<128x16xf32>
    %31 = arith.addf %30, %29 : vector<128x16xf32>
    %32 = arith.divf %30, %31 : vector<128x16xf32>
    %33 = arith.mulf %27, %32 : vector<128x16xf32>
    %34 = arith.truncf %33 : vector<128x16xf32> to vector<128x16xbf16>
    %35 = vector.extract_strided_slice %0 {offsets = [1, 0], sizes = [1, 16], strides = [1, 1]} : vector<8x16xf32> to vector<1x16xf32>
    %c0_11 = arith.constant 0 : index
    %c0_12 = arith.constant 0 : index
    %36 = vector.load %arg3[%c0_11, %c0_12] : memref<288x128xbf16, #tpu.memory_space<vmem>>, vector<288x128xbf16>
    %cst_13 = arith.constant dense<0.000000e+00> : vector<288x16xf32>
    %37 = tpu.matmul %36, %34, %cst_13 {dimension_numbers = #tpu.dot_dimension_numbers<[1], [0], [0], [1], [0, 0, 1, 1], [], []>} : vector<288x128xbf16>, vector<128x16xbf16>, vector<288x16xf32> -> vector<288x16xf32>
    %38 = arith.truncf %37 : vector<288x16xf32> to vector<288x16xbf16>
    %c0_14 = arith.constant 0 : index
    %c0_15 = arith.constant 0 : index
    %39 = vector.load %arg4[%c0_14, %c0_15] : memref<16x144xbf16, #tpu.memory_space<vmem>>, vector<16x144xbf16>
    %cst_16 = arith.constant dense<0.000000e+00> : vector<288x144xf32>
    %40 = tpu.matmul %38, %39, %cst_16 {dimension_numbers = #tpu.dot_dimension_numbers<[1], [0], [0], [1], [0, 0, 1, 1], [], []>} : vector<288x16xbf16>, vector<16x144xbf16>, vector<288x144xf32> -> vector<288x144xf32>
    %41 = vector.extract_strided_slice %40 {offsets = [0, 0], sizes = [32, 16], strides = [1, 1]} : vector<288x144xf32> to vector<32x16xf32>
    %42 = vector.extract_strided_slice %40 {offsets = [32, 16], sizes = [32, 16], strides = [1, 1]} : vector<288x144xf32> to vector<32x16xf32>
    %43 = arith.addf %41, %42 : vector<32x16xf32>
    %44 = vector.extract_strided_slice %40 {offsets = [64, 32], sizes = [32, 16], strides = [1, 1]} : vector<288x144xf32> to vector<32x16xf32>
    %45 = arith.addf %43, %44 : vector<32x16xf32>
    %46 = vector.extract_strided_slice %40 {offsets = [96, 48], sizes = [32, 16], strides = [1, 1]} : vector<288x144xf32> to vector<32x16xf32>
    %47 = arith.addf %45, %46 : vector<32x16xf32>
    %48 = vector.extract_strided_slice %40 {offsets = [128, 64], sizes = [32, 16], strides = [1, 1]} : vector<288x144xf32> to vector<32x16xf32>
    %49 = arith.addf %47, %48 : vector<32x16xf32>
    %50 = vector.extract_strided_slice %40 {offsets = [160, 80], sizes = [32, 16], strides = [1, 1]} : vector<288x144xf32> to vector<32x16xf32>
    %51 = arith.addf %49, %50 : vector<32x16xf32>
    %52 = vector.extract_strided_slice %40 {offsets = [192, 96], sizes = [32, 16], strides = [1, 1]} : vector<288x144xf32> to vector<32x16xf32>
    %53 = arith.addf %51, %52 : vector<32x16xf32>
    %54 = vector.extract_strided_slice %40 {offsets = [224, 112], sizes = [32, 16], strides = [1, 1]} : vector<288x144xf32> to vector<32x16xf32>
    %55 = arith.addf %53, %54 : vector<32x16xf32>
    %56 = vector.extract_strided_slice %40 {offsets = [256, 128], sizes = [32, 16], strides = [1, 1]} : vector<288x144xf32> to vector<32x16xf32>
    %57 = arith.addf %55, %56 : vector<32x16xf32>
    %58 = vector.broadcast %35 : vector<1x16xf32> to vector<32x16xf32>
    %59 = arith.addf %57, %58 : vector<32x16xf32>
    %60 = arith.negf %59 : vector<32x16xf32>
    %61 = math.exp %60 : vector<32x16xf32>
    %cst_17 = arith.constant 1.000000e+00 : f32
    %62 = vector.broadcast %cst_17 : f32 to vector<32x16xf32>
    %63 = arith.addf %62, %61 : vector<32x16xf32>
    %64 = arith.divf %62, %63 : vector<32x16xf32>
    %65 = arith.mulf %59, %64 : vector<32x16xf32>
    %66 = arith.truncf %65 : vector<32x16xf32> to vector<32x16xbf16>
    %c0_18 = arith.constant 0 : index
    %c0_19 = arith.constant 0 : index
    %67 = vector.load %arg5[%c0_18, %c0_19] : memref<16x16xbf16, #tpu.memory_space<vmem>>, vector<16x16xbf16>
    %cst_20 = arith.constant dense<0.000000e+00> : vector<32x16xf32>
    %68 = tpu.matmul %66, %67, %cst_20 {dimension_numbers = #tpu.dot_dimension_numbers<[1], [0], [0], [1], [0, 0, 1, 1], [], []>} : vector<32x16xbf16>, vector<16x16xbf16>, vector<32x16xf32> -> vector<32x16xf32>
    %69 = vector.extract_strided_slice %0 {offsets = [2, 0], sizes = [1, 16], strides = [1, 1]} : vector<8x16xf32> to vector<1x16xf32>
    %70 = vector.broadcast %69 : vector<1x16xf32> to vector<32x16xf32>
    %71 = arith.addf %68, %70 : vector<32x16xf32>
    %72 = arith.negf %71 : vector<32x16xf32>
    %73 = math.exp %72 : vector<32x16xf32>
    %cst_21 = arith.constant 1.000000e+00 : f32
    %74 = vector.broadcast %cst_21 : f32 to vector<32x16xf32>
    %75 = arith.addf %74, %73 : vector<32x16xf32>
    %76 = arith.divf %74, %75 : vector<32x16xf32>
    %77 = arith.mulf %71, %76 : vector<32x16xf32>
    %78 = arith.addf %65, %77 : vector<32x16xf32>
    %79 = arith.truncf %78 : vector<32x16xf32> to vector<32x16xbf16>
    %80 = vector.extract_strided_slice %1 {offsets = [96, 0], sizes = [1, 128], strides = [1, 1]} : vector<104x128xf32> to vector<1x128xf32>
    %c0_22 = arith.constant 0 : index
    %c0_23 = arith.constant 0 : index
    %81 = vector.load %arg6[%c0_22, %c0_23] : memref<16x128xbf16, #tpu.memory_space<vmem>>, vector<16x128xbf16>
    %cst_24 = arith.constant dense<0.000000e+00> : vector<32x128xf32>
    %82 = tpu.matmul %79, %81, %cst_24 {dimension_numbers = #tpu.dot_dimension_numbers<[1], [0], [0], [1], [0, 0, 1, 1], [], []>} : vector<32x16xbf16>, vector<16x128xbf16>, vector<32x128xf32> -> vector<32x128xf32>
    %83 = vector.broadcast %80 : vector<1x128xf32> to vector<32x128xf32>
    %84 = arith.addf %82, %83 : vector<32x128xf32>
    %85 = arith.negf %84 : vector<32x128xf32>
    %86 = math.exp %85 : vector<32x128xf32>
    %cst_25 = arith.constant 1.000000e+00 : f32
    %87 = vector.broadcast %cst_25 : f32 to vector<32x128xf32>
    %88 = arith.addf %87, %86 : vector<32x128xf32>
    %89 = arith.divf %87, %88 : vector<32x128xf32>
    %90 = vector.extract_strided_slice %1 {offsets = [0, 0], sizes = [32, 128], strides = [1, 1]} : vector<104x128xf32> to vector<32x128xf32>
    %91 = vector.extract_strided_slice %1 {offsets = [32, 0], sizes = [32, 128], strides = [1, 1]} : vector<104x128xf32> to vector<32x128xf32>
    %92 = vector.extract_strided_slice %1 {offsets = [64, 0], sizes = [32, 128], strides = [1, 1]} : vector<104x128xf32> to vector<32x128xf32>
    %93 = arith.mulf %91, %89 : vector<32x128xf32>
    %94 = arith.addf %90, %93 : vector<32x128xf32>
    %95 = arith.mulf %89, %94 : vector<32x128xf32>
    %96 = arith.addf %95, %92 : vector<32x128xf32>
    %c0_26 = arith.constant 0 : index
    %c0_27 = arith.constant 0 : index
    %97 = vector.load %arg9[%c0_26, %c0_27] : memref<32x128xf32, #tpu.memory_space<vmem>>, vector<32x128xf32>
    tpu.vector_store %arg9[%c0_26, %c0_27], %96 {strides = array<i32>} : memref<32x128xf32, #tpu.memory_space<vmem>>, vector<32x128xf32>,
    return
  }
}

</mosaic_0001>

<bundles_post_ra>
// kernel: tpu_custom_call.1
= control target key start
LH: loop header
LB: loop body
LE: loop exit
PB: predicated region body
PF: predicated region fallthrough
CT: control target
= control target key end

     0   :  { %14 = vsyncpa [#allocation3], 0  ;;  %s8935_s0 = inlined_call_operand.vmem [shape: bf16[512,8], index: 0, kind: input, shape index: {}]   ;;  %s8936_s1 = inlined_call_operand.hbm [shape: bf16[1152,512], index: 1, kind: input, shape index: {}]   ;;  %s8937_s2 = inlined_call_operand.hbm [shape: bf16[8,144], index: 2, kind: input, shape index: {}]   ;;  %s8938_s3 = inlined_call_operand.hbm [shape: bf16[288,128], index: 3, kind: input, shape index: {}]   ;;  %s8939_s4 = inlined_call_operand.hbm [shape: bf16[16,144], index: 4, kind: input, shape index: {}]   ;;  %s8940_s5 = inlined_call_operand.hbm [shape: bf16[16,16], index: 5, kind: input, shape index: {}]   ;;  %s8941_s6 = inlined_call_operand.hbm [shape: bf16[16,128], index: 6, kind: input, shape index: {}]   ;;  %s8942_s7 = inlined_call_operand.hbm [shape: f32[8,16], index: 7, kind: input, shape index: {}]   ;;  %s8943_s8 = inlined_call_operand.hbm [shape: f32[104,128], index: 8, kind: input, shape index: {}]   ;;  %s8944_s9 = inlined_call_operand.hbm [shape: f32[32,128], index: 9, kind: output, shape index: {}]  }
   0x1   :  { %15 = vsyncpa [#allocation6], 0 }
   0x2   :  { %16 = vsyncpa [#allocation9], 0 }
   0x3   :  { %17 = vsyncpa [#allocation12], 0 }
   0x4   :  { %18 = vsyncpa [#allocation15], 0 }
   0x5   :  { %19 = vsyncpa [#allocation4], 0  ;;  %s7654_s30 = smov [#allocation5]   ;;  %s7655_s11 = smov [#allocation8]  }
   0x6   :  { %s40_s10 = sshll.u32 %s7654_s30, 4  ;;  %s61_s12 = sshll.u32 %s7655_s11, 4  ;;  %s41_s10 = int_to_ptr.vmem [resolvable:$true] %s40_s10  ;;  %s7725_s12 = int_to_ptr.vmem [resolvable:$true] %s61_s12 }
   0x7   :  { %s7444_s15 = scalar_lea.hbm %s8937_s2, 128 }
   0x8   :  { %p7445_p0 = scmp.ne.s32.totalorder %s8937_s2, %s7444_s15  ;;  %p7448_p1 = scmp.lt.u32.totalorder %s7444_s15, %s8937_s2 }
   0xa   :  { %p7450_p2 = pnand %p7448_p1, %p7445_p0 }
   0xc   :  { %7453 = shalt.err (!%p7450_p2)
}
   0xd   :  { %s7454_s20 = scalar_lea.vmem %s41_s10, 128  ;;  %p7459_p4 = scmp.lt.s32.totalorder %s41_s10, %s41_s10 }
   0xe   :  { %p7455_p3 = scmp.ne.s32.totalorder %s41_s10, %s7454_s20  ;;  %p7460_p5 = scmp.lt.s32.totalorder %s7454_s20, %s7454_s20 }
  0x10   :  { %p7461_p6 = por %p7460_p5, %p7459_p4 }
  0x12   :  { %p7462_p7 = pnand %p7461_p6, %p7455_p3 }
  0x14   :  { %7465 = shalt.err (!%p7462_p7)
}
  0x15   :  { %43 = dma.hbm_to_vmem [thread:$0]  %s8937_s2, 128, %s41_s10, [#allocation6]  }
  0x16   :  { %s7466_s25 = scalar_lea.hbm %s8939_s4, 256 }
  0x17   :  { %p7467_p8 = scmp.ne.s32.totalorder %s8939_s4, %s7466_s25  ;;  %p7470_p9 = scmp.lt.u32.totalorder %s7466_s25, %s8939_s4 }
  0x19   :  { %p7472_p10 = pnand %p7470_p9, %p7467_p8 }
  0x1b   :  { %7475 = shalt.err (!%p7472_p10)
}
  0x1c   :  { %s7476_s30 = scalar_lea.vmem %s7725_s12, 256  ;;  %p7481_p12 = scmp.lt.s32.totalorder %s7725_s12, %s7725_s12 }
  0x1d   :  { %p7477_p11 = scmp.ne.s32.totalorder %s7725_s12, %s7476_s30  ;;  %p7482_p13 = scmp.lt.s32.totalorder %s7476_s30, %s7476_s30 }
  0x1f   :  { %p7483_p0 = por %p7482_p13, %p7481_p12 }
  0x21   :  { %p7484_p1 = pnand %p7483_p0, %p7477_p11 }
  0x23   :  { %7487 = shalt.err (!%p7484_p1)
}
  0x24   :  { %s7656_s2 = smov 128   ;;  %s7657_s10 = smov 8  }
  0x25   :  { %67 = dma.hbm_to_vmem [thread:$0]  %s8939_s4, 256, %s7725_s12, [#allocation9], %s7656_s2, %s7656_s2, %s7657_s10  }
  0x26   :  { %s7658_s14 = smov [#allocation11]   ;;  %s7659_s16 = smov [#allocation2]  }
  0x27   :  { %s85_s15 = sshll.u32 %s7658_s14, 4  ;;  %s27_s17 = sshll.u32 %s7659_s16, 4  ;;  %s86_s15 = int_to_ptr.vmem [resolvable:$true] %s85_s15  ;;  %s7759_s17 = int_to_ptr.vmem [resolvable:$true] %s27_s17 }
  0x28   :  { %s7488_s20 = scalar_lea.hbm %s8941_s6, 128 }
  0x29   :  { %p7489_p2 = scmp.ne.s32.totalorder %s8941_s6, %s7488_s20  ;;  %p7492_p3 = scmp.lt.u32.totalorder %s7488_s20, %s8941_s6 }
  0x2b   :  { %p7494_p4 = pnand %p7492_p3, %p7489_p2 }
  0x2d   :  { %7497 = shalt.err (!%p7494_p4)
}
  0x2e   :  { %s7498_s4 = scalar_lea.vmem %s86_s15, 128  ;;  %p7503_p6 = scmp.lt.s32.totalorder %s86_s15, %s86_s15 }
  0x2f   :  { %p7499_p5 = scmp.ne.s32.totalorder %s86_s15, %s7498_s4  ;;  %p7504_p7 = scmp.lt.s32.totalorder %s7498_s4, %s7498_s4 }
  0x31   :  { %p7505_p8 = por %p7504_p7, %p7503_p6 }
  0x33   :  { %p7506_p9 = pnand %p7505_p8, %p7499_p5 }
  0x35   :  { %7509 = shalt.err (!%p7506_p9)
}
  0x36   :  { %s7660_s12 = smov 64   ;;  %s7661_s25 = smov 4  }
  0x37   :  { %91 = dma.hbm_to_vmem [thread:$0]  %s8941_s6, 128, %s86_s15, [#allocation12], %s7660_s12, %s7660_s12, %s7661_s25  }
  0x38   :  { %s7510_s30 = scalar_lea.hbm %s8936_s1, 36864 }
  0x39   :  { %p7511_p10 = scmp.ne.s32.totalorder %s8936_s1, %s7510_s30  ;;  %p7514_p11 = scmp.lt.u32.totalorder %s7510_s30, %s8936_s1 }
  0x3b   :  { %p7516_p12 = pnand %p7514_p11, %p7511_p10 }
  0x3d   :  { %7519 = shalt.err (!%p7516_p12)
}
  0x3e   :  { %s7520_s18 = scalar_lea.vmem %s7759_s17, 36864  ;;  %p7525_p0 = scmp.lt.s32.totalorder %s7759_s17, %s7759_s17 }
  0x3f   :  { %p7521_p13 = scmp.ne.s32.totalorder %s7759_s17, %s7520_s18  ;;  %p7526_p1 = scmp.lt.s32.totalorder %s7520_s18, %s7520_s18 }
  0x41   :  { %p7527_p2 = por %p7526_p1, %p7525_p0 }
  0x43   :  { %p7528_p3 = pnand %p7527_p2, %p7521_p13 }
  0x45   :  { %7531 = shalt.err (!%p7528_p3)
}
  0x46   :  { %s7662_s6 = smov 256   ;;  %s7663_s15 = smov 16  }
  0x47   :  { %33 = dma.hbm_to_vmem [thread:$0]  %s8936_s1, 36864, %s7759_s17, [#allocation3], %s7662_s6, %s7662_s6, %s7663_s15  }
  0x48   :  { %s7664_s21 = smov [#allocation7]   ;;  %s7665_s23 = smov [#allocation10]  }
  0x49   :  { %s49_s22 = sshll.u32 %s7664_s21, 4  ;;  %s73_s24 = sshll.u32 %s7665_s23, 4  ;;  %s50_s22 = int_to_ptr.vmem [resolvable:$true] %s49_s22  ;;  %s7794_s24 = int_to_ptr.vmem [resolvable:$true] %s73_s24 }
  0x4a   :  { %s7532_s27 = scalar_lea.hbm %s8938_s3, 2304 }
  0x4b   :  { %p7533_p4 = scmp.ne.s32.totalorder %s8938_s3, %s7532_s27  ;;  %p7536_p5 = scmp.lt.u32.totalorder %s7532_s27, %s8938_s3 }
  0x4d   :  { %p7538_p6 = pnand %p7536_p5, %p7533_p4 }
  0x4f   :  { %7541 = shalt.err (!%p7538_p6)
}
  0x50   :  { %s7542_s1 = scalar_lea.vmem %s50_s22, 2304  ;;  %p7547_p8 = scmp.lt.s32.totalorder %s50_s22, %s50_s22 }
  0x51   :  { %p7543_p7 = scmp.ne.s32.totalorder %s50_s22, %s7542_s1  ;;  %p7548_p9 = scmp.lt.s32.totalorder %s7542_s1, %s7542_s1 }
  0x53   :  { %p7549_p10 = por %p7548_p9, %p7547_p8 }
  0x55   :  { %p7550_p11 = pnand %p7549_p10, %p7543_p7 }
  0x57   :  { %7553 = shalt.err (!%p7550_p11)
}
  0x58   :  { %55 = dma.hbm_to_vmem [thread:$0]  %s8938_s3, 2304, %s50_s22, [#allocation6], %s7660_s12, %s7660_s12, %s7661_s25  }
  0x59   :  { %s7554_s18 = scalar_lea.hbm %s8940_s5, 128 }
  0x5a   :  { %p7555_p12 = scmp.ne.s32.totalorder %s8940_s5, %s7554_s18  ;;  %p7558_p13 = scmp.lt.u32.totalorder %s7554_s18, %s8940_s5 }
  0x5c   :  { %p7560_p0 = pnand %p7558_p13, %p7555_p12 }
  0x5e   :  { %7563 = shalt.err (!%p7560_p0)
}
  0x5f   :  { %s7564_s23 = scalar_lea.vmem %s7794_s24, 128  ;;  %p7569_p2 = scmp.lt.s32.totalorder %s7794_s24, %s7794_s24 }
  0x60   :  { %p7565_p1 = scmp.ne.s32.totalorder %s7794_s24, %s7564_s23  ;;  %p7570_p3 = scmp.lt.s32.totalorder %s7564_s23, %s7564_s23 }
  0x62   :  { %p7571_p4 = por %p7570_p3, %p7569_p2 }
  0x64   :  { %p7572_p5 = pnand %p7571_p4, %p7565_p1 }
  0x66   :  { %7575 = shalt.err (!%p7572_p5)
}
  0x67   :  { %79 = dma.hbm_to_vmem [thread:$0]  %s8940_s5, 128, %s7794_s24, [#allocation9], %s7660_s12, %s7660_s12, %s7661_s25  }
  0x68   :  { %s7666_s4 = smov [#allocation13]   ;;  %s7667_s27 = smov [#allocation14]  }
  0x69   :  { %s98_s26 = sshll.u32 %s7666_s4, 4  ;;  %s107_s28 = sshll.u32 %s7667_s27, 4  ;;  %s99_s26 = int_to_ptr.vmem [resolvable:$true] %s98_s26  ;;  %s7831_s28 = int_to_ptr.vmem [resolvable:$true] %s107_s28 }
  0x6a   :  { %s7576_s11 = scalar_lea.hbm %s8942_s7, 128 }
  0x6b   :  { %p7577_p6 = scmp.ne.s32.totalorder %s8942_s7, %s7576_s11  ;;  %p7580_p7 = scmp.lt.u32.totalorder %s7576_s11, %s8942_s7 }
  0x6d   :  { %p7582_p8 = pnand %p7580_p7, %p7577_p6 }
  0x6f   :  { %7585 = shalt.err (!%p7582_p8)
}
  0x70   :  { %s7586_s5 = scalar_lea.vmem %s99_s26, 128  ;;  %p7591_p10 = scmp.lt.s32.totalorder %s99_s26, %s99_s26 }
  0x71   :  { %p7587_p9 = scmp.ne.s32.totalorder %s99_s26, %s7586_s5  ;;  %p7592_p11 = scmp.lt.s32.totalorder %s7586_s5, %s7586_s5 }
  0x73   :  { %p7593_p12 = por %p7592_p11, %p7591_p10 }
  0x75   :  { %p7594_p13 = pnand %p7593_p12, %p7587_p9 }
  0x77   :  { %7597 = shalt.err (!%p7594_p13)
}
  0x78   :  { %101 = dma.hbm_to_vmem [thread:$0]  %s8942_s7, 128, %s99_s26, [#allocation12]  }
  0x79   :  { %s7598_s6 = scalar_lea.hbm %s8943_s8, 1664 }
  0x7a   :  { %p7599_p0 = scmp.ne.s32.totalorder %s8943_s8, %s7598_s6  ;;  %p7602_p1 = scmp.lt.u32.totalorder %s7598_s6, %s8943_s8 }
  0x7c   :  { %p7604_p2 = pnand %p7602_p1, %p7599_p0 }
  0x7e   :  { %7607 = shalt.err (!%p7604_p2)
}
  0x7f   :  { %s7608_s3 = scalar_lea.vmem %s7831_s28, 1664  ;;  %p7613_p4 = scmp.lt.s32.totalorder %s7831_s28, %s7831_s28 }
  0x80   :  { %p7609_p3 = scmp.ne.s32.totalorder %s7831_s28, %s7608_s3  ;;  %p7614_p5 = scmp.lt.s32.totalorder %s7608_s3, %s7608_s3 }
  0x82   :  { %p7615_p6 = por %p7614_p5, %p7613_p4 }
  0x84   :  { %p7616_p7 = pnand %p7615_p6, %p7609_p3 }
  0x86   :  { %7619 = shalt.err (!%p7616_p7)
}
  0x87   :  { %113 = dma.hbm_to_vmem [thread:$0]  %s8943_s8, 1664, %s7831_s28, [#allocation15], %s7656_s2, %s7656_s2, %s7657_s10  }
  0x88   :  { %7642 = dma.done.wait [#allocation3], 36864  }
  0x89   :  { %7643 = vsyncadd [#allocation3], 4294930432 }
  0x8a   :  { %7644 = dma.done.wait [#allocation6], 2432  }
  0x8b   :  { %7645 = vsyncadd [#allocation6], 4294964864 }
  0x8c   :  { %7646 = dma.done.wait [#allocation9], 384  }
  0x8d   :  { %7647 = vsyncadd [#allocation9], 4294966912 }
  0x8e   :  { %7648 = dma.done.wait [#allocation12], 256  }
  0x8f   :  { %7649 = vsyncadd [#allocation12], 4294967040 }
  0x90   :  { %7650 = dma.done.wait [#allocation15], 1664  }
  0x91   :  { %7651 = vsyncadd [#allocation15], 4294965632  ;;  %v7668_v0 = vmov 0   ;;  %v6842_v1 = vld [vmem:[%s8935_s0] sm:$0xff]   ;;  %v6843_v2 = vld [vmem:[%s8935_s0 + $0x8] sm:$0xff]   ;;  %vm3650_vm0 = vcmask 1043456  }
  0x92   :  { %2137 = vmatprep.subr.bf16.mxu0 %v7668_v0  ;;  %6543 = vmatprep.subr.bf16.mxu1 %v7668_v0  ;;  %v6844_v3 = vld [vmem:[%s8935_s0 + $0x10] sm:$0xff]   ;;  %v6845_v4 = vld [vmem:[%s8935_s0 + $0x18] sm:$0xff]   ;;  %v6846_v5 = vld [vmem:[%s8935_s0 + $0x20] sm:$0xff]   ;;  %vm3433_vm1 = vcmask 64512   ;;  %s7670_s24 = smov 96   ;;  %s7671_s16 = smov 80  }
  0x93   :  { %2138 = vmatpush1.bf16.msra.mxu0 %v6842_v1  ;;  %6559 = vmatpush1.bf16.msra.mxu1 %v6842_v1  ;;  %v6860_v6 = vld [vmem:[#allocation2 + $0x4] ss:$16 sps:$4 sm:$0xff]   ;;  %v6847_v7 = vld [vmem:[%s8935_s0 + $0x28] sm:$0xff]   ;;  %v6849_v9 = vld [vmem:[%s8935_s0 + $0x38] sm:$0xff]   ;;  %s7672_s18 = smov 48   ;;  %s7673_s6 = smov 32  }
  0x94   :  { %2139 = vmatprep.subr.bf16.mxu0 %v7668_v0  ;;  %6544 = vmatprep.subr.bf16.mxu1 %v7668_v0  ;;  %v6848_v8 = vld [vmem:[%s8935_s0 + $0x30] sm:$0xff]   ;;  %v6850_v10 = vld [vmem:[%s8935_s0 + $0x40] sm:$0xff]   ;;  %v6851_v11 = vld [vmem:[%s8935_s0 + $0x48] sm:$0xff]   ;;  %vm5333_vm2 = vcmask 130048  }
  0x95   :  { %2169 = vmatprep.mubr.bf16.mxu0 %v6860_v6  ;;  %v6852_v12 = vld [vmem:[%s8935_s0 + $0x50] sm:$0xff]   ;;  %v6853_v13 = vld [vmem:[%s8935_s0 + $0x58] sm:$0xff]   ;;  %v6854_v14 = vld [vmem:[%s8935_s0 + $0x60] sm:$0xff]  }
  0x96   :  { %v6855_v15 = vld [vmem:[%s8935_s0 + $0x68] sm:$0xff]   ;;  %v6856_v16 = vld [vmem:[%s8935_s0 + $0x70] sm:$0xff]   ;;  %v6857_v17 = vld [vmem:[%s8935_s0 + $0x78] sm:$0xff]  }
  0x97   :  { %2140 = vmatpush1.bf16.msra.mxu0 %v6843_v2  ;;  %6560 = vmatpush1.bf16.msra.mxu1 %v6843_v2  ;;  %v6858_v18 = vld [vmem:[#allocation2] ss:$16 sps:$4 sm:$0xff]   ;;  %v6861_v19 = vld [vmem:[#allocation2 + $0x24] ss:$16 sps:$4 sm:$0xff]  }
  0x98   :  { %2141 = vmatprep.subr.bf16.mxu0 %v7668_v0  ;;  %6545 = vmatprep.subr.bf16.mxu1 %v7668_v0  ;;  %v6863_v20 = vld [vmem:[#allocation2 + $0x20] ss:$16 sps:$4 sm:$0xff]   ;;  %v6864_v21 = vld [vmem:[#allocation2 + $0x44] ss:$16 sps:$4 sm:$0xff]  }
  0x99   :  { %v6866_v22 = vld [vmem:[#allocation2 + $0x40] ss:$16 sps:$4 sm:$0xff]   ;;  %v6867_v23 = vld [vmem:[#allocation2 + $0x64] ss:$16 sps:$4 sm:$0xff]  }
  0x9a   :  { %v6869_v24 = vld [vmem:[#allocation2 + $0x60] ss:$16 sps:$4 sm:$0xff]   ;;  %v6870_v25 = vld [vmem:[#allocation2 + $0x84] ss:$16 sps:$4 sm:$0xff]  }
  0x9b   :  { %2142 = vmatpush1.bf16.msra.mxu0 %v6844_v3  ;;  %6561 = vmatpush1.bf16.msra.mxu1 %v6844_v3  ;;  %v6872_v26 = vld [vmem:[#allocation2 + $0x80] ss:$16 sps:$4 sm:$0xff]   ;;  %v6873_v27 = vld [vmem:[#allocation2 + $0xa4] ss:$16 sps:$4 sm:$0xff]  }
  0x9c   :  { %2143 = vmatprep.subr.bf16.mxu0 %v7668_v0  ;;  %6546 = vmatprep.subr.bf16.mxu1 %v7668_v0  ;;  %v6875_v28 = vld [vmem:[#allocation2 + $0xa0] ss:$16 sps:$4 sm:$0xff]   ;;  %v6876_v29 = vld [vmem:[#allocation2 + $0xc4] ss:$16 sps:$4 sm:$0xff]  }
  0x9d   :  { %v6878_v30 = vld [vmem:[#allocation2 + $0xc0] ss:$16 sps:$4 sm:$0xff]   ;;  %v6879_v31 = vld [vmem:[#allocation2 + $0xe4] ss:$16 sps:$4 sm:$0xff]  }
  0x9e   :  { %v6881_v32 = vld [vmem:[#allocation2 + $0xe0] ss:$16 sps:$4 sm:$0xff]   ;;  %v6882_v33 = vld [vmem:[#allocation2 + $0x104] ss:$16 sps:$4 sm:$0xff]  }
  0x9f   :  { %2144 = vmatpush1.bf16.msra.mxu0 %v6845_v4  ;;  %6562 = vmatpush1.bf16.msra.mxu1 %v6845_v4  ;;  %v6884_v34 = vld [vmem:[#allocation2 + $0x100] ss:$16 sps:$4 sm:$0xff]   ;;  %v6885_v35 = vld [vmem:[#allocation2 + $0x124] ss:$16 sps:$4 sm:$0xff]  }
  0xa0   :  { %2145 = vmatprep.subr.bf16.mxu0 %v7668_v0  ;;  %6547 = vmatprep.subr.bf16.mxu1 %v7668_v0  ;;  %v6887_v36 = vld [vmem:[#allocation2 + $0x120] ss:$16 sps:$4 sm:$0xff]   ;;  %v6888_v37 = vld [vmem:[#allocation2 + $0x144] ss:$16 sps:$4 sm:$0xff]  }
  0xa1   :  { %v6890_v38 = vld [vmem:[#allocation2 + $0x140] ss:$16 sps:$4 sm:$0xff]   ;;  %v6891_v39 = vld [vmem:[#allocation2 + $0x164] ss:$16 sps:$4 sm:$0xff]  }
  0xa2   :  { %v6893_v40 = vld [vmem:[#allocation2 + $0x160] ss:$16 sps:$4 sm:$0xff]   ;;  %v6894_v41 = vld [vmem:[#allocation2 + $0x184] ss:$16 sps:$4 sm:$0xff]  }
  0xa3   :  { %2146 = vmatpush1.bf16.msra.mxu0 %v6846_v5  ;;  %6563 = vmatpush1.bf16.msra.mxu1 %v6846_v5  ;;  %v6896_v42 = vld [vmem:[#allocation2 + $0x180] ss:$16 sps:$4 sm:$0xff]   ;;  %v6897_v43 = vld [vmem:[#allocation2 + $0x1a4] ss:$16 sps:$4 sm:$0xff]  }
  0xa4   :  { %2147 = vmatprep.subr.bf16.mxu0 %v7668_v0  ;;  %6548 = vmatprep.subr.bf16.mxu1 %v7668_v0  ;;  %v6899_v44 = vld [vmem:[#allocation2 + $0x1a0] ss:$16 sps:$4 sm:$0xff]   ;;  %v6900_v45 = vld [vmem:[#allocation2 + $0x1c4] ss:$16 sps:$4 sm:$0xff]  }
  0xa5   :  { %v6902_v46 = vld [vmem:[#allocation2 + $0x1c0] ss:$16 sps:$4 sm:$0xff]   ;;  %v6903_v47 = vld [vmem:[#allocation2 + $0x1e4] ss:$16 sps:$4 sm:$0xff]  }
  0xa6   :  { %v6905_v48 = vld [vmem:[#allocation2 + $0x1e0] ss:$16 sps:$4 sm:$0xff]   ;;  %v6906_v49 = vld [vmem:[#allocation2 + $0x204] ss:$16 sps:$4 sm:$0xff]  }
  0xa7   :  { %2148 = vmatpush1.bf16.msra.mxu0 %v6847_v7  ;;  %6564 = vmatpush1.bf16.msra.mxu1 %v6847_v7  ;;  %v6908_v50 = vld [vmem:[#allocation2 + $0x200] ss:$16 sps:$4 sm:$0xff]   ;;  %v6909_v51 = vld [vmem:[#allocation2 + $0x224] ss:$16 sps:$4 sm:$0xff]  }
  0xa8   :  { %2149 = vmatprep.subr.bf16.mxu0 %v7668_v0  ;;  %6549 = vmatprep.subr.bf16.mxu1 %v7668_v0  ;;  %v6911_v52 = vld [vmem:[#allocation2 + $0x220] ss:$16 sps:$4 sm:$0xff]   ;;  %v6912_v53 = vld [vmem:[#allocation2 + $0x244] ss:$16 sps:$4 sm:$0xff]  }
  0xa9   :  { %v6914_v54 = vld [vmem:[#allocation2 + $0x240] ss:$16 sps:$4 sm:$0xff]   ;;  %v6915_v55 = vld [vmem:[#allocation2 + $0x264] ss:$16 sps:$4 sm:$0xff]  }
  0xaa   :  { %v6917_v56 = vld [vmem:[#allocation2 + $0x260] ss:$16 sps:$4 sm:$0xff]   ;;  %v6918_v57 = vld [vmem:[#allocation2 + $0x284] ss:$16 sps:$4 sm:$0xff]  }
  0xab   :  { %2150 = vmatpush1.bf16.msra.mxu0 %v6848_v8  ;;  %6565 = vmatpush1.bf16.msra.mxu1 %v6848_v8  ;;  %v6920_v58 = vld [vmem:[#allocation2 + $0x280] ss:$16 sps:$4 sm:$0xff]   ;;  %v6921_v59 = vld [vmem:[#allocation2 + $0x2a4] ss:$16 sps:$4 sm:$0xff]  }
  0xac   :  { %2151 = vmatprep.subr.bf16.mxu0 %v7668_v0  ;;  %6550 = vmatprep.subr.bf16.mxu1 %v7668_v0  ;;  %v6923_v60 = vld [vmem:[#allocation2 + $0x2a0] ss:$16 sps:$4 sm:$0xff]   ;;  %v6924_v61 = vld [vmem:[#allocation2 + $0x2c4] ss:$16 sps:$4 sm:$0xff]  }
  0xad   :  { %v6926_v62 = vld [vmem:[#allocation2 + $0x2c0] ss:$16 sps:$4 sm:$0xff]   ;;  %v6927_v63 = vld [vmem:[#allocation2 + $0x2e4] ss:$16 sps:$4 sm:$0xff]  }
  0xae   :  { %v6929_v1 = vld [vmem:[#allocation2 + $0x2e0] ss:$16 sps:$4 sm:$0xff]   ;;  %v6930_v2 = vld [vmem:[#allocation2 + $0x304] ss:$16 sps:$4 sm:$0xff]  }
  0xaf   :  { %2152 = vmatpush1.bf16.msra.mxu0 %v6849_v9  ;;  %6566 = vmatpush1.bf16.msra.mxu1 %v6849_v9  ;;  %v6932_v3 = vld [vmem:[#allocation2 + $0x300] ss:$16 sps:$4 sm:$0xff]   ;;  %v6933_v4 = vld [vmem:[#allocation2 + $0x324] ss:$16 sps:$4 sm:$0xff]  }
  0xb0   :  { %2153 = vmatprep.subr.bf16.mxu0 %v7668_v0  ;;  %6551 = vmatprep.subr.bf16.mxu1 %v7668_v0  ;;  %v6935_v5 = vld [vmem:[#allocation2 + $0x320] ss:$16 sps:$4 sm:$0xff]   ;;  %v6936_v6 = vld [vmem:[#allocation2 + $0x344] ss:$16 sps:$4 sm:$0xff]  }
  0xb1   :  { %v6938_v7 = vld [vmem:[#allocation2 + $0x340] ss:$16 sps:$4 sm:$0xff]   ;;  %v6939_v8 = vld [vmem:[#allocation2 + $0x364] ss:$16 sps:$4 sm:$0xff]  }
  0xb2   :  { %v6941_v9 = vld [vmem:[#allocation2 + $0x360] ss:$16 sps:$4 sm:$0xff]  }
  0xb3   :  { %2154 = vmatpush1.bf16.msra.mxu0 %v6850_v10  ;;  %6567 = vmatpush1.bf16.msra.mxu1 %v6850_v10  ;;  %v6942_v10 = vld [vmem:[#allocation2 + $0x384] ss:$16 sps:$4 sm:$0xff]  }
  0xb4   :  { %2155 = vmatprep.subr.bf16.mxu0 %v7668_v0  ;;  %6552 = vmatprep.subr.bf16.mxu1 %v7668_v0 }
  0xb7   :  { %2156 = vmatpush1.bf16.msra.mxu0 %v6851_v11  ;;  %6568 = vmatpush1.bf16.msra.mxu1 %v6851_v11  ;;  %v6990_v11 = vld [vmem:[%s8935_s0 + $0x80] sm:$0xff]  }
  0xb8   :  { %2157 = vmatprep.subr.bf16.mxu0 %v7668_v0  ;;  %6553 = vmatprep.subr.bf16.mxu1 %v7668_v0 }
  0xbb   :  { %2158 = vmatpush1.bf16.msra.mxu0 %v6852_v12  ;;  %6569 = vmatpush1.bf16.msra.mxu1 %v6852_v12  ;;  %v6991_v12 = vld [vmem:[%s8935_s0 + $0x88] sm:$0xff]  }
  0xbc   :  { %2159 = vmatprep.subr.bf16.mxu0 %v7668_v0  ;;  %6554 = vmatprep.subr.bf16.mxu1 %v7668_v0 }
  0xbf   :  { %2160 = vmatpush1.bf16.msra.mxu0 %v6853_v13  ;;  %6570 = vmatpush1.bf16.msra.mxu1 %v6853_v13  ;;  %v6944_v13 = vld [vmem:[#allocation2 + $0x380] ss:$16 sps:$4 sm:$0xff]  }
  0xc0   :  { %2161 = vmatprep.subr.bf16.mxu0 %v7668_v0  ;;  %6555 = vmatprep.subr.bf16.mxu1 %v7668_v0 }
  0xc3   :  { %2162 = vmatpush1.bf16.msra.mxu0 %v6854_v14  ;;  %6571 = vmatpush1.bf16.msra.mxu1 %v6854_v14  ;;  %v6945_v14 = vld [vmem:[#allocation2 + $0x3a4] ss:$16 sps:$4 sm:$0xff]  }
  0xc4   :  { %2163 = vmatprep.subr.bf16.mxu0 %v7668_v0  ;;  %6556 = vmatprep.subr.bf16.mxu1 %v7668_v0 }
  0xc7   :  { %2164 = vmatpush1.bf16.msra.mxu0 %v6855_v15  ;;  %6572 = vmatpush1.bf16.msra.mxu1 %v6855_v15  ;;  %v6995_v15 = vld [vmem:[%s8935_s0 + $0x90] sm:$0xff]  }
  0xc8   :  { %2165 = vmatprep.subr.bf16.mxu0 %v7668_v0  ;;  %6557 = vmatprep.subr.bf16.mxu1 %v7668_v0 }
  0xcb   :  { %2166 = vmatpush1.bf16.msra.mxu0 %v6856_v16  ;;  %6573 = vmatpush1.bf16.msra.mxu1 %v6856_v16  ;;  %v6996_v16 = vld [vmem:[%s8935_s0 + $0x98] sm:$0xff]  }
  0xcc   :  { %2167 = vmatprep.subr.bf16.mxu0 %v7668_v0  ;;  %6558 = vmatprep.subr.bf16.mxu1 %v7668_v0 }
  0xcf   :  { %2168 = vmatpush1.bf16.msra.mxu0 %v6857_v17  ;;  %6574 = vmatpush1.bf16.msra.mxu1 %v6857_v17  ;;  %v6947_v17 = vld [vmem:[#allocation2 + $0x3a0] ss:$16 sps:$4 sm:$0xff]  }
  0xd0   :  { %2746 = vmatprep.subr.bf16.mxu0 %v7668_v0 }
  0xd2   :  { %2170 = vmatmul.mubr.bf16.vlgmr.msra.gmra.mrb[0].mxu0 %v6858_v18  ;;  %v6948_v18 = vld [vmem:[#allocation2 + $0x3c4] ss:$16 sps:$4 sm:$0xff]  }
  0xd3   :  { %2177 = vmatprep.mubr.bf16.mxu0 %v6861_v19  ;;  %2747 = vmatpush1.bf16.msra.mxu0 %v6990_v11  ;;  %v7000_v19 = vld [vmem:[%s8935_s0 + $0xa0] sm:$0xff]  }
  0xd4   :  { %2748 = vmatprep.subr.bf16.mxu0 %v7668_v0  ;;  %v7077_v11 = vld [vmem:[#allocation2 + $0x700] ss:$16 sps:$4 sm:$0xff]  }
  0xd7   :  { %2749 = vmatpush1.bf16.msra.mxu0 %v6991_v12  ;;  %v7004_v12 = vld [vmem:[#allocation2 + $0x5c0] ss:$16 sps:$4 sm:$0xff]  }
  0xd8   :  { %2750 = vmatprep.subr.bf16.mxu0 %v7668_v0 }
  0xda   :  { %2178 = vmatmul.mubr.bf16.gmra.mrb[4].mxu0 %v6863_v20  ;;  %v7001_v20 = vld [vmem:[%s8935_s0 + $0xa8] sm:$0xff]  }
  0xdb   :  { %2185 = vmatprep.mubr.bf16.mxu0 %v6864_v21  ;;  %2751 = vmatpush1.bf16.msra.mxu0 %v6995_v15  ;;  %v6950_v21 = vld [vmem:[#allocation2 + $0x3c0] ss:$16 sps:$4 sm:$0xff]  }
  0xdc   :  { %2752 = vmatprep.subr.bf16.mxu0 %v7668_v0  ;;  %v7083_v15 = vld [vmem:[#allocation2 + $0x720] ss:$16 sps:$4 sm:$0xff]  }
  0xdf   :  { %2753 = vmatpush1.bf16.msra.mxu0 %v6996_v16  ;;  %v7009_v16 = vld [vmem:[#allocation2 + $0x5e0] ss:$16 sps:$4 sm:$0xff]  }
  0xe0   :  { %2754 = vmatprep.subr.bf16.mxu0 %v7668_v0 }
  0xe2   :  { %2186 = vmatmul.mubr.bf16.gmra.mrb[8].mxu0 %v6866_v22  ;;  %v6951_v22 = vld [vmem:[#allocation2 + $0x3e4] ss:$16 sps:$4 sm:$0xff]  }
  0xe3   :  { %2193 = vmatprep.mubr.bf16.mxu0 %v6867_v23  ;;  %2755 = vmatpush1.bf16.msra.mxu0 %v7000_v19  ;;  %v7005_v23 = vld [vmem:[%s8935_s0 + $0xb0] sm:$0xff]  }
  0xe4   :  { %2756 = vmatprep.subr.bf16.mxu0 %v7668_v0  ;;  %v7089_v19 = vld [vmem:[#allocation2 + $0x740] ss:$16 sps:$4 sm:$0xff]  }
  0xe7   :  { %2757 = vmatpush1.bf16.msra.mxu0 %v7001_v20  ;;  %v7014_v20 = vld [vmem:[#allocation2 + $0x600] ss:$16 sps:$4 sm:$0xff]  }
  0xe8   :  { %2758 = vmatprep.subr.bf16.mxu0 %v7668_v0 }
  0xea   :  { %2194 = vmatmul.mubr.bf16.gmra.mrb[12].mxu0 %v6869_v24  ;;  %v7006_v24 = vld [vmem:[%s8935_s0 + $0xb8] sm:$0xff]  }
  0xeb   :  { %2201 = vmatprep.mubr.bf16.mxu0 %v6870_v25  ;;  %2759 = vmatpush1.bf16.msra.mxu0 %v7005_v23  ;;  %v6953_v25 = vld [vmem:[#allocation2 + $0x3e0] ss:$16 sps:$4 sm:$0xff]  }
  0xec   :  { %2760 = vmatprep.subr.bf16.mxu0 %v7668_v0  ;;  %v7095_v23 = vld [vmem:[#allocation2 + $0x760] ss:$16 sps:$4 sm:$0xff]  }
  0xef   :  { %2761 = vmatpush1.bf16.msra.mxu0 %v7006_v24  ;;  %v7019_v24 = vld [vmem:[#allocation2 + $0x620] ss:$16 sps:$4 sm:$0xff]  }
  0xf0   :  { %2762 = vmatprep.subr.bf16.mxu0 %v7668_v0 }
  0xf2   :  { %2202 = vmatmul.mubr.bf16.gmra.mrb[16].mxu0 %v6872_v26  ;;  %v6954_v26 = vld [vmem:[#allocation2 + $0x404] ss:$16 sps:$4 sm:$0xff]  }
  0xf3   :  { %2209 = vmatprep.mubr.bf16.mxu0 %v6873_v27  ;;  %v7010_v27 = vld [vmem:[%s8935_s0 + $0xc0] sm:$0xff]  }
  0xf4   :  { %2763 = vmatpush1.bf16.msra.mxu0 %v7010_v27  ;;  %v7101_v27 = vld [vmem:[#allocation2 + $0x780] ss:$16 sps:$4 sm:$0xff]  }
  0xf5   :  { %2764 = vmatprep.subr.bf16.mxu0 %v7668_v0 }
  0xfa   :  { %2210 = vmatmul.mubr.bf16.gmra.mrb[20].mxu0 %v6875_v28  ;;  %v7011_v28 = vld [vmem:[%s8935_s0 + $0xc8] sm:$0xff]  }
  0xfb   :  { %2217 = vmatprep.mubr.bf16.mxu0 %v6876_v29  ;;  %v6956_v29 = vld [vmem:[#allocation2 + $0x400] ss:$16 sps:$4 sm:$0xff]   ;;  %2765 = vmatpush1.bf16.msra.mxu0 %v7011_v28 }
  0xfc   :  { %2766 = vmatprep.subr.bf16.mxu0 %v7668_v0  ;;  %v7024_v28 = vld [vmem:[#allocation2 + $0x640] ss:$16 sps:$4 sm:$0xff]  }
 0x102   :  { %2218 = vmatmul.mubr.bf16.gmra.mrb[24].mxu0 %v6878_v30  ;;  %v6957_v30 = vld [vmem:[#allocation2 + $0x424] ss:$16 sps:$4 sm:$0xff]  }
 0x103   :  { %2225 = vmatprep.mubr.bf16.mxu0 %v6879_v31  ;;  %v7015_v31 = vld [vmem:[%s8935_s0 + $0xd0] sm:$0xff]  }
 0x104   :  { %2767 = vmatpush1.bf16.msra.mxu0 %v7015_v31  ;;  %v7107_v31 = vld [vmem:[#allocation2 + $0x7a0] ss:$16 sps:$4 sm:$0xff]  }
 0x105   :  { %2768 = vmatprep.subr.bf16.mxu0 %v7668_v0 }
 0x10a   :  { %2226 = vmatmul.mubr.bf16.gmra.mrb[28].mxu0 %v6881_v32  ;;  %v7016_v32 = vld [vmem:[%s8935_s0 + $0xd8] sm:$0xff]  }
 0x10b   :  { %2233 = vmatprep.mubr.bf16.mxu0 %v6882_v33  ;;  %v6959_v33 = vld [vmem:[#allocation2 + $0x420] ss:$16 sps:$4 sm:$0xff]   ;;  %2769 = vmatpush1.bf16.msra.mxu0 %v7016_v32  ;;  %v7027_v32 = vld [vmem:[#allocation2 + $0x8] ss:$16 sps:$4 sm:$0xff]  }
 0x10c   :  { %2770 = vmatprep.subr.bf16.mxu0 %v7668_v0 }
 0x112   :  { %2234 = vmatmul.mubr.bf16.gmra.mrb[32].mxu0 %v6884_v34  ;;  %v6960_v34 = vld [vmem:[#allocation2 + $0x444] ss:$16 sps:$4 sm:$0xff]  }
 0x113   :  { %2241 = vmatprep.mubr.bf16.mxu0 %v6885_v35  ;;  %v7020_v35 = vld [vmem:[%s8935_s0 + $0xe0] sm:$0xff]  }
 0x114   :  { %2771 = vmatpush1.bf16.msra.mxu0 %v7020_v35  ;;  %v7113_v35 = vld [vmem:[#allocation2 + $0x7c0] ss:$16 sps:$4 sm:$0xff]  }
 0x115   :  { %2772 = vmatprep.subr.bf16.mxu0 %v7668_v0 }
 0x11a   :  { %2242 = vmatmul.mubr.bf16.gmra.mrb[36].mxu0 %v6887_v36  ;;  %v7021_v36 = vld [vmem:[%s8935_s0 + $0xe8] sm:$0xff]  }
 0x11b   :  { %2249 = vmatprep.mubr.bf16.mxu0 %v6888_v37  ;;  %v6962_v37 = vld [vmem:[#allocation2 + $0x440] ss:$16 sps:$4 sm:$0xff]   ;;  %2773 = vmatpush1.bf16.msra.mxu0 %v7021_v36  ;;  %v7032_v36 = vld [vmem:[#allocation2 + $0x28] ss:$16 sps:$4 sm:$0xff]  }
 0x11c   :  { %2774 = vmatprep.subr.bf16.mxu0 %v7668_v0 }
 0x122   :  { %2250 = vmatmul.mubr.bf16.gmra.mrb[40].mxu0 %v6890_v38  ;;  %v6963_v38 = vld [vmem:[#allocation2 + $0x464] ss:$16 sps:$4 sm:$0xff]  }
 0x123   :  { %2257 = vmatprep.mubr.bf16.mxu0 %v6891_v39  ;;  %v7025_v39 = vld [vmem:[%s8935_s0 + $0xf0] sm:$0xff]  }
 0x124   :  { %2775 = vmatpush1.bf16.msra.mxu0 %v7025_v39  ;;  %v7119_v39 = vld [vmem:[#allocation2 + $0x7e0] ss:$16 sps:$4 sm:$0xff]  }
 0x125   :  { %2776 = vmatprep.subr.bf16.mxu0 %v7668_v0 }
 0x12a   :  { %2258 = vmatmul.mubr.bf16.gmra.mrb[44].mxu0 %v6893_v40  ;;  %v7026_v40 = vld [vmem:[%s8935_s0 + $0xf8] sm:$0xff]   ;;  %s7669_s0 = smov 112  }
 0x12b   :  { %2265 = vmatprep.mubr.bf16.mxu0 %v6894_v41  ;;  %v6965_v41 = vld [vmem:[#allocation2 + $0x460] ss:$16 sps:$4 sm:$0xff]   ;;  %2777 = vmatpush1.bf16.msra.mxu0 %v7026_v40  ;;  %v7035_v40 = vld [vmem:[#allocation2 + $0x48] ss:$16 sps:$4 sm:$0xff]  }
 0x132   :  { %2266 = vmatmul.mubr.bf16.gmra.mrb[48].mxu0 %v6896_v42  ;;  %v6966_v42 = vld [vmem:[#allocation2 + $0x484] ss:$16 sps:$4 sm:$0xff]  }
 0x133   :  { %2273 = vmatprep.mubr.bf16.mxu0 %v6897_v43  ;;  %v6968_v43 = vld [vmem:[#allocation2 + $0x480] ss:$16 sps:$4 sm:$0xff]  }
 0x13a   :  { %2274 = vmatmul.mubr.bf16.gmra.mrb[52].mxu0 %v6899_v44  ;;  %v6969_v44 = vld [vmem:[#allocation2 + $0x4a4] ss:$16 sps:$4 sm:$0xff]  }
 0x13b   :  { %2281 = vmatprep.mubr.bf16.mxu0 %v6900_v45  ;;  %v6971_v45 = vld [vmem:[#allocation2 + $0x4a0] ss:$16 sps:$4 sm:$0xff]  }
 0x142   :  { %2282 = vmatmul.mubr.bf16.gmra.mrb[56].mxu0 %v6902_v46  ;;  %v6972_v46 = vld [vmem:[#allocation2 + $0x4c4] ss:$16 sps:$4 sm:$0xff]  }
 0x143   :  { %2289 = vmatprep.mubr.bf16.mxu0 %v6903_v47  ;;  %v6974_v47 = vld [vmem:[#allocation2 + $0x4c0] ss:$16 sps:$4 sm:$0xff]  }
 0x14a   :  { %2290 = vmatmul.mubr.bf16.gmra.mrb[60].mxu0 %v6905_v48  ;;  %v6975_v48 = vld [vmem:[#allocation2 + $0x4e4] ss:$16 sps:$4 sm:$0xff]  }
 0x14b   :  { %2297 = vmatprep.mubr.bf16.mxu0 %v6906_v49  ;;  %v6977_v49 = vld [vmem:[#allocation2 + $0x4e0] ss:$16 sps:$4 sm:$0xff]  }
 0x152   :  { %2298 = vmatmul.mubr.bf16.gmra.mrb[64].mxu0 %v6908_v50  ;;  %v6978_v50 = vld [vmem:[#allocation2 + $0x504] ss:$16 sps:$4 sm:$0xff]  }
 0x153   :  { %2305 = vmatprep.mubr.bf16.mxu0 %v6909_v51  ;;  %v6980_v51 = vld [vmem:[#allocation2 + $0x500] ss:$16 sps:$4 sm:$0xff]  }
 0x15a   :  { %2306 = vmatmul.mubr.bf16.gmra.mrb[68].mxu0 %v6911_v52  ;;  %v6981_v52 = vld [vmem:[#allocation2 + $0x524] ss:$16 sps:$4 sm:$0xff]  }
 0x15b   :  { %2313 = vmatprep.mubr.bf16.mxu0 %v6912_v53  ;;  %v7045_v53 = vld [vmem:[#allocation2 + $0x660] ss:$16 sps:$4 sm:$0xff]  }
 0x162   :  { %2314 = vmatmul.mubr.bf16.gmra.mrb[72].mxu0 %v6914_v54  ;;  %v7047_v54 = vld [vmem:[#allocation2 + $0x664] ss:$16 sps:$4 sm:$0xff]  }
 0x163   :  { %2321 = vmatprep.mubr.bf16.mxu0 %v6915_v55  ;;  %2577 = vmatprep.mubr.bf16.mxu1 %v7047_v54  ;;  %v6983_v55 = vld [vmem:[#allocation2 + $0x520] ss:$16 sps:$4 sm:$0xff]   ;;  %v7141_v54 = vld [vmem:[#allocation2 + $0x864] ss:$16 sps:$4 sm:$0xff]  }
 0x164   :  { %2578 = vmatmul.mubr.bf16.vlgmr.msra.gmra.mrb[0].mxu1 %v7045_v53  ;;  %v7048_v53 = vld [vmem:[#allocation2 + $0xcc] ss:$16 sps:$4 sm:$0xff]  }
 0x16a   :  { %2322 = vmatmul.mubr.bf16.gmra.mrb[76].mxu0 %v6917_v56  ;;  %v6984_v56 = vld [vmem:[#allocation2 + $0x544] ss:$16 sps:$4 sm:$0xff]  }
 0x16b   :  { %2329 = vmatprep.mubr.bf16.mxu0 %v6918_v57  ;;  %v7051_v57 = vld [vmem:[#allocation2 + $0x684] ss:$16 sps:$4 sm:$0xff]  }
 0x16c   :  { %2585 = vmatprep.mubr.bf16.mxu1 %v7051_v57  ;;  %v7054_v57 = vld [vmem:[#allocation2 + $0xec] ss:$16 sps:$4 sm:$0xff]  }
 0x172   :  { %2330 = vmatmul.mubr.bf16.gmra.mrb[80].mxu0 %v6920_v58  ;;  %v7053_v58 = vld [vmem:[#allocation2 + $0x680] ss:$16 sps:$4 sm:$0xff]  }
 0x173   :  { %2337 = vmatprep.mubr.bf16.mxu0 %v6921_v59  ;;  %2586 = vmatmul.mubr.bf16.gmra.mrb[4].mxu1 %v7053_v58  ;;  %v6986_v59 = vld [vmem:[#allocation2 + $0x540] ss:$16 sps:$4 sm:$0xff]   ;;  %v7147_v58 = vld [vmem:[#allocation2 + $0x884] ss:$16 sps:$4 sm:$0xff]  }
 0x17a   :  { %2338 = vmatmul.mubr.bf16.gmra.mrb[84].mxu0 %v6923_v60  ;;  %v6987_v60 = vld [vmem:[#allocation2 + $0x564] ss:$16 sps:$4 sm:$0xff]  }
 0x17b   :  { %2345 = vmatprep.mubr.bf16.mxu0 %v6924_v61  ;;  %v7057_v61 = vld [vmem:[#allocation2 + $0x6a4] ss:$16 sps:$4 sm:$0xff]  }
 0x17c   :  { %2593 = vmatprep.mubr.bf16.mxu1 %v7057_v61  ;;  %v7060_v61 = vld [vmem:[#allocation2 + $0x10c] ss:$16 sps:$4 sm:$0xff]  }
 0x182   :  { %2346 = vmatmul.mubr.bf16.gmra.mrb[88].mxu0 %v6926_v62  ;;  %v7059_v62 = vld [vmem:[#allocation2 + $0x6a0] ss:$16 sps:$4 sm:$0xff]  }
 0x183   :  { %2353 = vmatprep.mubr.bf16.mxu0 %v6927_v63  ;;  %2594 = vmatmul.mubr.bf16.gmra.mrb[8].mxu1 %v7059_v62  ;;  %v6989_v63 = vld [vmem:[#allocation2 + $0x560] ss:$16 sps:$4 sm:$0xff]   ;;  %v7153_v62 = vld [vmem:[#allocation2 + $0x8a4] ss:$16 sps:$4 sm:$0xff]  }
 0x18a   :  { %2354 = vmatmul.mubr.bf16.gmra.mrb[92].mxu0 %v6929_v1  ;;  %v6992_v1 = vld [vmem:[#allocation2 + $0x584] ss:$16 sps:$4 sm:$0xff]  }
 0x18b   :  { %2361 = vmatprep.mubr.bf16.mxu0 %v6930_v2  ;;  %v7063_v2 = vld [vmem:[#allocation2 + $0x6c4] ss:$16 sps:$4 sm:$0xff]  }
 0x18c   :  { %2601 = vmatprep.mubr.bf16.mxu1 %v7063_v2  ;;  %v7066_v2 = vld [vmem:[#allocation2 + $0x12c] ss:$16 sps:$4 sm:$0xff]  }
 0x192   :  { %2362 = vmatmul.mubr.bf16.gmra.mrb[96].mxu0 %v6932_v3  ;;  %v7065_v3 = vld [vmem:[#allocation2 + $0x6c0] ss:$16 sps:$4 sm:$0xff]  }
 0x193   :  { %2369 = vmatprep.mubr.bf16.mxu0 %v6933_v4  ;;  %2602 = vmatmul.mubr.bf16.gmra.mrb[12].mxu1 %v7065_v3  ;;  %v6994_v4 = vld [vmem:[#allocation2 + $0x580] ss:$16 sps:$4 sm:$0xff]   ;;  %v7159_v3 = vld [vmem:[#allocation2 + $0x8c4] ss:$16 sps:$4 sm:$0xff]  }
 0x19a   :  { %2370 = vmatmul.mubr.bf16.gmra.mrb[100].mxu0 %v6935_v5  ;;  %v6997_v5 = vld [vmem:[#allocation2 + $0x5a4] ss:$16 sps:$4 sm:$0xff]  }
 0x19b   :  { %2377 = vmatprep.mubr.bf16.mxu0 %v6936_v6  ;;  %v7069_v6 = vld [vmem:[#allocation2 + $0x6e4] ss:$16 sps:$4 sm:$0xff]  }
 0x19c   :  { %2609 = vmatprep.mubr.bf16.mxu1 %v7069_v6  ;;  %v7072_v6 = vld [vmem:[#allocation2 + $0x14c] ss:$16 sps:$4 sm:$0xff]  }
 0x1a2   :  { %2378 = vmatmul.mubr.bf16.gmra.mrb[104].mxu0 %v6938_v7  ;;  %v7071_v7 = vld [vmem:[#allocation2 + $0x6e0] ss:$16 sps:$4 sm:$0xff]  }
 0x1a3   :  { %2385 = vmatprep.mubr.bf16.mxu0 %v6939_v8  ;;  %2610 = vmatmul.mubr.bf16.gmra.mrb[16].mxu1 %v7071_v7  ;;  %v6999_v8 = vld [vmem:[#allocation2 + $0x5a0] ss:$16 sps:$4 sm:$0xff]   ;;  %v7165_v7 = vld [vmem:[#allocation2 + $0x8e4] ss:$16 sps:$4 sm:$0xff]  }
 0x1aa   :  { %2386 = vmatmul.mubr.bf16.gmra.mrb[108].mxu0 %v6941_v9  ;;  %v7002_v9 = vld [vmem:[#allocation2 + $0x5c4] ss:$16 sps:$4 sm:$0xff]  }
 0x1ab   :  { %2393 = vmatprep.mubr.bf16.mxu0 %v6942_v10  ;;  %v7075_v10 = vld [vmem:[#allocation2 + $0x704] ss:$16 sps:$4 sm:$0xff]  }
 0x1ac   :  { %2617 = vmatprep.mubr.bf16.mxu1 %v7075_v10  ;;  %v7078_v10 = vld [vmem:[#allocation2 + $0x16c] ss:$16 sps:$4 sm:$0xff]  }
 0x1ad   :  { %2618 = vmatmul.mubr.bf16.gmra.mrb[20].mxu1 %v7077_v11  ;;  %v3427_v11 = vld [vmem:[#allocation5] sm:$0xff] }
 0x1b2   :  { %2394 = vmatmul.mubr.bf16.gmra.mrb[112].mxu0 %v6944_v13  ;;  %v7007_v13 = vld [vmem:[#allocation2 + $0x5e4] ss:$16 sps:$4 sm:$0xff]  }
 0x1b3   :  { %2401 = vmatprep.mubr.bf16.mxu0 %v6945_v14  ;;  %v7081_v14 = vld [vmem:[#allocation2 + $0x724] ss:$16 sps:$4 sm:$0xff]  }
 0x1b4   :  { %2625 = vmatprep.mubr.bf16.mxu1 %v7081_v14  ;;  %v7080_v14 = vld [vmem:[#allocation2 + $0x168] ss:$16 sps:$4 sm:$0xff]  }
 0x1b5   :  { %2626 = vmatmul.mubr.bf16.gmra.mrb[24].mxu1 %v7083_v15 }
 0x1ba   :  { %2402 = vmatmul.mubr.bf16.gmra.mrb[116].mxu0 %v6947_v17  ;;  %v7012_v17 = vld [vmem:[#allocation2 + $0x604] ss:$16 sps:$4 sm:$0xff]  }
 0x1bb   :  { %2409 = vmatprep.mubr.bf16.mxu0 %v6948_v18  ;;  %v7087_v18 = vld [vmem:[#allocation2 + $0x744] ss:$16 sps:$4 sm:$0xff]  }
 0x1bc   :  { %2633 = vmatprep.mubr.bf16.mxu1 %v7087_v18  ;;  %v7090_v18 = vld [vmem:[#allocation2 + $0x1ac] ss:$16 sps:$4 sm:$0xff]  }
 0x1bd   :  { %2634 = vmatmul.mubr.bf16.gmra.mrb[28].mxu1 %v7089_v19  ;;  %v7092_v19 = vld [vmem:[#allocation2 + $0x1a8] ss:$16 sps:$4 sm:$0xff]  }
 0x1c2   :  { %2410 = vmatmul.mubr.bf16.gmra.mrb[120].mxu0 %v6950_v21  ;;  %v7017_v21 = vld [vmem:[#allocation2 + $0x624] ss:$16 sps:$4 sm:$0xff]  }
 0x1c3   :  { %2417 = vmatprep.mubr.bf16.mxu0 %v6951_v22  ;;  %v7093_v22 = vld [vmem:[#allocation2 + $0x764] ss:$16 sps:$4 sm:$0xff]  }
 0x1c4   :  { %2641 = vmatprep.mubr.bf16.mxu1 %v7093_v22  ;;  %v7102_v22 = vld [vmem:[#allocation2 + $0x1ec] ss:$16 sps:$4 sm:$0xff]  }
 0x1c5   :  { %2642 = vmatmul.mubr.bf16.gmra.mrb[32].mxu1 %v7095_v23  ;;  %v7104_v23 = vld [vmem:[#allocation2 + $0x1e8] ss:$16 sps:$4 sm:$0xff]  }
 0x1ca   :  { %2418 = vmatmul.mubr.bf16.gmra.mrb[124].mxu0 %v6953_v25  ;;  %v7022_v25 = vld [vmem:[#allocation2 + $0x644] ss:$16 sps:$4 sm:$0xff]  }
 0x1cb   :  { %2425 = vmatprep.mubr.bf16.mxu0 %v6954_v26  ;;  %v7099_v26 = vld [vmem:[#allocation2 + $0x784] ss:$16 sps:$4 sm:$0xff]  }
 0x1cc   :  { %2649 = vmatprep.mubr.bf16.mxu1 %v7099_v26  ;;  %v7114_v26 = vld [vmem:[#allocation2 + $0x22c] ss:$16 sps:$4 sm:$0xff]  }
 0x1cd   :  { %2650 = vmatmul.mubr.bf16.gmra.mrb[36].mxu1 %v7101_v27 }
 0x1d2   :  { %2426 = vmatmul.mubr.bf16.gmra.mrb[128].mxu0 %v6956_v29  ;;  %v7029_v29 = vld [vmem:[#allocation2 + $0xc] ss:$16 sps:$4 sm:$0xff]  }
 0x1d3   :  { %2433 = vmatprep.mubr.bf16.mxu0 %v6957_v30  ;;  %v7105_v30 = vld [vmem:[#allocation2 + $0x7a4] ss:$16 sps:$4 sm:$0xff]  }
 0x1d4   :  { %2657 = vmatprep.mubr.bf16.mxu1 %v7105_v30  ;;  %v7116_v30 = vld [vmem:[#allocation2 + $0x228] ss:$16 sps:$4 sm:$0xff]  }
 0x1d5   :  { %2658 = vmatmul.mubr.bf16.gmra.mrb[40].mxu1 %v7107_v31 }
 0x1da   :  { %2434 = vmatmul.mubr.bf16.gmra.mrb[132].mxu0 %v6959_v33  ;;  %v7030_v33 = vld [vmem:[#allocation2 + $0x2c] ss:$16 sps:$4 sm:$0xff]  }
 0x1db   :  { %2441 = vmatprep.mubr.bf16.mxu0 %v6960_v34  ;;  %v7111_v34 = vld [vmem:[#allocation2 + $0x7c4] ss:$16 sps:$4 sm:$0xff]  }
 0x1dc   :  { %2665 = vmatprep.mubr.bf16.mxu1 %v7111_v34 }
 0x1dd   :  { %2666 = vmatmul.mubr.bf16.gmra.mrb[44].mxu1 %v7113_v35 }
 0x1e2   :  { %2442 = vmatmul.mubr.bf16.gmra.mrb[136].mxu0 %v6962_v37  ;;  %v7033_v37 = vld [vmem:[#allocation2 + $0x4c] ss:$16 sps:$4 sm:$0xff]  }
 0x1e3   :  { %2449 = vmatprep.mubr.bf16.mxu0 %v6963_v38  ;;  %v7117_v38 = vld [vmem:[#allocation2 + $0x7e4] ss:$16 sps:$4 sm:$0xff]  }
 0x1e4   :  { %2673 = vmatprep.mubr.bf16.mxu1 %v7117_v38  ;;  %v7126_v38 = vld [vmem:[#allocation2 + $0x26c] ss:$16 sps:$4 sm:$0xff]  }
 0x1e5   :  { %2674 = vmatmul.mubr.bf16.gmra.mrb[48].mxu1 %v7119_v39 }
 0x1ea   :  { %2450 = vmatmul.mubr.bf16.gmra.mrb[140].mxu0 %v6965_v41  ;;  %v7036_v41 = vld [vmem:[#allocation2 + $0x6c] ss:$16 sps:$4 sm:$0xff]  }
 0x1eb   :  { %2457 = vmatprep.mubr.bf16.mxu0 %v6966_v42  ;;  %v7123_v42 = vld [vmem:[#allocation2 + $0x804] ss:$16 sps:$4 sm:$0xff]  }
 0x1ec   :  { %2681 = vmatprep.mubr.bf16.mxu1 %v7123_v42  ;;  %v7128_v42 = vld [vmem:[#allocation2 + $0x268] ss:$16 sps:$4 sm:$0xff]  }
 0x1f2   :  { %2458 = vmatmul.mubr.bf16.gmra.mrb[144].mxu0 %v6968_v43  ;;  %v7125_v43 = vld [vmem:[#allocation2 + $0x800] ss:$16 sps:$4 sm:$0xff]  }
 0x1f3   :  { %2465 = vmatprep.mubr.bf16.mxu0 %v6969_v44  ;;  %2682 = vmatmul.mubr.bf16.gmra.mrb[52].mxu1 %v7125_v43  ;;  %v7038_v44 = vld [vmem:[#allocation2 + $0x68] ss:$16 sps:$4 sm:$0xff]  }
 0x1fa   :  { %2466 = vmatmul.mubr.bf16.gmra.mrb[148].mxu0 %v6971_v45  ;;  %v7039_v45 = vld [vmem:[#allocation2 + $0x8c] ss:$16 sps:$4 sm:$0xff]  }
 0x1fb   :  { %2473 = vmatprep.mubr.bf16.mxu0 %v6972_v46  ;;  %v7129_v46 = vld [vmem:[#allocation2 + $0x824] ss:$16 sps:$4 sm:$0xff]  }
 0x1fc   :  { %2689 = vmatprep.mubr.bf16.mxu1 %v7129_v46 }
 0x202   :  { %2474 = vmatmul.mubr.bf16.gmra.mrb[152].mxu0 %v6974_v47  ;;  %v7131_v47 = vld [vmem:[#allocation2 + $0x820] ss:$16 sps:$4 sm:$0xff]  }
 0x203   :  { %2481 = vmatprep.mubr.bf16.mxu0 %v6975_v48  ;;  %2690 = vmatmul.mubr.bf16.gmra.mrb[56].mxu1 %v7131_v47  ;;  %v7041_v48 = vld [vmem:[#allocation2 + $0x88] ss:$16 sps:$4 sm:$0xff]  }
 0x20a   :  { %2482 = vmatmul.mubr.bf16.gmra.mrb[156].mxu0 %v6977_v49  ;;  %v7042_v49 = vld [vmem:[#allocation2 + $0xac] ss:$16 sps:$4 sm:$0xff]  }
 0x20b   :  { %2489 = vmatprep.mubr.bf16.mxu0 %v6978_v50  ;;  %v7135_v50 = vld [vmem:[#allocation2 + $0x844] ss:$16 sps:$4 sm:$0xff]  }
 0x20c   :  { %2697 = vmatprep.mubr.bf16.mxu1 %v7135_v50  ;;  %v7138_v50 = vld [vmem:[#allocation2 + $0x2ac] ss:$16 sps:$4 sm:$0xff]  }
 0x212   :  { %2490 = vmatmul.mubr.bf16.gmra.mrb[160].mxu0 %v6980_v51  ;;  %v7137_v51 = vld [vmem:[#allocation2 + $0x840] ss:$16 sps:$4 sm:$0xff]  }
 0x213   :  { %2497 = vmatprep.mubr.bf16.mxu0 %v6981_v52  ;;  %2698 = vmatmul.mubr.bf16.gmra.mrb[60].mxu1 %v7137_v51  ;;  %v7044_v52 = vld [vmem:[#allocation2 + $0xa8] ss:$16 sps:$4 sm:$0xff]  }
 0x214   :  { %2705 = vmatprep.mubr.bf16.mxu1 %v7141_v54  ;;  %v7140_v54 = vld [vmem:[#allocation2 + $0x2a8] ss:$16 sps:$4 sm:$0xff]  }
 0x21a   :  { %2498 = vmatmul.mubr.bf16.gmra.mrb[164].mxu0 %v6983_v55  ;;  %v7143_v55 = vld [vmem:[#allocation2 + $0x860] ss:$16 sps:$4 sm:$0xff]  }
 0x21b   :  { %2505 = vmatprep.mubr.bf16.mxu0 %v6984_v56  ;;  %2706 = vmatmul.mubr.bf16.gmra.mrb[64].mxu1 %v7143_v55  ;;  %v7050_v56 = vld [vmem:[#allocation2 + $0xc8] ss:$16 sps:$4 sm:$0xff]  }
 0x21c   :  { %2713 = vmatprep.mubr.bf16.mxu1 %v7147_v58 }
 0x222   :  { %2506 = vmatmul.mubr.bf16.gmra.mrb[168].mxu0 %v6986_v59  ;;  %v7149_v59 = vld [vmem:[#allocation2 + $0x880] ss:$16 sps:$4 sm:$0xff]  }
 0x223   :  { %2513 = vmatprep.mubr.bf16.mxu0 %v6987_v60  ;;  %2714 = vmatmul.mubr.bf16.gmra.mrb[68].mxu1 %v7149_v59  ;;  %v7056_v60 = vld [vmem:[#allocation2 + $0xe8] ss:$16 sps:$4 sm:$0xff]  }
 0x224   :  { %2721 = vmatprep.mubr.bf16.mxu1 %v7153_v62  ;;  %v7150_v62 = vld [vmem:[#allocation2 + $0x2ec] ss:$16 sps:$4 sm:$0xff]  }
 0x22a   :  { %2514 = vmatmul.mubr.bf16.gmra.mrb[172].mxu0 %v6989_v63  ;;  %v7155_v63 = vld [vmem:[#allocation2 + $0x8a0] ss:$16 sps:$4 sm:$0xff]  }
 0x22b   :  { %2521 = vmatprep.mubr.bf16.mxu0 %v6992_v1  ;;  %2722 = vmatmul.mubr.bf16.gmra.mrb[72].mxu1 %v7155_v63  ;;  %v7062_v1 = vld [vmem:[#allocation2 + $0x108] ss:$16 sps:$4 sm:$0xff]  }
 0x22c   :  { %2729 = vmatprep.mubr.bf16.mxu1 %v7159_v3  ;;  %v7152_v3 = vld [vmem:[#allocation2 + $0x2e8] ss:$16 sps:$4 sm:$0xff]  }
 0x232   :  { %2522 = vmatmul.mubr.bf16.gmra.mrb[176].mxu0 %v6994_v4  ;;  %v7161_v4 = vld [vmem:[#allocation2 + $0x8c0] ss:$16 sps:$4 sm:$0xff]  }
 0x233   :  { %2529 = vmatprep.mubr.bf16.mxu0 %v6997_v5  ;;  %2730 = vmatmul.mubr.bf16.gmra.mrb[76].mxu1 %v7161_v4  ;;  %v7068_v5 = vld [vmem:[#allocation2 + $0x128] ss:$16 sps:$4 sm:$0xff]  }
 0x234   :  { %2737 = vmatprep.mubr.bf16.mxu1 %v7165_v7 }
 0x237   :  { %v8010_v27 = vpop.f32.mrb[0].mxu1 }
 0x23a   :  { %2530 = vmatmul.mubr.bf16.gmra.mrb[180].mxu0 %v6999_v8  ;;  %v7167_v8 = vld [vmem:[#allocation2 + $0x8e0] ss:$16 sps:$4 sm:$0xff]  }
 0x23b   :  { %2537 = vmatprep.mubr.bf16.mxu0 %v7002_v9  ;;  %2738 = vmatmul.mubr.bf16.gmra.mrb[80].mxu1 %v7167_v8  ;;  %v7074_v9 = vld [vmem:[#allocation2 + $0x148] ss:$16 sps:$4 sm:$0xff]  }
 0x23c   :  { %3689 = vmatprep.mubr.bf16.mxu1 %v7668_v0 }
 0x242   :  { %2538 = vmatmul.mubr.bf16.gmra.mrb[184].mxu0 %v7004_v12  ;;  %v6301_v12 = vcombine.high %v3427_v11, %v3427_v11 }
 0x243   :  { %2545 = vmatprep.mubr.bf16.mxu0 %v7007_v13  ;;  %v6300_v13 = vcombine.low %v3427_v11, %v3427_v11  ;;  %v7162_v11 = vld [vmem:[#allocation2 + $0x32c] ss:$16 sps:$4 sm:$0xff]  }
 0x244   :  { %6302 = vmatprep.subr.msk.bf16.mxu1 %vm3650_vm0, %v6301_v12 }
 0x245   :  { %v3652_v15 = vsel %vm3650_vm0, %v6300_v13, 0 }
 0x246   :  { %3658 = vmatpush1.bf16.msra.mxu1 %v3652_v15  ;;  %v7164_v15 = vld [vmem:[#allocation2 + $0x328] ss:$16 sps:$4 sm:$0xff]  }
 0x24a   :  { %2546 = vmatmul.mubr.bf16.gmra.mrb[188].mxu0 %v7009_v16  ;;  %v7084_v16 = vld [vmem:[#allocation2 + $0x18c] ss:$16 sps:$4 sm:$0xff]  }
 0x24b   :  { %2553 = vmatprep.mubr.bf16.mxu0 %v7012_v17  ;;  %v7086_v17 = vld [vmem:[#allocation2 + $0x188] ss:$16 sps:$4 sm:$0xff]  }
 0x252   :  { %2554 = vmatmul.mubr.bf16.gmra.mrb[192].mxu0 %v7014_v20  ;;  %v7096_v20 = vld [vmem:[#allocation2 + $0x1cc] ss:$16 sps:$4 sm:$0xff]  }
 0x253   :  { %2561 = vmatprep.mubr.bf16.mxu0 %v7017_v21  ;;  %v7098_v21 = vld [vmem:[#allocation2 + $0x1c8] ss:$16 sps:$4 sm:$0xff]  }
 0x25a   :  { %2562 = vmatmul.mubr.bf16.gmra.mrb[196].mxu0 %v7019_v24  ;;  %v7108_v24 = vld [vmem:[#allocation2 + $0x20c] ss:$16 sps:$4 sm:$0xff]  }
 0x25b   :  { %2569 = vmatprep.mubr.bf16.mxu0 %v7022_v25  ;;  %v7110_v25 = vld [vmem:[#allocation2 + $0x208] ss:$16 sps:$4 sm:$0xff]  }
 0x262   :  { %2570 = vmatmul.mubr.bf16.gmra.mrb[200].mxu0 %v7024_v28  ;;  %v2581_v28 = vpop.f32.mrb[1].mxu1 }
 0x263   :  { %2778 = vmatprep.mubr.bf16.mxu0 %v7029_v29  ;;  %v8012_v29 = vpop.f32.mrb[2].mxu1 }
 0x264   :  { %v2584_v31 = vpop.f32.mrb[3].mxu1 }
 0x265   :  { %v7175_v31 = vld [vmem:[#allocation2 + $0x368] ss:$16 sps:$4 sm:$0xff]  }
 0x26a   :  { %2779 = vmatmul.mubr.bf16.vlgmr.msra.gmra.mrb[0].mxu0 %v7027_v32  ;;  %v7120_v32 = vld [vmem:[#allocation2 + $0x24c] ss:$16 sps:$4 sm:$0xff]  }
 0x26b   :  { %2786 = vmatprep.mubr.bf16.mxu0 %v7030_v33  ;;  %v8014_v33 = vpop.f32.mrb[4].mxu1 }
 0x26c   :  { %v2589_v34 = vpop.f32.mrb[5].mxu1 }
 0x26d   :  { %v8016_v35 = vpop.f32.mrb[6].mxu1 }
 0x272   :  { %2787 = vmatmul.mubr.bf16.gmra.mrb[4].mxu0 %v7032_v36  ;;  %v7122_v36 = vld [vmem:[#allocation2 + $0x248] ss:$16 sps:$4 sm:$0xff]  }
 0x273   :  { %2794 = vmatprep.mubr.bf16.mxu0 %v7033_v37  ;;  %v2592_v37 = vpop.f32.mrb[7].mxu1 }
 0x274   :  { %v8018_v39 = vpop.f32.mrb[8].mxu1 }
 0x27a   :  { %2795 = vmatmul.mubr.bf16.gmra.mrb[8].mxu0 %v7035_v40  ;;  %v2597_v40 = vpop.f32.mrb[9].mxu1 }
 0x27b   :  { %2802 = vmatprep.mubr.bf16.mxu0 %v7036_v41  ;;  %v8020_v41 = vpop.f32.mrb[10].mxu1 }
 0x27c   :  { %v2600_v43 = vpop.f32.mrb[11].mxu1 }
 0x282   :  { %2803 = vmatmul.mubr.bf16.gmra.mrb[12].mxu0 %v7038_v44  ;;  %v7132_v44 = vld [vmem:[#allocation2 + $0x28c] ss:$16 sps:$4 sm:$0xff]  }
 0x283   :  { %2810 = vmatprep.mubr.bf16.mxu0 %v7039_v45  ;;  %v8022_v45 = vpop.f32.mrb[12].mxu1 }
 0x284   :  { %v2605_v46 = vpop.f32.mrb[13].mxu1 }
 0x285   :  { %v8024_v47 = vpop.f32.mrb[14].mxu1 }
 0x28a   :  { %2811 = vmatmul.mubr.bf16.gmra.mrb[16].mxu0 %v7041_v48  ;;  %v7134_v48 = vld [vmem:[#allocation2 + $0x288] ss:$16 sps:$4 sm:$0xff]  }
 0x28b   :  { %2818 = vmatprep.mubr.bf16.mxu0 %v7042_v49  ;;  %v2608_v49 = vpop.f32.mrb[15].mxu1 }
 0x28c   :  { %v8026_v51 = vpop.f32.mrb[16].mxu1 }
 0x292   :  { %2819 = vmatmul.mubr.bf16.gmra.mrb[20].mxu0 %v7044_v52  ;;  %v2613_v52 = vpop.f32.mrb[17].mxu1 }
 0x293   :  { %2826 = vmatprep.mubr.bf16.mxu0 %v7048_v53  ;;  %v8028_v53 = vpop.f32.mrb[18].mxu1  ;;  %v7179_v52 = vld [vmem:[#allocation2 + $0x3ac] ss:$16 sps:$4 sm:$0xff]  }
 0x294   :  { %v2616_v55 = vpop.f32.mrb[19].mxu1 }
 0x29a   :  { %2827 = vmatmul.mubr.bf16.gmra.mrb[24].mxu0 %v7050_v56  ;;  %v7144_v56 = vld [vmem:[#allocation2 + $0x2cc] ss:$16 sps:$4 sm:$0xff]  }
 0x29b   :  { %2834 = vmatprep.mubr.bf16.mxu0 %v7054_v57  ;;  %v8030_v57 = vpop.f32.mrb[20].mxu1 }
 0x29c   :  { %v2621_v58 = vpop.f32.mrb[21].mxu1 }
 0x29d   :  { %v8032_v59 = vpop.f32.mrb[22].mxu1 }
 0x2a2   :  { %2835 = vmatmul.mubr.bf16.gmra.mrb[28].mxu0 %v7056_v60  ;;  %v7146_v60 = vld [vmem:[#allocation2 + $0x2c8] ss:$16 sps:$4 sm:$0xff]  }
 0x2a3   :  { %2842 = vmatprep.mubr.bf16.mxu0 %v7060_v61  ;;  %v2624_v61 = vpop.f32.mrb[23].mxu1 }
 0x2a4   :  { %v8034_v63 = vpop.f32.mrb[24].mxu1 }
 0x2aa   :  { %2843 = vmatmul.mubr.bf16.gmra.mrb[32].mxu0 %v7062_v1  ;;  %v2629_v1 = vpop.f32.mrb[25].mxu1 }
 0x2ab   :  { %2850 = vmatprep.mubr.bf16.mxu0 %v7066_v2  ;;  %v8036_v2 = vpop.f32.mrb[26].mxu1  ;;  %v7181_v1 = vld [vmem:[#allocation2 + $0x3a8] ss:$16 sps:$4 sm:$0xff]  }
 0x2ac   :  { %v2632_v4 = vpop.f32.mrb[27].mxu1 }
 0x2b2   :  { %2851 = vmatmul.mubr.bf16.gmra.mrb[36].mxu0 %v7068_v5  ;;  %v7156_v5 = vld [vmem:[#allocation2 + $0x30c] ss:$16 sps:$4 sm:$0xff]  }
 0x2b3   :  { %2858 = vmatprep.mubr.bf16.mxu0 %v7072_v6  ;;  %v8038_v6 = vpop.f32.mrb[28].mxu1 }
 0x2b4   :  { %v2637_v7 = vpop.f32.mrb[29].mxu1 }
 0x2b5   :  { %v8040_v8 = vpop.f32.mrb[30].mxu1 }
 0x2ba   :  { %2859 = vmatmul.mubr.bf16.gmra.mrb[40].mxu0 %v7074_v9  ;;  %v7158_v9 = vld [vmem:[#allocation2 + $0x308] ss:$16 sps:$4 sm:$0xff]  }
 0x2bb   :  { %2866 = vmatprep.mubr.bf16.mxu0 %v7078_v10  ;;  %v2640_v10 = vpop.f32.mrb[31].mxu1 }
 0x2bc   :  { %v8042_v12 = vpop.f32.mrb[32].mxu1 }
 0x2bd   :  { %v2645_v13 = vpop.f32.mrb[33].mxu1 }
 0x2c2   :  { %2867 = vmatmul.mubr.bf16.gmra.mrb[44].mxu0 %v7080_v14  ;;  %v8044_v14 = vpop.f32.mrb[34].mxu1 }
 0x2c3   :  { %2874 = vmatprep.mubr.bf16.mxu0 %v7084_v16  ;;  %v2648_v16 = vpop.f32.mrb[35].mxu1 }
 0x2ca   :  { %2875 = vmatmul.mubr.bf16.gmra.mrb[48].mxu0 %v7086_v17  ;;  %v7168_v17 = vld [vmem:[#allocation2 + $0x34c] ss:$16 sps:$4 sm:$0xff]  }
 0x2cb   :  { %2882 = vmatprep.mubr.bf16.mxu0 %v7090_v18  ;;  %v8046_v18 = vpop.f32.mrb[36].mxu1 }
 0x2d2   :  { %2883 = vmatmul.mubr.bf16.gmra.mrb[52].mxu0 %v7092_v19  ;;  %v2653_v19 = vpop.f32.mrb[37].mxu1 }
 0x2d3   :  { %2890 = vmatprep.mubr.bf16.mxu0 %v7096_v20  ;;  %v8048_v20 = vpop.f32.mrb[38].mxu1 }
 0x2da   :  { %2891 = vmatmul.mubr.bf16.gmra.mrb[56].mxu0 %v7098_v21  ;;  %v7170_v21 = vld [vmem:[#allocation2 + $0x348] ss:$16 sps:$4 sm:$0xff]  }
 0x2db   :  { %2898 = vmatprep.mubr.bf16.mxu0 %v7102_v22  ;;  %v2656_v22 = vpop.f32.mrb[39].mxu1 }
 0x2dc   :  { %v7185_v22 = vld [vmem:[#allocation2 + $0x3ec] ss:$16 sps:$4 sm:$0xff]  }
 0x2e2   :  { %2899 = vmatmul.mubr.bf16.gmra.mrb[60].mxu0 %v7104_v23  ;;  %v7173_v23 = vld [vmem:[#allocation2 + $0x36c] ss:$16 sps:$4 sm:$0xff]  }
 0x2e3   :  { %2906 = vmatprep.mubr.bf16.mxu0 %v7108_v24  ;;  %v8050_v24 = vpop.f32.mrb[40].mxu1 }
 0x2ea   :  { %2907 = vmatmul.mubr.bf16.gmra.mrb[64].mxu0 %v7110_v25  ;;  %v2661_v25 = vpop.f32.mrb[41].mxu1 }
 0x2eb   :  { %2914 = vmatprep.mubr.bf16.mxu0 %v7114_v26  ;;  %v8052_v28 = vpop.f32.mrb[42].mxu1 }
 0x2f2   :  { %2915 = vmatmul.mubr.bf16.gmra.mrb[68].mxu0 %v7116_v30 }
 0x2f3   :  { %2922 = vmatprep.mubr.bf16.mxu0 %v7120_v32  ;;  %v2664_v32 = vpop.f32.mrb[43].mxu1 }
 0x2f4   :  { %v8055_v40 = vpop.f32.mrb[44].mxu1 }
 0x2fa   :  { %2923 = vmatmul.mubr.bf16.gmra.mrb[72].mxu0 %v7122_v36  ;;  %v7176_v36 = vld [vmem:[#allocation2 + $0x38c] ss:$16 sps:$4 sm:$0xff]  }
 0x2fb   :  { %2930 = vmatprep.mubr.bf16.mxu0 %v7126_v38 }
 0x302   :  { %2931 = vmatmul.mubr.bf16.gmra.mrb[76].mxu0 %v7128_v42  ;;  %v2669_v42 = vpop.f32.mrb[45].mxu1 }
 0x303   :  { %2938 = vmatprep.mubr.bf16.mxu0 %v7132_v44  ;;  %v8058_v44 = vpop.f32.mrb[46].mxu1  ;;  %v7188_v42 = vld [vmem:[#allocation2 + $0x40c] ss:$16 sps:$4 sm:$0xff]  }
 0x304   :  { %v2672_v49 = vpop.f32.mrb[47].mxu1 }
 0x30a   :  { %2939 = vmatmul.mubr.bf16.gmra.mrb[80].mxu0 %v7134_v48  ;;  %v7178_v48 = vld [vmem:[#allocation2 + $0x388] ss:$16 sps:$4 sm:$0xff]  }
 0x30b   :  { %2946 = vmatprep.mubr.bf16.mxu0 %v7138_v50 }
 0x312   :  { %2947 = vmatmul.mubr.bf16.gmra.mrb[84].mxu0 %v7140_v54 }
 0x313   :  { %2954 = vmatprep.mubr.bf16.mxu0 %v7144_v56  ;;  %v8061_v56 = vpop.f32.mrb[48].mxu1 }
 0x314   :  { %v2677_v58 = vpop.f32.mrb[49].mxu1 }
 0x315   :  { %v8064_v61 = vpop.f32.mrb[50].mxu1 }
 0x31a   :  { %2955 = vmatmul.mubr.bf16.gmra.mrb[88].mxu0 %v7146_v60 }
 0x31b   :  { %2962 = vmatprep.mubr.bf16.mxu0 %v7150_v62 }
 0x322   :  { %2963 = vmatmul.mubr.bf16.gmra.mrb[92].mxu0 %v7152_v3  ;;  %v2680_v3 = vpop.f32.mrb[51].mxu1 }
 0x323   :  { %2970 = vmatprep.mubr.bf16.mxu0 %v7156_v5  ;;  %v7182_v5 = vld [vmem:[#allocation2 + $0x3cc] ss:$16 sps:$4 sm:$0xff]   ;;  %v8067_v10 = vpop.f32.mrb[52].mxu1 }
 0x32a   :  { %2971 = vmatmul.mubr.bf16.gmra.mrb[96].mxu0 %v7158_v9 }
 0x32b   :  { %2978 = vmatprep.mubr.bf16.mxu0 %v7162_v11  ;;  %v2685_v11 = vpop.f32.mrb[53].mxu1 }
 0x332   :  { %2979 = vmatmul.mubr.bf16.gmra.mrb[100].mxu0 %v7164_v15  ;;  %v8070_v15 = vpop.f32.mrb[54].mxu1 }
 0x333   :  { %2986 = vmatprep.mubr.bf16.mxu0 %v7168_v17  ;;  %v7184_v17 = vld [vmem:[#allocation2 + $0x3c8] ss:$16 sps:$4 sm:$0xff]   ;;  %v2688_v19 = vpop.f32.mrb[55].mxu1 }
 0x334   :  { %v7194_v19 = vld [vmem:[#allocation2 + $0x44c] ss:$16 sps:$4 sm:$0xff]  }
 0x33a   :  { %2987 = vmatmul.mubr.bf16.gmra.mrb[104].mxu0 %v7170_v21 }
 0x33b   :  { %2994 = vmatprep.mubr.bf16.mxu0 %v7173_v23 }
 0x33d   :  { %v2780_v26 = vpop.f32.mrb[0].mxu0 }
 0x33e   :  { %v2782_v30 = vpop.f32.mrb[1].mxu0 }
 0x33f   :  { %v2783_v34 = vpop.f32.mrb[2].mxu0 }
 0x340   :  { %v3355_v37 = vpack.c.bf16 %v2783_v34, %v2780_v26  ;;  %v2785_v38 = vpop.f32.mrb[3].mxu0  ;;  %v8073_v26 = vpop.f32.mrb[56].mxu1 }
 0x341   :  { %v2693_v30 = vpop.f32.mrb[57].mxu1 }
 0x342   :  { %2995 = vmatmul.mubr.bf16.gmra.mrb[108].mxu0 %v7175_v31  ;;  %6303 = vmatmul.mubr.msk.bf16.vlgmr.msra.gmra.mrb[84].mxu1 %vm3433_vm1, %v3355_v37  ;;  %v8076_v32 = vpop.f32.mrb[58].mxu1 }
 0x343   :  { %3002 = vmatprep.mubr.bf16.mxu0 %v7176_v36  ;;  %3697 = vmatprep.mubr.bf16.mxu1 %v7668_v0  ;;  %v7187_v36 = vld [vmem:[#allocation2 + $0x3e8] ss:$16 sps:$4 sm:$0xff]   ;;  %v2696_v37 = vpop.f32.mrb[59].mxu1 }
 0x345   :  { %v2788_v43 = vpop.f32.mrb[4].mxu0 }
 0x346   :  { %v2790_v46 = vpop.f32.mrb[5].mxu0 }
 0x347   :  { %v2791_v50 = vpop.f32.mrb[6].mxu0 }
 0x348   :  { %v3356_v54 = vpack.c.bf16 %v2791_v50, %v2788_v43  ;;  %v2793_v55 = vpop.f32.mrb[7].mxu0 }
 0x349   :  { %v7190_v55 = vld [vmem:[#allocation2 + $0x408] ss:$16 sps:$4 sm:$0xff]  }
 0x34a   :  { %3003 = vmatmul.mubr.bf16.gmra.mrb[112].mxu0 %v7178_v48  ;;  %6304 = vmatmul.mubr.msk.bf16.gmra.mrb[88].mxu1 %vm3433_vm1, %v3356_v54  ;;  %v8079_v48 = vpop.f32.mrb[60].mxu1 }
 0x34b   :  { %3010 = vmatprep.mubr.bf16.mxu0 %v7179_v52  ;;  %3705 = vmatprep.mubr.bf16.mxu1 %v7668_v0  ;;  %v2701_v49 = vpop.f32.mrb[61].mxu1 }
 0x34c   :  { %v8082_v52 = vpop.f32.mrb[62].mxu1 }
 0x34d   :  { %v2796_v60 = vpop.f32.mrb[8].mxu0  ;;  %v2704_v58 = vpop.f32.mrb[63].mxu1 }
 0x34e   :  { %v2798_v62 = vpop.f32.mrb[9].mxu0 }
 0x34f   :  { %v2799_v4 = vpop.f32.mrb[10].mxu0  ;;  %v7191_v62 = vld [vmem:[#allocation2 + $0x42c] ss:$16 sps:$4 sm:$0xff]  }
 0x350   :  { %v3357_v7 = vpack.c.bf16 %v2799_v4, %v2796_v60  ;;  %v2801_v9 = vpop.f32.mrb[11].mxu0  ;;  %v8085_v4 = vpop.f32.mrb[64].mxu1 }
 0x352   :  { %3011 = vmatmul.mubr.bf16.gmra.mrb[116].mxu0 %v7181_v1  ;;  %6305 = vmatmul.mubr.msk.bf16.gmra.mrb[92].mxu1 %vm3433_vm1, %v3357_v7 }
 0x353   :  { %3018 = vmatprep.mubr.bf16.mxu0 %v7182_v5  ;;  %3713 = vmatprep.mubr.bf16.mxu1 %v7668_v0  ;;  %v2709_v5 = vpop.f32.mrb[65].mxu1 }
 0x354   :  { %v8088_v9 = vpop.f32.mrb[66].mxu1 }
 0x355   :  { %v2804_v13 = vpop.f32.mrb[12].mxu0 }
 0x356   :  { %v2806_v16 = vpop.f32.mrb[13].mxu0 }
 0x357   :  { %v2807_v21 = vpop.f32.mrb[14].mxu0  ;;  %v2712_v16 = vpop.f32.mrb[67].mxu1 }
 0x358   :  { %v3358_v23 = vpack.c.bf16 %v2807_v21, %v2804_v13  ;;  %v2809_v25 = vpop.f32.mrb[15].mxu0  ;;  %v7193_v13 = vld [vmem:[#allocation2 + $0x428] ss:$16 sps:$4 sm:$0xff]  }
 0x35a   :  { %3019 = vmatmul.mubr.bf16.gmra.mrb[120].mxu0 %v7184_v17  ;;  %6306 = vmatmul.mubr.msk.bf16.gmra.mrb[96].mxu1 %vm3433_vm1, %v3358_v23  ;;  %v8091_v23 = vpop.f32.mrb[68].mxu1 }
 0x35b   :  { %3026 = vmatprep.mubr.bf16.mxu0 %v7185_v22  ;;  %3721 = vmatprep.mubr.bf16.mxu1 %v7668_v0  ;;  %v2717_v25 = vpop.f32.mrb[69].mxu1 }
 0x35d   :  { %v2812_v31 = vpop.f32.mrb[16].mxu0 }
 0x35e   :  { %v2814_v34 = vpop.f32.mrb[17].mxu0 }
 0x35f   :  { %v2815_v38 = vpop.f32.mrb[18].mxu0 }
 0x360   :  { %v3359_v43 = vpack.c.bf16 %v2815_v38, %v2812_v31  ;;  %v2817_v46 = vpop.f32.mrb[19].mxu0  ;;  %v8094_v31 = vpop.f32.mrb[70].mxu1 }
 0x361   :  { %v2720_v37 = vpop.f32.mrb[71].mxu1 }
 0x362   :  { %3027 = vmatmul.mubr.bf16.gmra.mrb[124].mxu0 %v7187_v36  ;;  %6307 = vmatmul.mubr.msk.bf16.gmra.mrb[100].mxu1 %vm3433_vm1, %v3359_v43  ;;  %v7196_v36 = vld [vmem:[#allocation2 + $0x448] ss:$16 sps:$4 sm:$0xff]   ;;  %v8097_v49 = vpop.f32.mrb[72].mxu1 }
 0x363   :  { %3034 = vmatprep.mubr.bf16.mxu0 %v7188_v42  ;;  %3729 = vmatprep.mubr.bf16.mxu1 %v7668_v0  ;;  %v7197_v42 = vld [vmem:[#allocation2 + $0x46c] ss:$16 sps:$4 sm:$0xff]  }
 0x365   :  { %v2820_v50 = vpop.f32.mrb[20].mxu0 }
 0x366   :  { %v2822_v54 = vpop.f32.mrb[21].mxu0 }
 0x367   :  { %v2823_v60 = vpop.f32.mrb[22].mxu0 }
 0x368   :  { %v3360_v1 = vpack.c.bf16 %v2823_v60, %v2820_v50  ;;  %v2825_v3 = vpop.f32.mrb[23].mxu0  ;;  %v2725_v50 = vpop.f32.mrb[73].mxu1  ;;  %v7199_v60 = vld [vmem:[#allocation2 + $0x468] ss:$16 sps:$4 sm:$0xff]  }
 0x369   :  { %v7200_v3 = vld [vmem:[#allocation2 + $0x48c] ss:$16 sps:$4 sm:$0xff]   ;;  %v7205_v50 = vld [vmem:[#allocation2 + $0x4a8] ss:$16 sps:$4 sm:$0xff]  }
 0x36a   :  { %3035 = vmatmul.mubr.bf16.gmra.mrb[128].mxu0 %v7190_v55  ;;  %6308 = vmatmul.mubr.msk.bf16.gmra.mrb[104].mxu1 %vm3433_vm1, %v3360_v1  ;;  %v8100_v55 = vpop.f32.mrb[74].mxu1 }
 0x36b   :  { %3042 = vmatprep.mubr.bf16.mxu0 %v7191_v62  ;;  %3737 = vmatprep.mubr.bf16.mxu1 %v7668_v0  ;;  %v2728_v62 = vpop.f32.mrb[75].mxu1 }
 0x36d   :  { %v2828_v7 = vpop.f32.mrb[24].mxu0 }
 0x36e   :  { %v2830_v11 = vpop.f32.mrb[25].mxu0 }
 0x36f   :  { %v2831_v17 = vpop.f32.mrb[26].mxu0  ;;  %v8103_v11 = vpop.f32.mrb[76].mxu1 }
 0x370   :  { %v3361_v21 = vpack.c.bf16 %v2831_v17, %v2828_v7  ;;  %v2833_v22 = vpop.f32.mrb[27].mxu0 }
 0x372   :  { %3043 = vmatmul.mubr.bf16.gmra.mrb[132].mxu0 %v7193_v13  ;;  %6309 = vmatmul.mubr.msk.bf16.gmra.mrb[108].mxu1 %vm3433_vm1, %v3361_v21  ;;  %v2733_v13 = vpop.f32.mrb[77].mxu1  ;;  %v7202_v21 = vld [vmem:[#allocation2 + $0x488] ss:$16 sps:$4 sm:$0xff]  }
 0x373   :  { %3050 = vmatprep.mubr.bf16.mxu0 %v7194_v19  ;;  %3745 = vmatprep.mubr.bf16.mxu1 %v7668_v0  ;;  %v8106_v17 = vpop.f32.mrb[78].mxu1 }
 0x374   :  { %v2736_v22 = vpop.f32.mrb[79].mxu1 }
 0x375   :  { %v2836_v30 = vpop.f32.mrb[28].mxu0  ;;  %v8109_v37 = vpop.f32.mrb[80].mxu1 }
 0x376   :  { %v2838_v34 = vpop.f32.mrb[29].mxu0 }
 0x377   :  { %v2839_v38 = vpop.f32.mrb[30].mxu0 }
 0x378   :  { %v3362_v43 = vpack.c.bf16 %v2839_v38, %v2836_v30  ;;  %v2841_v46 = vpop.f32.mrb[31].mxu0  ;;  %v7203_v30 = vld [vmem:[#allocation2 + $0x4ac] ss:$16 sps:$4 sm:$0xff]   ;;  %v2741_v38 = vpop.f32.mrb[81].mxu1 }
 0x37a   :  { %3051 = vmatmul.mubr.bf16.gmra.mrb[136].mxu0 %v7196_v36  ;;  %6310 = vmatmul.mubr.msk.bf16.gmra.mrb[112].mxu1 %vm3433_vm1, %v3362_v43  ;;  %v8112_v43 = vpop.f32.mrb[82].mxu1 }
 0x37b   :  { %3058 = vmatprep.mubr.bf16.mxu0 %v7197_v42  ;;  %3753 = vmatprep.mubr.bf16.mxu1 %v7668_v0 }
 0x37d   :  { %v2844_v54 = vpop.f32.mrb[32].mxu0 }
 0x37e   :  { %v2846_v58 = vpop.f32.mrb[33].mxu0 }
 0x37f   :  { %v2847_v1 = vpop.f32.mrb[34].mxu0 }
 0x380   :  { %v3363_v5 = vpack.c.bf16 %v2847_v1, %v2844_v54  ;;  %v2849_v7 = vpop.f32.mrb[35].mxu0  ;;  %v2744_v54 = vpop.f32.mrb[83].mxu1 }
 0x381   :  { %v7208_v7 = vld [vmem:[#allocation2 + $0x4c8] ss:$16 sps:$4 sm:$0xff]  }
 0x382   :  { %3059 = vmatmul.mubr.bf16.gmra.mrb[140].mxu0 %v7199_v60  ;;  %6311 = vmatmul.mubr.msk.bf16.gmra.mrb[116].mxu1 %vm3433_vm1, %v3363_v5  ;;  %v7206_v60 = vld [vmem:[#allocation2 + $0x4cc] ss:$16 sps:$4 sm:$0xff]   ;;  %v7214_v54 = vld [vmem:[#allocation2 + $0x508] ss:$16 sps:$4 sm:$0xff]  }
 0x383   :  { %3066 = vmatprep.mubr.bf16.mxu0 %v7200_v3  ;;  %3761 = vmatprep.mubr.bf16.mxu1 %v7668_v0 }
 0x385   :  { %v2852_v16 = vpop.f32.mrb[36].mxu0 }
 0x386   :  { %v2854_v19 = vpop.f32.mrb[37].mxu0 }
 0x387   :  { %v2855_v25 = vpop.f32.mrb[38].mxu0 }
 0x388   :  { %v3364_v34 = vpack.c.bf16 %v2855_v25, %v2852_v16  ;;  %v2857_v36 = vpop.f32.mrb[39].mxu0  ;;  %v7209_v16 = vld [vmem:[#allocation2 + $0x4ec] ss:$16 sps:$4 sm:$0xff]  }
 0x389   :  { %v7212_v36 = vld [vmem:[#allocation2 + $0x50c] ss:$16 sps:$4 sm:$0xff]  }
 0x38a   :  { %3067 = vmatmul.mubr.bf16.gmra.mrb[144].mxu0 %v7202_v21  ;;  %6312 = vmatmul.mubr.msk.bf16.gmra.mrb[120].mxu1 %vm3433_vm1, %v3364_v34 }
 0x38b   :  { %3074 = vmatprep.mubr.bf16.mxu0 %v7203_v30  ;;  %3769 = vmatprep.mubr.bf16.mxu1 %v7668_v0  ;;  %v7211_v30 = vld [vmem:[#allocation2 + $0x4e8] ss:$16 sps:$4 sm:$0xff]  }
 0x38d   :  { %v2860_v42 = vpop.f32.mrb[40].mxu0 }
 0x38e   :  { %v2862_v46 = vpop.f32.mrb[41].mxu0 }
 0x38f   :  { %v2863_v58 = vpop.f32.mrb[42].mxu0 }
 0x390   :  { %v3365_v62 = vpack.c.bf16 %v2863_v58, %v2860_v42  ;;  %v2865_v1 = vpop.f32.mrb[43].mxu0 }
 0x392   :  { %3075 = vmatmul.mubr.bf16.gmra.mrb[148].mxu0 %v7205_v50  ;;  %6313 = vmatmul.mubr.msk.bf16.gmra.mrb[124].mxu1 %vm3433_vm1, %v3365_v62 }
 0x393   :  { %3082 = vmatprep.mubr.bf16.mxu0 %v7206_v60  ;;  %3777 = vmatprep.mubr.bf16.mxu1 %v7668_v0  ;;  %v7215_v60 = vld [vmem:[#allocation2 + $0x52c] ss:$16 sps:$4 sm:$0xff]  }
 0x395   :  { %v2868_v3 = vpop.f32.mrb[44].mxu0 }
 0x396   :  { %v2870_v5 = vpop.f32.mrb[45].mxu0 }
 0x397   :  { %v2871_v13 = vpop.f32.mrb[46].mxu0 }
 0x398   :  { %v3366_v19 = vpack.c.bf16 %v2871_v13, %v2868_v3  ;;  %v2873_v21 = vpop.f32.mrb[47].mxu0 }
 0x39a   :  { %3083 = vmatmul.mubr.bf16.gmra.mrb[152].mxu0 %v7208_v7  ;;  %6314 = vmatmul.mubr.msk.bf16.gmra.mrb[128].mxu1 %vm3433_vm1, %v3366_v19  ;;  %v7217_v7 = vld [vmem:[#allocation2 + $0x528] ss:$16 sps:$4 sm:$0xff]  }
 0x39b   :  { %3090 = vmatprep.mubr.bf16.mxu0 %v7209_v16  ;;  %3785 = vmatprep.mubr.bf16.mxu1 %v7668_v0  ;;  %v7218_v16 = vld [vmem:[#allocation2 + $0x54c] ss:$16 sps:$4 sm:$0xff]  }
 0x39d   :  { %v2876_v22 = vpop.f32.mrb[48].mxu0 }
 0x39e   :  { %v2878_v25 = vpop.f32.mrb[49].mxu0 }
 0x39f   :  { %v2879_v34 = vpop.f32.mrb[50].mxu0 }
 0x3a0   :  { %v3367_v38 = vpack.c.bf16 %v2879_v34, %v2876_v22  ;;  %v2881_v42 = vpop.f32.mrb[51].mxu0 }
 0x3a2   :  { %3091 = vmatmul.mubr.bf16.gmra.mrb[156].mxu0 %v7211_v30  ;;  %6315 = vmatmul.mubr.msk.bf16.gmra.mrb[132].mxu1 %vm3433_vm1, %v3367_v38  ;;  %v7220_v30 = vld [vmem:[#allocation2 + $0x548] ss:$16 sps:$4 sm:$0xff]  }
 0x3a3   :  { %3098 = vmatprep.mubr.bf16.mxu0 %v7212_v36  ;;  %3793 = vmatprep.mubr.bf16.mxu1 %v7668_v0  ;;  %v7221_v36 = vld [vmem:[#allocation2 + $0x56c] ss:$16 sps:$4 sm:$0xff]  }
 0x3a5   :  { %v2884_v46 = vpop.f32.mrb[52].mxu0 }
 0x3a6   :  { %v2886_v50 = vpop.f32.mrb[53].mxu0 }
 0x3a7   :  { %v2887_v58 = vpop.f32.mrb[54].mxu0 }
 0x3a8   :  { %v3368_v62 = vpack.c.bf16 %v2887_v58, %v2884_v46  ;;  %v2889_v1 = vpop.f32.mrb[55].mxu0 }
 0x3aa   :  { %3099 = vmatmul.mubr.bf16.gmra.mrb[160].mxu0 %v7214_v54  ;;  %6316 = vmatmul.mubr.msk.bf16.gmra.mrb[136].mxu1 %vm3433_vm1, %v3368_v62  ;;  %v7223_v54 = vld [vmem:[#allocation2 + $0x568] ss:$16 sps:$4 sm:$0xff]  }
 0x3ab   :  { %3106 = vmatprep.mubr.bf16.mxu0 %v7215_v60  ;;  %3801 = vmatprep.mubr.bf16.mxu1 %v7668_v0  ;;  %v7224_v60 = vld [vmem:[#allocation2 + $0x58c] ss:$16 sps:$4 sm:$0xff]  }
 0x3ad   :  { %v2892_v3 = vpop.f32.mrb[56].mxu0 }
 0x3ae   :  { %v2894_v5 = vpop.f32.mrb[57].mxu0 }
 0x3af   :  { %v2895_v13 = vpop.f32.mrb[58].mxu0 }
 0x3b0   :  { %v3369_v19 = vpack.c.bf16 %v2895_v13, %v2892_v3  ;;  %v2897_v21 = vpop.f32.mrb[59].mxu0 }
 0x3b2   :  { %3107 = vmatmul.mubr.bf16.gmra.mrb[164].mxu0 %v7217_v7  ;;  %6317 = vmatmul.mubr.msk.bf16.gmra.mrb[140].mxu1 %vm3433_vm1, %v3369_v19  ;;  %v7226_v7 = vld [vmem:[#allocation2 + $0x588] ss:$16 sps:$4 sm:$0xff]  }
 0x3b3   :  { %3114 = vmatprep.mubr.bf16.mxu0 %v7218_v16  ;;  %3809 = vmatprep.mubr.bf16.mxu1 %v7668_v0  ;;  %v7227_v16 = vld [vmem:[#allocation2 + $0x5ac] ss:$16 sps:$4 sm:$0xff]  }
 0x3b5   :  { %v2900_v22 = vpop.f32.mrb[60].mxu0 }
 0x3b6   :  { %v2902_v25 = vpop.f32.mrb[61].mxu0 }
 0x3b7   :  { %v2903_v34 = vpop.f32.mrb[62].mxu0 }
 0x3b8   :  { %v3370_v38 = vpack.c.bf16 %v2903_v34, %v2900_v22  ;;  %v2905_v42 = vpop.f32.mrb[63].mxu0 }
 0x3ba   :  { %3115 = vmatmul.mubr.bf16.gmra.mrb[168].mxu0 %v7220_v30  ;;  %6318 = vmatmul.mubr.msk.bf16.gmra.mrb[144].mxu1 %vm3433_vm1, %v3370_v38  ;;  %v7229_v30 = vld [vmem:[#allocation2 + $0x5a8] ss:$16 sps:$4 sm:$0xff]  }
 0x3bb   :  { %3122 = vmatprep.mubr.bf16.mxu0 %v7221_v36  ;;  %3817 = vmatprep.mubr.bf16.mxu1 %v7668_v0  ;;  %v7230_v36 = vld [vmem:[#allocation2 + $0x5cc] ss:$16 sps:$4 sm:$0xff]  }
 0x3bd   :  { %v2908_v46 = vpop.f32.mrb[64].mxu0 }
 0x3be   :  { %v2910_v50 = vpop.f32.mrb[65].mxu0 }
 0x3bf   :  { %v2911_v58 = vpop.f32.mrb[66].mxu0 }
 0x3c0   :  { %v3371_v62 = vpack.c.bf16 %v2911_v58, %v2908_v46  ;;  %v2913_v1 = vpop.f32.mrb[67].mxu0 }
 0x3c2   :  { %3123 = vmatmul.mubr.bf16.gmra.mrb[172].mxu0 %v7223_v54  ;;  %6319 = vmatmul.mubr.msk.bf16.gmra.mrb[148].mxu1 %vm3433_vm1, %v3371_v62  ;;  %v7232_v54 = vld [vmem:[#allocation2 + $0x5c8] ss:$16 sps:$4 sm:$0xff]  }
 0x3c3   :  { %3130 = vmatprep.mubr.bf16.mxu0 %v7224_v60  ;;  %3825 = vmatprep.mubr.bf16.mxu1 %v7668_v0  ;;  %v7233_v60 = vld [vmem:[#allocation2 + $0x5ec] ss:$16 sps:$4 sm:$0xff]  }
 0x3c5   :  { %v2916_v3 = vpop.f32.mrb[68].mxu0 }
 0x3c6   :  { %v2918_v5 = vpop.f32.mrb[69].mxu0 }
 0x3c7   :  { %v2919_v13 = vpop.f32.mrb[70].mxu0 }
 0x3c8   :  { %v3372_v19 = vpack.c.bf16 %v2919_v13, %v2916_v3  ;;  %v2921_v21 = vpop.f32.mrb[71].mxu0 }
 0x3ca   :  { %3131 = vmatmul.mubr.bf16.gmra.mrb[176].mxu0 %v7226_v7  ;;  %6320 = vmatmul.mubr.msk.bf16.gmra.mrb[152].mxu1 %vm3433_vm1, %v3372_v19  ;;  %v7235_v7 = vld [vmem:[#allocation2 + $0x5e8] ss:$16 sps:$4 sm:$0xff]  }
 0x3cb   :  { %3138 = vmatprep.mubr.bf16.mxu0 %v7227_v16  ;;  %3833 = vmatprep.mubr.bf16.mxu1 %v7668_v0  ;;  %v7236_v16 = vld [vmem:[#allocation2 + $0x60c] ss:$16 sps:$4 sm:$0xff]  }
 0x3cd   :  { %v2924_v22 = vpop.f32.mrb[72].mxu0 }
 0x3ce   :  { %v2926_v25 = vpop.f32.mrb[73].mxu0 }
 0x3cf   :  { %v2927_v34 = vpop.f32.mrb[74].mxu0 }
 0x3d0   :  { %v3373_v38 = vpack.c.bf16 %v2927_v34, %v2924_v22  ;;  %v2929_v42 = vpop.f32.mrb[75].mxu0 }
 0x3d2   :  { %3139 = vmatmul.mubr.bf16.gmra.mrb[180].mxu0 %v7229_v30  ;;  %6321 = vmatmul.mubr.msk.bf16.gmra.mrb[156].mxu1 %vm3433_vm1, %v3373_v38  ;;  %v7238_v30 = vld [vmem:[#allocation2 + $0x608] ss:$16 sps:$4 sm:$0xff]  }
 0x3d3   :  { %3146 = vmatprep.mubr.bf16.mxu0 %v7230_v36  ;;  %3841 = vmatprep.mubr.bf16.mxu1 %v7668_v0  ;;  %v7239_v36 = vld [vmem:[#allocation2 + $0x62c] ss:$16 sps:$4 sm:$0xff]  }
 0x3d5   :  { %v2932_v46 = vpop.f32.mrb[76].mxu0 }
 0x3d6   :  { %v2934_v50 = vpop.f32.mrb[77].mxu0 }
 0x3d7   :  { %v2935_v58 = vpop.f32.mrb[78].mxu0 }
 0x3d8   :  { %v3374_v62 = vpack.c.bf16 %v2935_v58, %v2932_v46  ;;  %v2937_v1 = vpop.f32.mrb[79].mxu0 }
 0x3da   :  { %3147 = vmatmul.mubr.bf16.gmra.mrb[184].mxu0 %v7232_v54  ;;  %6322 = vmatmul.mubr.msk.bf16.gmra.mrb[160].mxu1 %vm3433_vm1, %v3374_v62  ;;  %v7241_v54 = vld [vmem:[#allocation2 + $0x628] ss:$16 sps:$4 sm:$0xff]  }
 0x3db   :  { %3154 = vmatprep.mubr.bf16.mxu0 %v7233_v60  ;;  %3849 = vmatprep.mubr.bf16.mxu1 %v7668_v0  ;;  %v7242_v60 = vld [vmem:[#allocation2 + $0x64c] ss:$16 sps:$4 sm:$0xff]  }
 0x3dd   :  { %v2940_v3 = vpop.f32.mrb[80].mxu0 }
 0x3de   :  { %v2942_v5 = vpop.f32.mrb[81].mxu0 }
 0x3df   :  { %v2943_v13 = vpop.f32.mrb[82].mxu0 }
 0x3e0   :  { %v3375_v19 = vpack.c.bf16 %v2943_v13, %v2940_v3  ;;  %v2945_v21 = vpop.f32.mrb[83].mxu0 }
 0x3e2   :  { %3155 = vmatmul.mubr.bf16.gmra.mrb[188].mxu0 %v7235_v7  ;;  %6323 = vmatmul.mubr.msk.bf16.gmra.mrb[164].mxu1 %vm3433_vm1, %v3375_v19  ;;  %v7244_v7 = vld [vmem:[#allocation2 + $0x648] ss:$16 sps:$4 sm:$0xff]  }
 0x3e3   :  { %3162 = vmatprep.mubr.bf16.mxu0 %v7236_v16  ;;  %3857 = vmatprep.mubr.bf16.mxu1 %v7668_v0  ;;  %v7245_v16 = vld [vmem:[#allocation2 + $0x66c] ss:$16 sps:$4 sm:$0xff]  }
 0x3e5   :  { %v2948_v22 = vpop.f32.mrb[84].mxu0 }
 0x3e6   :  { %v2950_v25 = vpop.f32.mrb[85].mxu0 }
 0x3e7   :  { %v2951_v34 = vpop.f32.mrb[86].mxu0 }
 0x3e8   :  { %v3376_v38 = vpack.c.bf16 %v2951_v34, %v2948_v22  ;;  %v2953_v42 = vpop.f32.mrb[87].mxu0 }
 0x3ea   :  { %3163 = vmatmul.mubr.bf16.gmra.mrb[192].mxu0 %v7238_v30  ;;  %6324 = vmatmul.mubr.msk.bf16.gmra.mrb[168].mxu1 %vm3433_vm1, %v3376_v38  ;;  %v7247_v30 = vld [vmem:[#allocation2 + $0x668] ss:$16 sps:$4 sm:$0xff]  }
 0x3eb   :  { %3170 = vmatprep.mubr.bf16.mxu0 %v7239_v36  ;;  %3865 = vmatprep.mubr.bf16.mxu1 %v7668_v0  ;;  %v7248_v36 = vld [vmem:[#allocation2 + $0x68c] ss:$16 sps:$4 sm:$0xff]  }
 0x3ed   :  { %v2956_v46 = vpop.f32.mrb[88].mxu0 }
 0x3ee   :  { %v2958_v50 = vpop.f32.mrb[89].mxu0 }
 0x3ef   :  { %v2959_v58 = vpop.f32.mrb[90].mxu0 }
 0x3f0   :  { %v3377_v62 = vpack.c.bf16 %v2959_v58, %v2956_v46  ;;  %v2961_v1 = vpop.f32.mrb[91].mxu0 }
 0x3f2   :  { %3171 = vmatmul.mubr.bf16.gmra.mrb[196].mxu0 %v7241_v54  ;;  %6325 = vmatmul.mubr.msk.bf16.gmra.mrb[172].mxu1 %vm3433_vm1, %v3377_v62  ;;  %v7250_v54 = vld [vmem:[#allocation2 + $0x688] ss:$16 sps:$4 sm:$0xff]  }
 0x3f3   :  { %3178 = vmatprep.mubr.bf16.mxu0 %v7242_v60  ;;  %3873 = vmatprep.mubr.bf16.mxu1 %v7668_v0  ;;  %v7251_v60 = vld [vmem:[#allocation2 + $0x6ac] ss:$16 sps:$4 sm:$0xff]  }
 0x3f5   :  { %v2964_v3 = vpop.f32.mrb[92].mxu0 }
 0x3f6   :  { %v2966_v5 = vpop.f32.mrb[93].mxu0 }
 0x3f7   :  { %v2967_v13 = vpop.f32.mrb[94].mxu0 }
 0x3f8   :  { %v3378_v19 = vpack.c.bf16 %v2967_v13, %v2964_v3  ;;  %v2969_v21 = vpop.f32.mrb[95].mxu0 }
 0x3fa   :  { %3179 = vmatmul.mubr.bf16.gmra.mrb[200].mxu0 %v7244_v7  ;;  %6326 = vmatmul.mubr.msk.bf16.gmra.mrb[176].mxu1 %vm3433_vm1, %v3378_v19  ;;  %v7253_v7 = vld [vmem:[#allocation2 + $0x6a8] ss:$16 sps:$4 sm:$0xff]  }
 0x3fb   :  { %3186 = vmatprep.mubr.bf16.mxu0 %v7245_v16  ;;  %3881 = vmatprep.mubr.bf16.mxu1 %v7668_v0  ;;  %v7254_v16 = vld [vmem:[#allocation2 + $0x6cc] ss:$16 sps:$4 sm:$0xff]  }
 0x3fd   :  { %v2972_v22 = vpop.f32.mrb[96].mxu0 }
 0x3fe   :  { %v2974_v25 = vpop.f32.mrb[97].mxu0 }
 0x3ff   :  { %v2975_v34 = vpop.f32.mrb[98].mxu0 }
 0x400   :  { %v3379_v38 = vpack.c.bf16 %v2975_v34, %v2972_v22  ;;  %v2977_v42 = vpop.f32.mrb[99].mxu0 }
 0x402   :  { %3187 = vmatmul.mubr.bf16.gmra.mrb[204].mxu0 %v7247_v30  ;;  %6327 = vmatmul.mubr.msk.bf16.gmra.mrb[180].mxu1 %vm3433_vm1, %v3379_v38 }
 0x403   :  { %3194 = vmatprep.mubr.bf16.mxu0 %v7248_v36  ;;  %3889 = vmatprep.mubr.bf16.mxu1 %v7668_v0  ;;  %v7256_v36 = vld [vmem:[#allocation2 + $0x6c8] ss:$16 sps:$4 sm:$0xff]  }
 0x405   :  { %v2980_v46 = vpop.f32.mrb[100].mxu0 }
 0x406   :  { %v2982_v50 = vpop.f32.mrb[101].mxu0 }
 0x407   :  { %v2983_v58 = vpop.f32.mrb[102].mxu0 }
 0x408   :  { %v3380_v62 = vpack.c.bf16 %v2983_v58, %v2980_v46  ;;  %v2985_v1 = vpop.f32.mrb[103].mxu0  ;;  %v7257_v46 = vld [vmem:[#allocation2 + $0x6ec] ss:$16 sps:$4 sm:$0xff]  }
 0x40a   :  { %3195 = vmatmul.mubr.bf16.gmra.mrb[208].mxu0 %v7250_v54  ;;  %6328 = vmatmul.mubr.msk.bf16.gmra.mrb[184].mxu1 %vm3433_vm1, %v3380_v62 }
 0x40b   :  { %3202 = vmatprep.mubr.bf16.mxu0 %v7251_v60  ;;  %3897 = vmatprep.mubr.bf16.mxu1 %v7668_v0 }
 0x40d   :  { %v2988_v3 = vpop.f32.mrb[104].mxu0 }
 0x40e   :  { %v2990_v5 = vpop.f32.mrb[105].mxu0 }
 0x40f   :  { %v2991_v13 = vpop.f32.mrb[106].mxu0  ;;  %v7259_v5 = vld [vmem:[#allocation2 + $0x6e8] ss:$16 sps:$4 sm:$0xff]  }
 0x410   :  { %v3381_v19 = vpack.c.bf16 %v2991_v13, %v2988_v3  ;;  %v2993_v21 = vpop.f32.mrb[107].mxu0 }
 0x412   :  { %3203 = vmatmul.mubr.bf16.gmra.mrb[212].mxu0 %v7253_v7  ;;  %6329 = vmatmul.mubr.msk.bf16.gmra.mrb[188].mxu1 %vm3433_vm1, %v3381_v19 }
 0x413   :  { %3210 = vmatprep.mubr.bf16.mxu0 %v7254_v16  ;;  %3905 = vmatprep.mubr.bf16.mxu1 %v7668_v0  ;;  %v7260_v16 = vld [vmem:[#allocation2 + $0x70c] ss:$16 sps:$4 sm:$0xff]  }
 0x415   :  { %v2996_v22 = vpop.f32.mrb[108].mxu0  ;;  %v8148_v25 = vpop.f32.mrb[84].mxu1 }
 0x416   :  { %8945 = vst [vmem:[#allocation23_spill] sm:$0xff] %v8148_v25  ;;  %v2998_v30 = vpop.f32.mrb[109].mxu0  ;;  %v3693_v34 = vpop.f32.mrb[85].mxu1  ;;  %v7281_v25 = vld [vmem:[#allocation2 + $0x7ec] ss:$16 sps:$4 sm:$0xff]  }
 0x417   :  { %v2999_v38 = vpop.f32.mrb[110].mxu0  ;;  %v8150_v42 = vpop.f32.mrb[86].mxu1 }
 0x418   :  { %8946 = vst [vmem:[#allocation24_spill] sm:$0xff] %v8150_v42  ;;  %v3382_v50 = vpack.c.bf16 %v2999_v38, %v2996_v22  ;;  %v3001_v54 = vpop.f32.mrb[111].mxu0  ;;  %v3696_v58 = vpop.f32.mrb[87].mxu1 }
 0x419   :  { %v7263_v58 = vld [vmem:[#allocation2 + $0x72c] ss:$16 sps:$4 sm:$0xff]  }
 0x41a   :  { %3211 = vmatmul.mubr.bf16.gmra.mrb[216].mxu0 %v7256_v36  ;;  %6330 = vmatmul.mubr.msk.bf16.gmra.mrb[192].mxu1 %vm3433_vm1, %v3382_v50 }
 0x41b   :  { %3218 = vmatprep.mubr.bf16.mxu0 %v7257_v46  ;;  %3913 = vmatprep.mubr.bf16.mxu1 %v7668_v0  ;;  %v7262_v46 = vld [vmem:[#allocation2 + $0x708] ss:$16 sps:$4 sm:$0xff]  }
 0x41d   :  { %v3004_v60 = vpop.f32.mrb[112].mxu0  ;;  %v8154_v62 = vpop.f32.mrb[88].mxu1 }
 0x41e   :  { %8947 = vst [vmem:[#allocation25_spill] sm:$0xff] %v8154_v62  ;;  %v3006_v1 = vpop.f32.mrb[113].mxu0  ;;  %v3701_v3 = vpop.f32.mrb[89].mxu1  ;;  %v7278_v62 = vld [vmem:[#allocation2 + $0x7cc] ss:$16 sps:$4 sm:$0xff]  }
 0x41f   :  { %v3007_v7 = vpop.f32.mrb[114].mxu0  ;;  %v8156_v13 = vpop.f32.mrb[90].mxu1 }
 0x420   :  { %8948 = vst [vmem:[#allocation26_spill] sm:$0xff] %v8156_v13  ;;  %v3383_v19 = vpack.c.bf16 %v3007_v7, %v3004_v60  ;;  %v3009_v21 = vpop.f32.mrb[115].mxu0  ;;  %v3704_v22 = vpop.f32.mrb[91].mxu1 }
 0x421   :  { %v7265_v21 = vld [vmem:[#allocation2 + $0x728] ss:$16 sps:$4 sm:$0xff]  }
 0x422   :  { %3219 = vmatmul.mubr.bf16.gmra.mrb[220].mxu0 %v7259_v5  ;;  %6331 = vmatmul.mubr.msk.bf16.gmra.mrb[196].mxu1 %vm3433_vm1, %v3383_v19 }
 0x423   :  { %3226 = vmatprep.mubr.bf16.mxu0 %v7260_v16  ;;  %3921 = vmatprep.mubr.bf16.mxu1 %v7668_v0 }
 0x425   :  { %v3012_v30 = vpop.f32.mrb[116].mxu0  ;;  %v8160_v34 = vpop.f32.mrb[92].mxu1 }
 0x426   :  { %8949 = vst [vmem:[#allocation27_spill] sm:$0xff] %v8160_v34  ;;  %v3014_v36 = vpop.f32.mrb[117].mxu0  ;;  %v3709_v38 = vpop.f32.mrb[93].mxu1  ;;  %v7275_v34 = vld [vmem:[#allocation2 + $0x7ac] ss:$16 sps:$4 sm:$0xff]  }
 0x427   :  { %v3015_v50 = vpop.f32.mrb[118].mxu0  ;;  %v8162_v54 = vpop.f32.mrb[94].mxu1  ;;  %v7266_v38 = vld [vmem:[#allocation2 + $0x74c] ss:$16 sps:$4 sm:$0xff]  }
 0x428   :  { %8950 = vst [vmem:[#allocation28_spill] sm:$0xff] %v8162_v54  ;;  %v3384_v1 = vpack.c.bf16 %v3015_v50, %v3012_v30  ;;  %v3017_v60 = vpop.f32.mrb[119].mxu0  ;;  %v3712_v3 = vpop.f32.mrb[95].mxu1 }
 0x429   :  { %v7268_v3 = vld [vmem:[#allocation2 + $0x748] ss:$16 sps:$4 sm:$0xff]  }
 0x42a   :  { %3227 = vmatmul.mubr.bf16.gmra.mrb[224].mxu0 %v7262_v46  ;;  %6332 = vmatmul.mubr.msk.bf16.gmra.mrb[200].mxu1 %vm3433_vm1, %v3384_v1 }
 0x42b   :  { %3234 = vmatprep.mubr.bf16.mxu0 %v7263_v58  ;;  %3929 = vmatprep.mubr.bf16.mxu1 %v7668_v0 }
 0x42d   :  { %v3020_v5 = vpop.f32.mrb[120].mxu0  ;;  %v8166_v7 = vpop.f32.mrb[96].mxu1 }
 0x42e   :  { %8951 = vst [vmem:[#allocation29_spill] sm:$0xff] %v8166_v7  ;;  %v3022_v16 = vpop.f32.mrb[121].mxu0  ;;  %v3717_v19 = vpop.f32.mrb[97].mxu1 }
 0x42f   :  { %v3023_v22 = vpop.f32.mrb[122].mxu0  ;;  %v8168_v36 = vpop.f32.mrb[98].mxu1 }
 0x430   :  { %8952 = vst [vmem:[#allocation30_spill] sm:$0xff] %v8168_v36  ;;  %v3385_v54 = vpack.c.bf16 %v3023_v22, %v3020_v5  ;;  %v3025_v30 = vpop.f32.mrb[123].mxu0  ;;  %v3720_v50 = vpop.f32.mrb[99].mxu1  ;;  %v7269_v36 = vld [vmem:[#allocation2 + $0x76c] ss:$16 sps:$4 sm:$0xff]  }
 0x431   :  { %v7271_v50 = vld [vmem:[#allocation2 + $0x768] ss:$16 sps:$4 sm:$0xff]  }
 0x432   :  { %3235 = vmatmul.mubr.bf16.gmra.mrb[228].mxu0 %v7265_v21  ;;  %6333 = vmatmul.mubr.msk.bf16.gmra.mrb[204].mxu1 %vm3433_vm1, %v3385_v54 }
 0x433   :  { %3242 = vmatprep.mubr.bf16.mxu0 %v7266_v38  ;;  %3937 = vmatprep.mubr.bf16.mxu1 %v7668_v0 }
 0x435   :  { %v3028_v46 = vpop.f32.mrb[124].mxu0  ;;  %v8172_v58 = vpop.f32.mrb[100].mxu1 }
 0x436   :  { %8953 = vst [vmem:[#allocation31_spill] sm:$0xff] %v8172_v58  ;;  %v3030_v1 = vpop.f32.mrb[125].mxu0  ;;  %v3725_v60 = vpop.f32.mrb[101].mxu1 }
 0x437   :  { %v3031_v16 = vpop.f32.mrb[126].mxu0  ;;  %v8174_v19 = vpop.f32.mrb[102].mxu1 }
 0x438   :  { %8954 = vst [vmem:[#allocation32_spill] sm:$0xff] %v8174_v19  ;;  %v3386_v7 = vpack.c.bf16 %v3031_v16, %v3028_v46  ;;  %v3033_v5 = vpop.f32.mrb[127].mxu0  ;;  %v3728_v22 = vpop.f32.mrb[103].mxu1  ;;  %v7272_v19 = vld [vmem:[#allocation2 + $0x78c] ss:$16 sps:$4 sm:$0xff]  }
 0x439   :  { %v7274_v22 = vld [vmem:[#allocation2 + $0x788] ss:$16 sps:$4 sm:$0xff]  }
 0x43a   :  { %3243 = vmatmul.mubr.bf16.gmra.mrb[232].mxu0 %v7268_v3  ;;  %6334 = vmatmul.mubr.msk.bf16.gmra.mrb[208].mxu1 %vm3433_vm1, %v3386_v7 }
 0x43b   :  { %3250 = vmatprep.mubr.bf16.mxu0 %v7269_v36  ;;  %3945 = vmatprep.mubr.bf16.mxu1 %v7668_v0 }
 0x43d   :  { %v3036_v54 = vpop.f32.mrb[128].mxu0  ;;  %v8178_v21 = vpop.f32.mrb[104].mxu1 }
 0x43e   :  { %v3038_v38 = vpop.f32.mrb[129].mxu0  ;;  %v3733_v30 = vpop.f32.mrb[105].mxu1 }
 0x43f   :  { %v3039_v1 = vpop.f32.mrb[130].mxu0  ;;  %v8180_v60 = vpop.f32.mrb[106].mxu1 }
 0x440   :  { %v3387_v58 = vpack.c.bf16 %v3039_v1, %v3036_v54  ;;  %v3041_v46 = vpop.f32.mrb[131].mxu0  ;;  %v3736_v16 = vpop.f32.mrb[107].mxu1 }
 0x441   :  { %v7277_v16 = vld [vmem:[#allocation2 + $0x7a8] ss:$16 sps:$4 sm:$0xff]  }
 0x442   :  { %3251 = vmatmul.mubr.bf16.gmra.mrb[236].mxu0 %v7271_v50  ;;  %6335 = vmatmul.mubr.msk.bf16.gmra.mrb[212].mxu1 %vm3433_vm1, %v3387_v58 }
 0x443   :  { %3258 = vmatprep.mubr.bf16.mxu0 %v7272_v19  ;;  %3953 = vmatprep.mubr.bf16.mxu1 %v7668_v0 }
 0x445   :  { %v3044_v7 = vpop.f32.mrb[132].mxu0  ;;  %v8184_v36 = vpop.f32.mrb[108].mxu1 }
 0x446   :  { %v3046_v3 = vpop.f32.mrb[133].mxu0  ;;  %v3741_v5 = vpop.f32.mrb[109].mxu1 }
 0x447   :  { %v3047_v38 = vpop.f32.mrb[134].mxu0  ;;  %v8186_v30 = vpop.f32.mrb[110].mxu1 }
 0x448   :  { %v3388_v13 = vpack.c.bf16 %v3047_v38, %v3044_v7  ;;  %v3049_v54 = vpop.f32.mrb[135].mxu0  ;;  %v3744_v1 = vpop.f32.mrb[111].mxu1 }
 0x449   :  { %v7280_v1 = vld [vmem:[#allocation2 + $0x7c8] ss:$16 sps:$4 sm:$0xff]  }
 0x44a   :  { %3259 = vmatmul.mubr.bf16.gmra.mrb[240].mxu0 %v7274_v22  ;;  %6336 = vmatmul.mubr.msk.bf16.gmra.mrb[216].mxu1 %vm3433_vm1, %v3388_v13 }
 0x44b   :  { %3266 = vmatprep.mubr.bf16.mxu0 %v7275_v34  ;;  %3961 = vmatprep.mubr.bf16.mxu1 %v7668_v0 }
 0x44d   :  { %v3052_v58 = vpop.f32.mrb[136].mxu0  ;;  %v8190_v19 = vpop.f32.mrb[112].mxu1 }
 0x44e   :  { %v3054_v50 = vpop.f32.mrb[137].mxu0  ;;  %v3749_v46 = vpop.f32.mrb[113].mxu1 }
 0x44f   :  { %v3055_v3 = vpop.f32.mrb[138].mxu0  ;;  %v8192_v5 = vpop.f32.mrb[114].mxu1 }
 0x450   :  { %v3389_v42 = vpack.c.bf16 %v3055_v3, %v3052_v58  ;;  %v3057_v7 = vpop.f32.mrb[139].mxu0  ;;  %v3752_v38 = vpop.f32.mrb[115].mxu1 }
 0x452   :  { %3267 = vmatmul.mubr.bf16.gmra.mrb[244].mxu0 %v7277_v16  ;;  %6337 = vmatmul.mubr.msk.bf16.gmra.mrb[220].mxu1 %vm3433_vm1, %v3389_v42 }
 0x453   :  { %3274 = vmatprep.mubr.bf16.mxu0 %v7278_v62  ;;  %3969 = vmatprep.mubr.bf16.mxu1 %v7668_v0 }
 0x455   :  { %v3060_v13 = vpop.f32.mrb[140].mxu0  ;;  %v3755_v34 = vpop.f32.mrb[116].mxu1 }
 0x456   :  { %4282 = vrot.lane.b32.xlu0 %v3755_v34, %s7669_s0  ;;  %v3062_v22 = vpop.f32.mrb[141].mxu0  ;;  %v3757_v54 = vpop.f32.mrb[117].mxu1  ;;  %v7283_v34 = vld [vmem:[#allocation2 + $0x7e8] ss:$16 sps:$4 sm:$0xff]  }
 0x457   :  { %v3063_v50 = vpop.f32.mrb[142].mxu0  ;;  %v3758_v46 = vpop.f32.mrb[118].mxu1 }
 0x458   :  { %v3390_v58 = vpack.c.bf16 %v3063_v50, %v3060_v13  ;;  %v3065_v3 = vpop.f32.mrb[143].mxu0  ;;  %v3760_v7 = vpop.f32.mrb[119].mxu1  ;;  %v7286_v13 = vld [vmem:[#allocation2 + $0x80c] ss:$16 sps:$4 sm:$0xff]  }
 0x45a   :  { %3275 = vmatmul.mubr.bf16.gmra.mrb[248].mxu0 %v7280_v1  ;;  %4284 = vrot.lane.b32.xlu0 %v3758_v46, %s7669_s0 }
 0x45b   :  { %6338 = vmatmul.mubr.msk.bf16.gmra.mrb[224].mxu1 %vm3433_vm1, %v3390_v58  ;;  %3282 = vmatprep.mubr.bf16.mxu0 %v7281_v25 }
 0x45c   :  { %3977 = vmatprep.mubr.bf16.mxu1 %v7668_v0 }
 0x45d   :  { %v3068_v42 = vpop.f32.mrb[144].mxu0  ;;  %v3763_v62 = vpop.f32.mrb[120].mxu1 }
 0x45e   :  { %4286 = vrot.lane.b32.xlu0 %v3763_v62, %s7669_s0  ;;  %v3070_v16 = vpop.f32.mrb[145].mxu0  ;;  %v3765_v38 = vpop.f32.mrb[121].mxu1  ;;  %v7284_v62 = vld [vmem:[#allocation2 + $0x808] ss:$16 sps:$4 sm:$0xff]  }
 0x45f   :  { %v3071_v22 = vpop.f32.mrb[146].mxu0  ;;  %v3766_v54 = vpop.f32.mrb[122].mxu1 }
 0x460   :  { %v3391_v50 = vpack.c.bf16 %v3071_v22, %v3068_v42  ;;  %4288 = vrot.lane.b32.xlu1 %v3766_v54, %s7669_s0  ;;  %v3073_v1 = vpop.f32.mrb[147].mxu0  ;;  %v3768_v46 = vpop.f32.mrb[123].mxu1  ;;  %v7289_v42 = vld [vmem:[#allocation2 + $0x82c] ss:$16 sps:$4 sm:$0xff]  }
 0x462   :  { %3283 = vmatmul.mubr.bf16.gmra.mrb[252].mxu0 %v7283_v34 }
 0x463   :  { %6339 = vmatmul.mubr.msk.bf16.gmra.mrb[228].mxu1 %vm3433_vm1, %v3391_v50  ;;  %3290 = vmatprep.mubr.bf16.mxu0 %v7286_v13 }
 0x464   :  { %3985 = vmatprep.mubr.bf16.mxu1 %v7668_v0 }
 0x465   :  { %v3076_v25 = vpop.f32.mrb[148].mxu0  ;;  %v3771_v58 = vpop.f32.mrb[124].mxu1 }
 0x466   :  { %4290 = vrot.lane.b32.xlu0 %v3771_v58, %s7669_s0  ;;  %v3078_v3 = vpop.f32.mrb[149].mxu0  ;;  %v3773_v7 = vpop.f32.mrb[125].mxu1  ;;  %v7287_v58 = vld [vmem:[#allocation2 + $0x828] ss:$16 sps:$4 sm:$0xff]  }
 0x467   :  { %v3079_v16 = vpop.f32.mrb[150].mxu0  ;;  %v3774_v38 = vpop.f32.mrb[126].mxu1 }
 0x468   :  { %v3392_v22 = vpack.c.bf16 %v3079_v16, %v3076_v25  ;;  %4292 = vrot.lane.b32.xlu1 %v3774_v38, %s7669_s0  ;;  %v3081_v54 = vpop.f32.mrb[151].mxu0  ;;  %v3776_v34 = vpop.f32.mrb[127].mxu1  ;;  %v7292_v25 = vld [vmem:[#allocation2 + $0x84c] ss:$16 sps:$4 sm:$0xff]  }
 0x46a   :  { %3291 = vmatmul.mubr.bf16.gmra.mrb[0].mxu0 %v7284_v62 }
 0x46b   :  { %6340 = vmatmul.mubr.msk.bf16.gmra.mrb[232].mxu1 %vm3433_vm1, %v3392_v22  ;;  %3298 = vmatprep.mubr.bf16.mxu0 %v7289_v42 }
 0x46c   :  { %3993 = vmatprep.mubr.bf16.mxu1 %v7668_v0 }
 0x46d   :  { %v3084_v13 = vpop.f32.mrb[152].mxu0  ;;  %v3779_v50 = vpop.f32.mrb[128].mxu1 }
 0x46e   :  { %4294 = vrot.lane.b32.xlu0 %v3779_v50, %s7669_s0  ;;  %v3086_v1 = vpop.f32.mrb[153].mxu0  ;;  %v3781_v46 = vpop.f32.mrb[129].mxu1  ;;  %v7290_v50 = vld [vmem:[#allocation2 + $0x848] ss:$16 sps:$4 sm:$0xff]  }
 0x46f   :  { %v3087_v3 = vpop.f32.mrb[154].mxu0  ;;  %v3782_v7 = vpop.f32.mrb[130].mxu1 }
 0x470   :  { %v3393_v16 = vpack.c.bf16 %v3087_v3, %v3084_v13  ;;  %4296 = vrot.lane.b32.xlu1 %v3782_v7, %s7669_s0  ;;  %v3089_v38 = vpop.f32.mrb[155].mxu0  ;;  %v3784_v62 = vpop.f32.mrb[131].mxu1  ;;  %v7295_v13 = vld [vmem:[#allocation2 + $0x86c] ss:$16 sps:$4 sm:$0xff]  }
 0x472   :  { %3299 = vmatmul.mubr.bf16.gmra.mrb[4].mxu0 %v7287_v58 }
 0x473   :  { %6341 = vmatmul.mubr.msk.bf16.gmra.mrb[236].mxu1 %vm3433_vm1, %v3393_v16  ;;  %3306 = vmatprep.mubr.bf16.mxu0 %v7292_v25 }
 0x474   :  { %4001 = vmatprep.mubr.bf16.mxu1 %v7668_v0 }
 0x475   :  { %v3092_v42 = vpop.f32.mrb[156].mxu0  ;;  %v3787_v22 = vpop.f32.mrb[132].mxu1 }
 0x476   :  { %4298 = vrot.lane.b32.xlu0 %v3787_v22, %s7669_s0  ;;  %v3094_v54 = vpop.f32.mrb[157].mxu0  ;;  %v3789_v34 = vpop.f32.mrb[133].mxu1  ;;  %v7293_v22 = vld [vmem:[#allocation2 + $0x868] ss:$16 sps:$4 sm:$0xff]  }
 0x477   :  { %v3095_v1 = vpop.f32.mrb[158].mxu0  ;;  %v3790_v46 = vpop.f32.mrb[134].mxu1 }
 0x478   :  { %v3394_v3 = vpack.c.bf16 %v3095_v1, %v3092_v42  ;;  %4300 = vrot.lane.b32.xlu1 %v3790_v46, %s7669_s0  ;;  %v3097_v7 = vpop.f32.mrb[159].mxu0  ;;  %v3792_v58 = vpop.f32.mrb[135].mxu1  ;;  %v7298_v42 = vld [vmem:[#allocation2 + $0x88c] ss:$16 sps:$4 sm:$0xff]  }
 0x47a   :  { %3307 = vmatmul.mubr.bf16.gmra.mrb[8].mxu0 %v7290_v50 }
 0x47b   :  { %6342 = vmatmul.mubr.msk.bf16.gmra.mrb[240].mxu1 %vm3433_vm1, %v3394_v3  ;;  %3314 = vmatprep.mubr.bf16.mxu0 %v7295_v13 }
 0x47c   :  { %4009 = vmatprep.mubr.bf16.mxu1 %v7668_v0 }
 0x47d   :  { %v3100_v25 = vpop.f32.mrb[160].mxu0  ;;  %v3795_v16 = vpop.f32.mrb[136].mxu1 }
 0x47e   :  { %4302 = vrot.lane.b32.xlu0 %v3795_v16, %s7669_s0  ;;  %v3102_v38 = vpop.f32.mrb[161].mxu0  ;;  %v3797_v62 = vpop.f32.mrb[137].mxu1  ;;  %v7296_v16 = vld [vmem:[#allocation2 + $0x888] ss:$16 sps:$4 sm:$0xff]  }
 0x47f   :  { %v3103_v54 = vpop.f32.mrb[162].mxu0  ;;  %v3798_v34 = vpop.f32.mrb[138].mxu1 }
 0x480   :  { %v3395_v1 = vpack.c.bf16 %v3103_v54, %v3100_v25  ;;  %4304 = vrot.lane.b32.xlu1 %v3798_v34, %s7669_s0  ;;  %v3105_v46 = vpop.f32.mrb[163].mxu0  ;;  %v3800_v50 = vpop.f32.mrb[139].mxu1  ;;  %v7301_v25 = vld [vmem:[#allocation2 + $0x8ac] ss:$16 sps:$4 sm:$0xff]  }
 0x482   :  { %3315 = vmatmul.mubr.bf16.gmra.mrb[12].mxu0 %v7293_v22 }
 0x483   :  { %6343 = vmatmul.mubr.msk.bf16.gmra.mrb[244].mxu1 %vm3433_vm1, %v3395_v1  ;;  %3322 = vmatprep.mubr.bf16.mxu0 %v7298_v42 }
 0x484   :  { %4017 = vmatprep.mubr.bf16.mxu1 %v7668_v0 }
 0x485   :  { %v3108_v13 = vpop.f32.mrb[164].mxu0  ;;  %v3803_v3 = vpop.f32.mrb[140].mxu1 }
 0x486   :  { %4306 = vrot.lane.b32.xlu0 %v3803_v3, %s7669_s0  ;;  %v3110_v7 = vpop.f32.mrb[165].mxu0  ;;  %v3805_v58 = vpop.f32.mrb[141].mxu1  ;;  %v7299_v3 = vld [vmem:[#allocation2 + $0x8a8] ss:$16 sps:$4 sm:$0xff]  }
 0x487   :  { %v3111_v38 = vpop.f32.mrb[166].mxu0  ;;  %v3806_v62 = vpop.f32.mrb[142].mxu1 }
 0x488   :  { %v3396_v54 = vpack.c.bf16 %v3111_v38, %v3108_v13  ;;  %4308 = vrot.lane.b32.xlu1 %v3806_v62, %s7669_s0  ;;  %v3113_v34 = vpop.f32.mrb[167].mxu0  ;;  %v3808_v22 = vpop.f32.mrb[143].mxu1  ;;  %v7304_v13 = vld [vmem:[#allocation2 + $0x8cc] ss:$16 sps:$4 sm:$0xff]  }
 0x48a   :  { %3323 = vmatmul.mubr.bf16.gmra.mrb[16].mxu0 %v7296_v16 }
 0x48b   :  { %6344 = vmatmul.mubr.msk.bf16.gmra.mrb[248].mxu1 %vm3433_vm1, %v3396_v54  ;;  %3330 = vmatprep.mubr.bf16.mxu0 %v7301_v25 }
 0x48c   :  { %4025 = vmatprep.mubr.bf16.mxu1 %v7668_v0 }
 0x48d   :  { %v3116_v42 = vpop.f32.mrb[168].mxu0  ;;  %v3811_v1 = vpop.f32.mrb[144].mxu1 }
 0x48e   :  { %4310 = vrot.lane.b32.xlu0 %v3811_v1, %s7669_s0  ;;  %v3118_v46 = vpop.f32.mrb[169].mxu0  ;;  %v3813_v50 = vpop.f32.mrb[145].mxu1  ;;  %v7302_v1 = vld [vmem:[#allocation2 + $0x8c8] ss:$16 sps:$4 sm:$0xff]  }
 0x48f   :  { %v3119_v7 = vpop.f32.mrb[170].mxu0  ;;  %v3814_v58 = vpop.f32.mrb[146].mxu1  ;;  %v7307_v50 = vld [vmem:[#allocation2 + $0x8ec] ss:$16 sps:$4 sm:$0xff]  }
 0x490   :  { %v3397_v38 = vpack.c.bf16 %v3119_v7, %v3116_v42  ;;  %4312 = vrot.lane.b32.xlu1 %v3814_v58, %s7669_s0  ;;  %v3121_v62 = vpop.f32.mrb[171].mxu0  ;;  %v3816_v16 = vpop.f32.mrb[147].mxu1 }
 0x492   :  { %3331 = vmatmul.mubr.bf16.gmra.mrb[20].mxu0 %v7299_v3 }
 0x493   :  { %6345 = vmatmul.mubr.msk.bf16.gmra.mrb[252].mxu1 %vm3433_vm1, %v3397_v38  ;;  %3338 = vmatprep.mubr.bf16.mxu0 %v7304_v13 }
 0x494   :  { %4033 = vmatprep.mubr.bf16.mxu1 %v7668_v0 }
 0x495   :  { %v3124_v25 = vpop.f32.mrb[172].mxu0  ;;  %v3819_v54 = vpop.f32.mrb[148].mxu1 }
 0x496   :  { %4362 = vrot.lane.b32.xlu1 %v3819_v54, %s7670_s24  ;;  %v3126_v34 = vpop.f32.mrb[173].mxu0  ;;  %v3821_v22 = vpop.f32.mrb[149].mxu1  ;;  %v7305_v54 = vld [vmem:[#allocation2 + $0x8e8] ss:$16 sps:$4 sm:$0xff]  }
 0x497   :  { %v3127_v46 = vpop.f32.mrb[174].mxu0  ;;  %v3822_v42 = vpop.f32.mrb[150].mxu1 }
 0x498   :  { %v3398_v7 = vpack.c.bf16 %v3127_v46, %v3124_v25  ;;  %v3129_v58 = vpop.f32.mrb[175].mxu0  ;;  %v3824_v62 = vpop.f32.mrb[151].mxu1 }
 0x49a   :  { %3339 = vmatmul.mubr.bf16.gmra.mrb[24].mxu0 %v7302_v1  ;;  %4364 = vrot.lane.b32.xlu1 %v3822_v42, %s7670_s24 }
 0x49b   :  { %6346 = vmatmul.mubr.msk.bf16.gmra.mrb[0].mxu1 %vm3433_vm1, %v3398_v7  ;;  %3346 = vmatprep.mubr.bf16.mxu0 %v7307_v50 }
 0x49c   :  { %4041 = vmatprep.mubr.bf16.mxu1 %v7668_v0 }
 0x49d   :  { %v3132_v3 = vpop.f32.mrb[176].mxu0  ;;  %v3827_v13 = vpop.f32.mrb[152].mxu1 }
 0x49e   :  { %4366 = vrot.lane.b32.xlu0 %v3827_v13, %s7670_s24  ;;  %v3134_v38 = vpop.f32.mrb[177].mxu0  ;;  %v3829_v16 = vpop.f32.mrb[153].mxu1 }
 0x49f   :  { %v3135_v34 = vpop.f32.mrb[178].mxu0  ;;  %v3830_v22 = vpop.f32.mrb[154].mxu1 }
 0x4a0   :  { %v3399_v25 = vpack.c.bf16 %v3135_v34, %v3132_v3  ;;  %4368 = vrot.lane.b32.xlu1 %v3830_v22, %s7670_s24  ;;  %v3137_v1 = vpop.f32.mrb[179].mxu0  ;;  %v3832_v46 = vpop.f32.mrb[155].mxu1 }
 0x4a2   :  { %3347 = vmatmul.mubr.bf16.gmra.mrb[28].mxu0 %v7305_v54 }
 0x4a3   :  { %6347 = vmatmul.mubr.msk.bf16.gmra.mrb[4].mxu1 %vm3433_vm1, %v3399_v25 }
 0x4a4   :  { %4049 = vmatprep.mubr.bf16.mxu1 %v7668_v0 }
 0x4a5   :  { %v3140_v42 = vpop.f32.mrb[180].mxu0  ;;  %v3835_v50 = vpop.f32.mrb[156].mxu1 }
 0x4a6   :  { %4370 = vrot.lane.b32.xlu0 %v3835_v50, %s7670_s24  ;;  %v3142_v7 = vpop.f32.mrb[181].mxu0  ;;  %v3837_v58 = vpop.f32.mrb[157].mxu1 }
 0x4a7   :  { %v3143_v62 = vpop.f32.mrb[182].mxu0  ;;  %v3838_v13 = vpop.f32.mrb[158].mxu1 }
 0x4a8   :  { %v3400_v38 = vpack.c.bf16 %v3143_v62, %v3140_v42  ;;  %4372 = vrot.lane.b32.xlu1 %v3838_v13, %s7670_s24  ;;  %v3145_v3 = vpop.f32.mrb[183].mxu0  ;;  %v3840_v16 = vpop.f32.mrb[159].mxu1 }
 0x4ab   :  { %6348 = vmatmul.mubr.msk.bf16.gmra.mrb[8].mxu1 %vm3433_vm1, %v3400_v38 }
 0x4ac   :  { %4057 = vmatprep.mubr.bf16.mxu1 %v7668_v0 }
 0x4ad   :  { %v3148_v54 = vpop.f32.mrb[184].mxu0  ;;  %v3843_v34 = vpop.f32.mrb[160].mxu1 }
 0x4ae   :  { %4374 = vrot.lane.b32.xlu0 %v3843_v34, %s7670_s24  ;;  %v3150_v22 = vpop.f32.mrb[185].mxu0  ;;  %v3845_v25 = vpop.f32.mrb[161].mxu1 }
 0x4af   :  { %v3151_v1 = vpop.f32.mrb[186].mxu0  ;;  %v3846_v46 = vpop.f32.mrb[162].mxu1 }
 0x4b0   :  { %v3401_v50 = vpack.c.bf16 %v3151_v1, %v3148_v54  ;;  %4376 = vrot.lane.b32.xlu1 %v3846_v46, %s7670_s24  ;;  %v3153_v42 = vpop.f32.mrb[187].mxu0  ;;  %v3848_v7 = vpop.f32.mrb[163].mxu1 }
 0x4b3   :  { %6349 = vmatmul.mubr.msk.bf16.gmra.mrb[12].mxu1 %vm3433_vm1, %v3401_v50 }
 0x4b4   :  { %4065 = vmatprep.mubr.bf16.mxu1 %v7668_v0 }
 0x4b5   :  { %v3156_v58 = vpop.f32.mrb[188].mxu0  ;;  %v3851_v62 = vpop.f32.mrb[164].mxu1 }
 0x4b6   :  { %4378 = vrot.lane.b32.xlu0 %v3851_v62, %s7670_s24  ;;  %v3158_v13 = vpop.f32.mrb[189].mxu0  ;;  %v3853_v38 = vpop.f32.mrb[165].mxu1 }
 0x4b7   :  { %v3159_v3 = vpop.f32.mrb[190].mxu0  ;;  %v3854_v16 = vpop.f32.mrb[166].mxu1 }
 0x4b8   :  { %v3402_v34 = vpack.c.bf16 %v3159_v3, %v3156_v58  ;;  %4380 = vrot.lane.b32.xlu1 %v3854_v16, %s7670_s24  ;;  %v3161_v54 = vpop.f32.mrb[191].mxu0  ;;  %v3856_v22 = vpop.f32.mrb[167].mxu1 }
 0x4bb   :  { %6350 = vmatmul.mubr.msk.bf16.gmra.mrb[16].mxu1 %vm3433_vm1, %v3402_v34 }
 0x4bc   :  { %4073 = vmatprep.mubr.bf16.mxu1 %v7668_v0 }
 0x4bd   :  { %v3164_v25 = vpop.f32.mrb[192].mxu0  ;;  %v3859_v1 = vpop.f32.mrb[168].mxu1 }
 0x4be   :  { %4382 = vrot.lane.b32.xlu0 %v3859_v1, %s7670_s24  ;;  %v3166_v46 = vpop.f32.mrb[193].mxu0  ;;  %v3861_v50 = vpop.f32.mrb[169].mxu1 }
 0x4bf   :  { %v3167_v42 = vpop.f32.mrb[194].mxu0  ;;  %v3862_v7 = vpop.f32.mrb[170].mxu1 }
 0x4c0   :  { %v3403_v62 = vpack.c.bf16 %v3167_v42, %v3164_v25  ;;  %4384 = vrot.lane.b32.xlu1 %v3862_v7, %s7670_s24  ;;  %v3169_v58 = vpop.f32.mrb[195].mxu0  ;;  %v3864_v13 = vpop.f32.mrb[171].mxu1 }
 0x4c3   :  { %6351 = vmatmul.mubr.msk.bf16.gmra.mrb[20].mxu1 %vm3433_vm1, %v3403_v62 }
 0x4c4   :  { %4081 = vmatprep.mubr.bf16.mxu1 %v7668_v0 }
 0x4c5   :  { %v3172_v38 = vpop.f32.mrb[196].mxu0  ;;  %v3867_v3 = vpop.f32.mrb[172].mxu1 }
 0x4c6   :  { %4386 = vrot.lane.b32.xlu0 %v3867_v3, %s7670_s24  ;;  %v3174_v16 = vpop.f32.mrb[197].mxu0  ;;  %v3869_v34 = vpop.f32.mrb[173].mxu1 }
 0x4c7   :  { %v3175_v54 = vpop.f32.mrb[198].mxu0  ;;  %v3870_v22 = vpop.f32.mrb[174].mxu1 }
 0x4c8   :  { %v3404_v1 = vpack.c.bf16 %v3175_v54, %v3172_v38  ;;  %4388 = vrot.lane.b32.xlu1 %v3870_v22, %s7670_s24  ;;  %v3177_v25 = vpop.f32.mrb[199].mxu0  ;;  %v3872_v46 = vpop.f32.mrb[175].mxu1 }
 0x4cb   :  { %6352 = vmatmul.mubr.msk.bf16.gmra.mrb[24].mxu1 %vm3433_vm1, %v3404_v1 }
 0x4cc   :  { %4089 = vmatprep.mubr.bf16.mxu1 %v7668_v0 }
 0x4cd   :  { %v3180_v50 = vpop.f32.mrb[200].mxu0  ;;  %v3875_v42 = vpop.f32.mrb[176].mxu1 }
 0x4ce   :  { %4390 = vrot.lane.b32.xlu0 %v3875_v42, %s7670_s24  ;;  %v3182_v7 = vpop.f32.mrb[201].mxu0  ;;  %v3877_v62 = vpop.f32.mrb[177].mxu1 }
 0x4cf   :  { %v3183_v58 = vpop.f32.mrb[202].mxu0  ;;  %v3878_v13 = vpop.f32.mrb[178].mxu1 }
 0x4d0   :  { %v3405_v3 = vpack.c.bf16 %v3183_v58, %v3180_v50  ;;  %4392 = vrot.lane.b32.xlu1 %v3878_v13, %s7670_s24  ;;  %v3185_v38 = vpop.f32.mrb[203].mxu0  ;;  %v3880_v16 = vpop.f32.mrb[179].mxu1 }
 0x4d3   :  { %6353 = vmatmul.mubr.msk.bf16.gmra.mrb[28].mxu1 %vm3433_vm1, %v3405_v3 }
 0x4d4   :  { %4097 = vmatprep.mubr.bf16.mxu1 %v7668_v0 }
 0x4d5   :  { %v3188_v34 = vpop.f32.mrb[204].mxu0  ;;  %v3883_v54 = vpop.f32.mrb[180].mxu1 }
 0x4d6   :  { %v3189_v22 = vadd.f32 %v3188_v34, %v8010_v27  ;;  %4442 = vrot.lane.b32.xlu0 %v3883_v54, %s7671_s16  ;;  %v3190_v1 = vpop.f32.mrb[205].mxu0  ;;  %v3885_v25 = vpop.f32.mrb[181].mxu1 }
 0x4d7   :  { %v3191_v46 = vpop.f32.mrb[206].mxu0  ;;  %v3886_v42 = vpop.f32.mrb[182].mxu1 }
 0x4d8   :  { %v3192_v50 = vadd.f32 %v3191_v46, %v8012_v29  ;;  %4444 = vrot.lane.b32.xlu1 %v3886_v42, %s7671_s16  ;;  %v3193_v7 = vpop.f32.mrb[207].mxu0  ;;  %v3888_v62 = vpop.f32.mrb[183].mxu1 }
 0x4da   :  { %v3406_v58 = vpack.c.bf16 %v3192_v50, %v3189_v22 }
 0x4dc   :  { %6354 = vmatmul.mubr.msk.bf16.gmra.mrb[32].mxu1 %vm3433_vm1, %v3406_v58 }
 0x4dd   :  { %v3196_v13 = vpop.f32.mrb[208].mxu0  ;;  %v3891_v3 = vpop.f32.mrb[184].mxu1  ;;  %4105 = vmatprep.mubr.bf16.mxu1 %v7668_v0 }
 0x4de   :  { %v3197_v27 = vadd.f32 %v3196_v13, %v8014_v33  ;;  %4446 = vrot.lane.b32.xlu0 %v3891_v3, %s7671_s16  ;;  %v3198_v38 = vpop.f32.mrb[209].mxu0  ;;  %v3893_v16 = vpop.f32.mrb[185].mxu1 }
 0x4df   :  { %v3199_v34 = vpop.f32.mrb[210].mxu0  ;;  %v3894_v54 = vpop.f32.mrb[186].mxu1 }
 0x4e0   :  { %v3200_v29 = vadd.f32 %v3199_v34, %v8016_v35  ;;  %4448 = vrot.lane.b32.xlu1 %v3894_v54, %s7671_s16  ;;  %v3201_v1 = vpop.f32.mrb[211].mxu0  ;;  %v3896_v22 = vpop.f32.mrb[187].mxu1 }
 0x4e2   :  { %v3407_v25 = vpack.c.bf16 %v3200_v29, %v3197_v27 }
 0x4e4   :  { %6355 = vmatmul.mubr.msk.bf16.gmra.mrb[36].mxu1 %vm3433_vm1, %v3407_v25 }
 0x4e5   :  { %v3204_v46 = vpop.f32.mrb[212].mxu0  ;;  %v3899_v42 = vpop.f32.mrb[188].mxu1  ;;  %4113 = vmatprep.mubr.bf16.mxu1 %v7668_v0 }
 0x4e6   :  { %v3205_v33 = vadd.f32 %v3204_v46, %v8018_v39  ;;  %4450 = vrot.lane.b32.xlu0 %v3899_v42, %s7671_s16  ;;  %v3206_v50 = vpop.f32.mrb[213].mxu0  ;;  %v3901_v7 = vpop.f32.mrb[189].mxu1 }
 0x4e7   :  { %v3207_v62 = vpop.f32.mrb[214].mxu0  ;;  %v3902_v58 = vpop.f32.mrb[190].mxu1 }
 0x4e8   :  { %v3208_v35 = vadd.f32 %v3207_v62, %v8020_v41  ;;  %4452 = vrot.lane.b32.xlu1 %v3902_v58, %s7671_s16  ;;  %v3209_v13 = vpop.f32.mrb[215].mxu0  ;;  %v3904_v3 = vpop.f32.mrb[191].mxu1 }
 0x4e9   :  { %v8282_v42 = vpop.permute.xlu0 %4282 }
 0x4ea   :  { %v3408_v27 = vpack.c.bf16 %v3208_v35, %v3205_v33 }
 0x4ec   :  { %6356 = vmatmul.mubr.msk.bf16.gmra.mrb[40].mxu1 %vm3433_vm1, %v3408_v27 }
 0x4ed   :  { %v3212_v38 = vpop.f32.mrb[216].mxu0  ;;  %v3907_v16 = vpop.f32.mrb[192].mxu1  ;;  %4121 = vmatprep.mubr.bf16.mxu1 %v7668_v0 }
 0x4ee   :  { %v3213_v39 = vadd.f32 %v3212_v38, %v8022_v45  ;;  %4454 = vrot.lane.b32.xlu0 %v3907_v16, %s7671_s16  ;;  %v3214_v34 = vpop.f32.mrb[217].mxu0  ;;  %v3909_v54 = vpop.f32.mrb[193].mxu1 }
 0x4ef   :  { %v3215_v29 = vpop.f32.mrb[218].mxu0  ;;  %v3910_v1 = vpop.f32.mrb[194].mxu1 }
 0x4f0   :  { %v3216_v41 = vadd.f32 %v3215_v29, %v8024_v47  ;;  %4456 = vrot.lane.b32.xlu1 %v3910_v1, %s7671_s16  ;;  %v3217_v22 = vpop.f32.mrb[219].mxu0  ;;  %v3912_v25 = vpop.f32.mrb[195].mxu1 }
 0x4f1   :  { %v8290_v38 = vpop.permute.xlu0 %4284 }
 0x4f2   :  { %v3409_v46 = vpack.c.bf16 %v3216_v41, %v3213_v39 }
 0x4f4   :  { %6357 = vmatmul.mubr.msk.bf16.gmra.mrb[44].mxu1 %vm3433_vm1, %v3409_v46 }
 0x4f5   :  { %v3220_v33 = vpop.f32.mrb[220].mxu0  ;;  %v3915_v50 = vpop.f32.mrb[196].mxu1  ;;  %4129 = vmatprep.mubr.bf16.mxu1 %v7668_v0 }
 0x4f6   :  { %v3221_v45 = vadd.f32 %v3220_v33, %v8026_v51  ;;  %4458 = vrot.lane.b32.xlu0 %v3915_v50, %s7671_s16  ;;  %v3222_v7 = vpop.f32.mrb[221].mxu0  ;;  %v3917_v62 = vpop.f32.mrb[197].mxu1 }
 0x4f7   :  { %v3223_v47 = vpop.f32.mrb[222].mxu0  ;;  %v3918_v58 = vpop.f32.mrb[198].mxu1 }
 0x4f8   :  { %v3224_v35 = vadd.f32 %v3223_v47, %v8028_v53  ;;  %4460 = vrot.lane.b32.xlu1 %v3918_v58, %s7671_s16  ;;  %v3225_v13 = vpop.f32.mrb[223].mxu0  ;;  %v3920_v3 = vpop.f32.mrb[199].mxu1 }
 0x4f9   :  { %v8298_v46 = vpop.permute.xlu0 %4286  ;;  %v8304_v47 = vpop.permute.xlu1 %4288 }
 0x4fa   :  { %v3410_v27 = vpack.c.bf16 %v3224_v35, %v3221_v45 }
 0x4fc   :  { %6358 = vmatmul.mubr.msk.bf16.gmra.mrb[48].mxu1 %vm3433_vm1, %v3410_v27 }
 0x4fd   :  { %v3228_v16 = vpop.f32.mrb[224].mxu0  ;;  %v3923_v39 = vpop.f32.mrb[200].mxu1  ;;  %4137 = vmatprep.mubr.bf16.mxu1 %v7668_v0 }
 0x4fe   :  { %v3229_v51 = vadd.f32 %v3228_v16, %v8030_v57  ;;  %4462 = vrot.lane.b32.xlu0 %v3923_v39, %s7671_s16  ;;  %v3230_v34 = vpop.f32.mrb[225].mxu0  ;;  %v3925_v54 = vpop.f32.mrb[201].mxu1 }
 0x4ff   :  { %v3231_v53 = vpop.f32.mrb[226].mxu0  ;;  %v3926_v29 = vpop.f32.mrb[202].mxu1 }
 0x500   :  { %v3232_v1 = vadd.f32 %v3231_v53, %v8032_v59  ;;  %4464 = vrot.lane.b32.xlu1 %v3926_v29, %s7671_s16  ;;  %v3233_v41 = vpop.f32.mrb[227].mxu0  ;;  %v3928_v22 = vpop.f32.mrb[203].mxu1 }
 0x501   :  { %v8308_v27 = vpop.permute.xlu0 %4290  ;;  %v8310_v16 = vpop.permute.xlu1 %4292 }
 0x502   :  { %v3411_v25 = vpack.c.bf16 %v3232_v1, %v3229_v51 }
 0x504   :  { %6359 = vmatmul.mubr.msk.bf16.gmra.mrb[52].mxu1 %vm3433_vm1, %v3411_v25 }
 0x505   :  { %v3236_v33 = vpop.f32.mrb[228].mxu0  ;;  %v3931_v50 = vpop.f32.mrb[204].mxu1  ;;  %4145 = vmatprep.mubr.bf16.mxu1 %v7668_v0 }
 0x506   :  { %v3237_v57 = vadd.f32 %v3236_v33, %v8034_v63  ;;  %4466 = vrot.lane.b32.xlu0 %v3931_v50, %s7671_s16  ;;  %v3238_v45 = vpop.f32.mrb[229].mxu0  ;;  %v3933_v7 = vpop.f32.mrb[205].mxu1 }
 0x507   :  { %v3239_v59 = vpop.f32.mrb[230].mxu0  ;;  %v3934_v62 = vpop.f32.mrb[206].mxu1 }
 0x508   :  { %v3240_v58 = vadd.f32 %v3239_v59, %v8036_v2  ;;  %4468 = vrot.lane.b32.xlu1 %v3934_v62, %s7671_s16  ;;  %v3936_v35 = vpop.f32.mrb[207].mxu1  ;;  %v3241_v13 = vpop.f32.mrb[231].mxu0 }
 0x509   :  { %v8316_v29 = vpop.permute.xlu1 %4296  ;;  %v8320_v33 = vpop.permute.xlu0 %4294 }
 0x50a   :  { %v3412_v3 = vpack.c.bf16 %v3240_v58, %v3237_v57 }
 0x50c   :  { %6360 = vmatmul.mubr.msk.bf16.gmra.mrb[56].mxu1 %vm3433_vm1, %v3412_v3 }
 0x50d   :  { %v3244_v63 = vpop.f32.mrb[232].mxu0  ;;  %v3939_v39 = vpop.f32.mrb[208].mxu1  ;;  %4153 = vmatprep.mubr.bf16.mxu1 %v7668_v0 }
 0x50e   :  { %v3245_v51 = vadd.f32 %v3244_v63, %v8038_v6  ;;  %4470 = vrot.lane.b32.xlu0 %v3939_v39, %s7671_s16  ;;  %v3246_v2 = vpop.f32.mrb[233].mxu0  ;;  %v3941_v34 = vpop.f32.mrb[209].mxu1 }
 0x50f   :  { %v3247_v54 = vpop.f32.mrb[234].mxu0  ;;  %v3942_v53 = vpop.f32.mrb[210].mxu1 }
 0x510   :  { %v3248_v1 = vadd.f32 %v3247_v54, %v8040_v8  ;;  %4472 = vrot.lane.b32.xlu1 %v3942_v53, %s7671_s16  ;;  %v3944_v41 = vpop.f32.mrb[211].mxu1  ;;  %v3249_v22 = vpop.f32.mrb[235].mxu0 }
 0x511   :  { %v8322_v50 = vpop.permute.xlu1 %4300  ;;  %v8332_v39 = vpop.permute.xlu0 %4298 }
 0x512   :  { %v3413_v25 = vpack.c.bf16 %v3248_v1, %v3245_v51 }
 0x514   :  { %6361 = vmatmul.mubr.msk.bf16.gmra.mrb[60].mxu1 %vm3433_vm1, %v3413_v25 }
 0x515   :  { %v3252_v6 = vpop.f32.mrb[236].mxu0  ;;  %v3947_v57 = vpop.f32.mrb[212].mxu1  ;;  %4161 = vmatprep.mubr.bf16.mxu1 %v7668_v0 }
 0x516   :  { %v3253_v45 = vadd.f32 %v3252_v6, %v8042_v12  ;;  %4522 = vrot.lane.b32.xlu0 %v3947_v57, %s7660_s12  ;;  %v3254_v8 = vpop.f32.mrb[237].mxu0  ;;  %v3949_v7 = vpop.f32.mrb[213].mxu1 }
 0x517   :  { %v3255_v59 = vpop.f32.mrb[238].mxu0  ;;  %v3950_v62 = vpop.f32.mrb[214].mxu1 }
 0x518   :  { %v8328_v58 = vpop.permute.xlu1 %4304  ;;  %v3256_v35 = vadd.f32 %v3255_v59, %v8044_v14  ;;  %4524 = vrot.lane.b32.xlu1 %v3950_v62, %s7660_s12  ;;  %v3952_v13 = vpop.f32.mrb[215].mxu1 }
 0x519   :  { %v3257_v3 = vpop.f32.mrb[239].mxu0 }
 0x51a   :  { %v3414_v63 = vpack.c.bf16 %v3256_v35, %v3253_v45  ;;  %v8344_v45 = vpop.permute.xlu0 %4302 }
 0x51c   :  { %v8334_v51 = vpop.permute.xlu1 %4308  ;;  %6362 = vmatmul.mubr.msk.bf16.gmra.mrb[64].mxu1 %vm3433_vm1, %v3414_v63 }
 0x51d   :  { %v3260_v12 = vpop.f32.mrb[240].mxu0  ;;  %v3955_v2 = vpop.f32.mrb[216].mxu1  ;;  %4169 = vmatprep.mubr.bf16.mxu1 %v7668_v0 }
 0x51e   :  { %v3261_v34 = vadd.f32 %v3260_v12, %v8046_v18  ;;  %4526 = vrot.lane.b32.xlu0 %v3955_v2, %s7660_s12  ;;  %v3262_v14 = vpop.f32.mrb[241].mxu0  ;;  %v3957_v54 = vpop.f32.mrb[217].mxu1 }
 0x51f   :  { %v3263_v53 = vpop.f32.mrb[242].mxu0  ;;  %v3958_v1 = vpop.f32.mrb[218].mxu1 }
 0x520   :  { %v8340_v41 = vpop.permute.xlu1 %4312  ;;  %v3264_v22 = vadd.f32 %v3263_v53, %v8048_v20  ;;  %4528 = vrot.lane.b32.xlu1 %v3958_v1, %s7660_s12  ;;  %v3960_v25 = vpop.f32.mrb[219].mxu1 }
 0x521   :  { %v3265_v6 = vpop.f32.mrb[243].mxu0  ;;  %v8352_v3 = vpop.permute.xlu0 %4306 }
 0x522   :  { %v3415_v57 = vpack.c.bf16 %v3264_v22, %v3261_v34 }
 0x524   :  { %v8346_v8 = vpop.permute.xlu1 %4362  ;;  %6363 = vmatmul.mubr.msk.bf16.gmra.mrb[68].mxu1 %vm3433_vm1, %v3415_v57 }
 0x525   :  { %v3268_v18 = vpop.f32.mrb[244].mxu0  ;;  %v3963_v7 = vpop.f32.mrb[220].mxu1  ;;  %4177 = vmatprep.mubr.bf16.mxu1 %v7668_v0 }
 0x526   :  { %v3269_v59 = vadd.f32 %v3268_v18, %v8050_v24  ;;  %4530 = vrot.lane.b32.xlu0 %v3963_v7, %s7660_s12  ;;  %v3270_v20 = vpop.f32.mrb[245].mxu0  ;;  %v3965_v62 = vpop.f32.mrb[221].mxu1 }
 0x527   :  { %v3271_v35 = vpop.f32.mrb[246].mxu0  ;;  %v3966_v13 = vpop.f32.mrb[222].mxu1 }
 0x528   :  { %v3272_v63 = vadd.f32 %v3271_v35, %v8052_v28  ;;  %4532 = vrot.lane.b32.xlu1 %v3966_v13, %s7660_s12  ;;  %v3968_v12 = vpop.f32.mrb[223].mxu1  ;;  %v3273_v2 = vpop.f32.mrb[247].mxu0 }
 0x529   :  { %v8356_v14 = vpop.permute.xlu0 %4310  ;;  %v8359_v24 = vpop.permute.xlu1 %4364 }
 0x52a   :  { %v3416_v34 = vpack.c.bf16 %v3272_v63, %v3269_v59 }
 0x52c   :  { %6364 = vmatmul.mubr.msk.bf16.gmra.mrb[72].mxu1 %vm3433_vm1, %v3416_v34 }
 0x52d   :  { %v3276_v54 = vpop.f32.mrb[248].mxu0  ;;  %4185 = vmatprep.mubr.bf16.mxu1 %v7668_v0  ;;  %v8364_v6 = vpop.permute.xlu0 %4366 }
 0x52e   :  { %v3277_v53 = vadd.f32 %v3276_v54, %v8055_v40  ;;  %v3971_v1 = vpop.f32.mrb[224].mxu1  ;;  %v3278_v22 = vpop.f32.mrb[249].mxu0 }
 0x52f   :  { %4534 = vrot.lane.b32.xlu0 %v3971_v1, %s7660_s12  ;;  %v3973_v28 = vpop.f32.mrb[225].mxu1  ;;  %v3279_v25 = vpop.f32.mrb[250].mxu0 }
 0x530   :  { %v3280_v57 = vadd.f32 %v3279_v25, %v8058_v44  ;;  %v3974_v18 = vpop.f32.mrb[226].mxu1  ;;  %v3281_v59 = vpop.f32.mrb[251].mxu0 }
 0x531   :  { %4536 = vrot.lane.b32.xlu1 %v3974_v18, %s7660_s12  ;;  %v3976_v7 = vpop.f32.mrb[227].mxu1  ;;  %v8368_v62 = vpop.permute.xlu1 %4368 }
 0x532   :  { %v3417_v20 = vpack.c.bf16 %v3280_v57, %v3277_v53  ;;  %v8371_v40 = vpop.permute.xlu0 %4370 }
 0x534   :  { %6365 = vmatmul.mubr.msk.bf16.gmra.mrb[76].mxu1 %vm3433_vm1, %v3417_v20 }
 0x535   :  { %v3284_v35 = vpop.f32.mrb[252].mxu0  ;;  %4193 = vmatprep.mubr.bf16.mxu1 %v7668_v0  ;;  %v8376_v34 = vpop.permute.xlu1 %4372 }
 0x536   :  { %v3285_v13 = vadd.f32 %v3284_v35, %v8061_v56  ;;  %v3979_v63 = vpop.f32.mrb[228].mxu1  ;;  %v3286_v12 = vpop.f32.mrb[253].mxu0 }
 0x537   :  { %4538 = vrot.lane.b32.xlu0 %v3979_v63, %s7660_s12  ;;  %v3981_v44 = vpop.f32.mrb[229].mxu1  ;;  %v3287_v2 = vpop.f32.mrb[254].mxu0 }
 0x538   :  { %v3288_v54 = vadd.f32 %v3287_v2, %v8064_v61  ;;  %v3982_v53 = vpop.f32.mrb[230].mxu1  ;;  %v3289_v22 = vpop.f32.mrb[255].mxu0 }
 0x539   :  { %4540 = vrot.lane.b32.xlu1 %v3982_v53, %s7660_s12  ;;  %v3984_v1 = vpop.f32.mrb[231].mxu1  ;;  %v8380_v25 = vpop.permute.xlu0 %4374 }
 0x53a   :  { %v3418_v28 = vpack.c.bf16 %v3288_v54, %v3285_v13  ;;  %v8383_v56 = vpop.permute.xlu1 %4376 }
 0x53c   :  { %6366 = vmatmul.mubr.msk.bf16.gmra.mrb[80].mxu1 %vm3433_vm1, %v3418_v28 }
 0x53d   :  { %v3292_v57 = vpop.f32.mrb[0].mxu0  ;;  %4201 = vmatprep.mubr.bf16.mxu1 %v7668_v0  ;;  %v8388_v35 = vpop.permute.xlu0 %4378 }
 0x53e   :  { %v3293_v18 = vadd.f32 %v3292_v57, %v8067_v10  ;;  %v3987_v7 = vpop.f32.mrb[232].mxu1  ;;  %v3294_v59 = vpop.f32.mrb[1].mxu0 }
 0x53f   :  { %4542 = vrot.lane.b32.xlu0 %v3987_v7, %s7660_s12  ;;  %v3989_v61 = vpop.f32.mrb[233].mxu1  ;;  %v3295_v20 = vpop.f32.mrb[2].mxu0 }
 0x540   :  { %v3296_v13 = vadd.f32 %v3295_v20, %v8070_v15  ;;  %v3990_v63 = vpop.f32.mrb[234].mxu1  ;;  %v3297_v44 = vpop.f32.mrb[3].mxu0 }
 0x541   :  { %4544 = vrot.lane.b32.xlu1 %v3990_v63, %s7660_s12  ;;  %v3992_v12 = vpop.f32.mrb[235].mxu1  ;;  %v8392_v54 = vpop.permute.xlu1 %4380 }
 0x542   :  { %v3419_v2 = vpack.c.bf16 %v3296_v13, %v3293_v18  ;;  %8955 = vst [vmem:[#allocation33_spill] sm:$0xff] %v8392_v54  ;;  %v8395_v10 = vpop.permute.xlu0 %4382 }
 0x544   :  { %6367 = vmatmul.mubr.msk.bf16.gmra.mrb[84].mxu1 %vm3433_vm1, %v3419_v2 }
 0x545   :  { %v3300_v53 = vpop.f32.mrb[4].mxu0  ;;  %4209 = vmatprep.mubr.bf16.mxu1 %v7668_v0  ;;  %v8400_v7 = vpop.permute.xlu1 %4384 }
 0x546   :  { %v3301_v1 = vadd.f32 %v3300_v53, %v8073_v26  ;;  %v3995_v22 = vpop.f32.mrb[236].mxu1  ;;  %v3302_v28 = vpop.f32.mrb[5].mxu0 }
 0x547   :  { %4546 = vrot.lane.b32.xlu0 %v3995_v22, %s7660_s12  ;;  %v3997_v15 = vpop.f32.mrb[237].mxu1  ;;  %v3303_v57 = vpop.f32.mrb[6].mxu0 }
 0x548   :  { %v3304_v18 = vadd.f32 %v3303_v57, %v8076_v32  ;;  %v3998_v59 = vpop.f32.mrb[238].mxu1  ;;  %v3305_v20 = vpop.f32.mrb[7].mxu0 }
 0x549   :  { %4548 = vrot.lane.b32.xlu1 %v3998_v59, %s7660_s12  ;;  %v4000_v61 = vpop.f32.mrb[239].mxu1  ;;  %v8404_v63 = vpop.permute.xlu0 %4386 }
 0x54a   :  { %v3420_v13 = vpack.c.bf16 %v3304_v18, %v3301_v1  ;;  %v8407_v26 = vpop.permute.xlu1 %4388 }
 0x54c   :  { %6368 = vmatmul.mubr.msk.bf16.gmra.mrb[88].mxu1 %vm3433_vm1, %v3420_v13 }
 0x54d   :  { %v3308_v12 = vpop.f32.mrb[8].mxu0  ;;  %4217 = vmatprep.mubr.bf16.mxu1 %v7668_v0  ;;  %v8412_v28 = vpop.permute.xlu0 %4390 }
 0x54e   :  { %v3309_v44 = vadd.f32 %v3308_v12, %v8079_v48  ;;  %v4003_v2 = vpop.f32.mrb[240].mxu1  ;;  %v3310_v53 = vpop.f32.mrb[9].mxu0 }
 0x54f   :  { %4550 = vrot.lane.b32.xlu0 %v4003_v2, %s7660_s12  ;;  %v4005_v32 = vpop.f32.mrb[241].mxu1  ;;  %v3311_v22 = vpop.f32.mrb[10].mxu0 }
 0x550   :  { %v3312_v1 = vadd.f32 %v3311_v22, %v8082_v52  ;;  %v4006_v15 = vpop.f32.mrb[242].mxu1  ;;  %v3313_v18 = vpop.f32.mrb[11].mxu0 }
 0x551   :  { %4552 = vrot.lane.b32.xlu1 %v4006_v15, %s7660_s12  ;;  %v4008_v57 = vpop.f32.mrb[243].mxu1  ;;  %v8416_v61 = vpop.permute.xlu1 %4392 }
 0x552   :  { %v3421_v59 = vpack.c.bf16 %v3312_v1, %v3309_v44  ;;  %v8419_v48 = vpop.permute.xlu0 %4442 }
 0x554   :  { %6369 = vmatmul.mubr.msk.bf16.gmra.mrb[92].mxu1 %vm3433_vm1, %v3421_v59 }
 0x555   :  { %v3316_v20 = vpop.f32.mrb[12].mxu0  ;;  %4225 = vmatprep.mubr.bf16.mxu1 %v7668_v0  ;;  %v8424_v32 = vpop.permute.xlu1 %4444 }
 0x556   :  { %v3317_v13 = vadd.f32 %v3316_v20, %v8085_v4  ;;  %v4011_v12 = vpop.f32.mrb[244].mxu1  ;;  %v3318_v2 = vpop.f32.mrb[13].mxu0 }
 0x557   :  { %4602 = vrot.lane.b32.xlu0 %v4011_v12, %s7672_s18  ;;  %v4013_v52 = vpop.f32.mrb[245].mxu1  ;;  %v3319_v53 = vpop.f32.mrb[14].mxu0 }
 0x558   :  { %v3320_v44 = vadd.f32 %v3319_v53, %v8088_v9  ;;  %v4014_v22 = vpop.f32.mrb[246].mxu1  ;;  %v3321_v15 = vpop.f32.mrb[15].mxu0 }
 0x559   :  { %4604 = vrot.lane.b32.xlu1 %v4014_v22, %s7672_s18  ;;  %v4016_v1 = vpop.f32.mrb[247].mxu1  ;;  %v8428_v18 = vpop.permute.xlu0 %4446 }
 0x55a   :  { %v3422_v57 = vpack.c.bf16 %v3320_v44, %v3317_v13  ;;  %v8431_v4 = vpop.permute.xlu1 %4448 }
 0x55c   :  { %6370 = vmatmul.mubr.msk.bf16.gmra.mrb[96].mxu1 %vm3433_vm1, %v3422_v57 }
 0x55d   :  { %v3324_v59 = vpop.f32.mrb[16].mxu0  ;;  %4233 = vmatprep.mubr.bf16.mxu1 %v7668_v0  ;;  %v8436_v53 = vpop.permute.xlu0 %4450 }
 0x55e   :  { %v3325_v20 = vadd.f32 %v3324_v59, %v8091_v23  ;;  %v4019_v12 = vpop.f32.mrb[248].mxu1  ;;  %v3326_v2 = vpop.f32.mrb[17].mxu0 }
 0x55f   :  { %4606 = vrot.lane.b32.xlu0 %v4019_v12, %s7672_s18  ;;  %v4021_v9 = vpop.f32.mrb[249].mxu1  ;;  %v3327_v52 = vpop.f32.mrb[18].mxu0 }
 0x560   :  { %v3328_v13 = vadd.f32 %v3327_v52, %v8094_v31  ;;  %v4022_v44 = vpop.f32.mrb[250].mxu1  ;;  %v3329_v1 = vpop.f32.mrb[19].mxu0 }
 0x561   :  { %4608 = vrot.lane.b32.xlu1 %v4022_v44, %s7672_s18  ;;  %v4024_v22 = vpop.f32.mrb[251].mxu1  ;;  %v8440_v57 = vpop.permute.xlu1 %4452 }
 0x562   :  { %v3423_v15 = vpack.c.bf16 %v3328_v13, %v3325_v20  ;;  %v8443_v23 = vpop.permute.xlu0 %4454 }
 0x564   :  { %6371 = vmatmul.mubr.msk.bf16.gmra.mrb[100].mxu1 %vm3433_vm1, %v3423_v15 }
 0x565   :  { %v3332_v59 = vpop.f32.mrb[20].mxu0  ;;  %4241 = vmatprep.mubr.bf16.mxu1 %v7668_v0  ;;  %v8448_v44 = vpop.permute.xlu1 %4456 }
 0x566   :  { %v3333_v12 = vadd.f32 %v3332_v59, %v8097_v49  ;;  %v4027_v2 = vpop.f32.mrb[252].mxu1  ;;  %v3334_v9 = vpop.f32.mrb[21].mxu0  ;;  %v4340_v49 = vadd.f32 %v8344_v45, %v8178_v21 }
 0x567   :  { %4610 = vrot.lane.b32.xlu0 %v4027_v2, %s7672_s18  ;;  %v4029_v31 = vpop.f32.mrb[253].mxu1  ;;  %v3335_v52 = vpop.f32.mrb[22].mxu0 }
 0x568   :  { %v3336_v20 = vadd.f32 %v3335_v52, %v8100_v55  ;;  %v4030_v13 = vpop.f32.mrb[254].mxu1  ;;  %v3337_v1 = vpop.f32.mrb[23].mxu0  ;;  %v4341_v52 = vadd.f32 %v8328_v58, %v8180_v60 }
 0x569   :  { %4612 = vrot.lane.b32.xlu1 %v4030_v13, %s7672_s18  ;;  %v4032_v22 = vpop.f32.mrb[255].mxu1  ;;  %v8452_v54 = vpop.permute.xlu0 %4458 }
 0x56a   :  { %v3424_v15 = vpack.c.bf16 %v3336_v20, %v3333_v12  ;;  %v8457_v59 = vpop.permute.xlu1 %4460  ;;  %v4420_v12 = vadd.f32 %v8395_v10, %v4340_v49  ;;  %v4421_v1 = vadd.f32 %v8400_v7, %v4341_v52  ;;  %v4342_v10 = vadd.f32 %v8352_v3, %v8184_v36 }
 0x56b   :  { %v4343_v52 = vadd.f32 %v8334_v51, %v8186_v30 }
 0x56c   :  { %6372 = vmatmul.mubr.msk.bf16.gmra.mrb[104].mxu1 %vm3433_vm1, %v3424_v15 }
 0x56d   :  { %v3340_v2 = vpop.f32.mrb[24].mxu0  ;;  %4249 = vmatprep.mubr.bf16.mxu1 %v7668_v0  ;;  %v4423_v3 = vadd.f32 %v8407_v26, %v4343_v52 }
 0x56e   :  { %v3341_v55 = vadd.f32 %v3340_v2, %v8103_v11  ;;  %v4035_v9 = vpop.f32.mrb[0].mxu1  ;;  %v3342_v31 = vpop.f32.mrb[25].mxu0 }
 0x56f   :  { %4614 = vrot.lane.b32.xlu0 %v4035_v9, %s7672_s18  ;;  %v4037_v20 = vpop.f32.mrb[1].mxu1  ;;  %v3343_v13 = vpop.f32.mrb[26].mxu0 }
 0x570   :  { %v3344_v21 = vadd.f32 %v3343_v13, %v8106_v17  ;;  %v4038_v45 = vpop.f32.mrb[2].mxu1  ;;  %v4463_v22 = vpop.permute.xlu0 %4462 }
 0x571   :  { %v8467_v15 = vadd.f32 %v4463_v22, %v4420_v12  ;;  %4616 = vrot.lane.b32.xlu1 %v4038_v45, %s7672_s18  ;;  %v4040_v11 = vpop.f32.mrb[3].mxu1  ;;  %v3345_v2 = vpop.f32.mrb[27].mxu0 }
 0x572   :  { %v3425_v31 = vpack.c.bf16 %v3344_v21, %v3341_v55  ;;  %v4465_v60 = vpop.permute.xlu1 %4464  ;;  %v4422_v55 = vadd.f32 %v8404_v63, %v4342_v10  ;;  %v4344_v63 = vadd.f32 %v8356_v14, %v8190_v19  ;;  %v4345_v11 = vadd.f32 %v8340_v41, %v8192_v5  ;;  %v8956_v19 = vld [vmem:[#allocation23_spill] sm:$0xff]  ;;  %v8957_v5 = vld [vmem:[#allocation24_spill] sm:$0xff] }
 0x573   :  { %v8470_v58 = vadd.f32 %v4465_v60, %v4421_v1  ;;  %v4330_v14 = vadd.f32 %v8282_v42, %v8956_v19  ;;  %v4331_v41 = vadd.f32 %v8290_v38, %v8957_v5 }
 0x574   :  { %6373 = vmatmul.mubr.msk.bf16.gmra.mrb[108].mxu1 %vm3433_vm1, %v3425_v31  ;;  %v4424_v26 = vadd.f32 %v8412_v28, %v4344_v63  ;;  %v4425_v10 = vadd.f32 %v8416_v61, %v4345_v11 }
 0x575   :  { %v3348_v17 = vpop.f32.mrb[28].mxu0  ;;  %4257 = vmatprep.mubr.bf16.mxu1 %v7668_v0  ;;  %v4410_v28 = vadd.f32 %v8346_v8, %v4330_v14 }
 0x576   :  { %v3349_v7 = vadd.f32 %v3348_v17, %v8109_v37  ;;  %v4043_v49 = vpop.f32.mrb[4].mxu1  ;;  %v3350_v9 = vpop.f32.mrb[29].mxu0 }
 0x577   :  { %4618 = vrot.lane.b32.xlu0 %v4043_v49, %s7672_s18  ;;  %v4045_v12 = vpop.f32.mrb[5].mxu1  ;;  %v3351_v20 = vpop.f32.mrb[30].mxu0  ;;  %v4490_v61 = vadd.f32 %v8419_v48, %v4410_v28 }
 0x578   :  { %v3352_v13 = vadd.f32 %v3351_v20, %v8112_v43  ;;  %v4046_v21 = vpop.f32.mrb[6].mxu1  ;;  %v4467_v36 = vpop.permute.xlu0 %4466 }
 0x579   :  { %v8483_v45 = vadd.f32 %v4467_v36, %v4422_v55  ;;  %4620 = vrot.lane.b32.xlu1 %v4046_v21, %s7672_s18  ;;  %v4048_v37 = vpop.f32.mrb[7].mxu1  ;;  %v3353_v22 = vpop.f32.mrb[31].mxu0  ;;  %v4411_v55 = vadd.f32 %v8359_v24, %v4331_v41  ;;  %v8959_v24 = vld [vmem:[#allocation26_spill] sm:$0xff] }
 0x57a   :  { %v3426_v1 = vpack.c.bf16 %v3352_v13, %v3349_v7  ;;  %v4469_v30 = vpop.permute.xlu1 %4468  ;;  %v4333_v48 = vadd.f32 %v8304_v47, %v8959_v24 }
 0x57b   :  { %v8486_v51 = vadd.f32 %v4469_v30, %v4423_v3  ;;  %v4491_v21 = vadd.f32 %v8424_v32, %v4411_v55  ;;  %v8958_v3 = vld [vmem:[#allocation25_spill] sm:$0xff] }
 0x57c   :  { %6374 = vmatmul.mubr.msk.bf16.gmra.mrb[112].mxu1 %vm3433_vm1, %v3426_v1  ;;  %v4332_v8 = vadd.f32 %v8298_v46, %v8958_v3  ;;  %v4413_v30 = vadd.f32 %v8368_v62, %v4333_v48  ;;  %v8961_v62 = vld [vmem:[#allocation28_spill] sm:$0xff] }
 0x57d   :  { %v8965_v48 = vld [vmem:[#allocation32_spill] sm:$0xff] }
 0x57e   :  { %v4051_v43 = vpop.f32.mrb[8].mxu1  ;;  %v4412_v22 = vadd.f32 %v8364_v6, %v4332_v8  ;;  %v8964_v8 = vld [vmem:[#allocation31_spill] sm:$0xff] }
 0x57f   :  { %4622 = vrot.lane.b32.xlu0 %v4051_v43, %s7672_s18  ;;  %v4053_v2 = vpop.f32.mrb[9].mxu1 }
 0x580   :  { %v4054_v31 = vpop.f32.mrb[10].mxu1  ;;  %v4471_v60 = vpop.permute.xlu0 %4470  ;;  %v4492_v32 = vadd.f32 %v8428_v18, %v4412_v22  ;;  %v4335_v18 = vadd.f32 %v8310_v16, %v8961_v62 }
 0x581   :  { %v8496_v17 = vadd.f32 %v4471_v60, %v4424_v26  ;;  %4624 = vrot.lane.b32.xlu1 %v4054_v31, %s7672_s18  ;;  %v4056_v7 = vpop.f32.mrb[11].mxu1  ;;  %v4493_v26 = vadd.f32 %v8431_v4, %v4413_v30  ;;  %v8960_v31 = vld [vmem:[#allocation27_spill] sm:$0xff]  ;;  %v8966_v30 = vld [vmem:[#allocation33_spill] sm:$0xff] }
 0x582   :  { %v4473_v49 = vpop.permute.xlu1 %4472  ;;  %v4334_v6 = vadd.f32 %v8308_v27, %v8960_v31 }
 0x583   :  { %v8501_v9 = vadd.f32 %v4473_v49, %v4425_v10  ;;  %v4415_v49 = vadd.f32 %v8376_v34, %v4335_v18 }
 0x584   :  { %v4414_v10 = vadd.f32 %v8371_v40, %v4334_v6 }
 0x585   :  { %v4495_v27 = vadd.f32 %v8440_v57, %v4415_v49 }
 0x586   :  { %v4059_v52 = vpop.f32.mrb[12].mxu1  ;;  %v4494_v4 = vadd.f32 %v8436_v53, %v4414_v10  ;;  %v8963_v53 = vld [vmem:[#allocation30_spill] sm:$0xff] }
 0x587   :  { %4626 = vrot.lane.b32.xlu0 %v4059_v52, %s7672_s18  ;;  %v4061_v12 = vpop.f32.mrb[13].mxu1  ;;  %v8962_v52 = vld [vmem:[#allocation29_spill] sm:$0xff]  ;;  %v4337_v55 = vadd.f32 %v8316_v29, %v8963_v53 }
 0x588   :  { %v4062_v20 = vpop.f32.mrb[14].mxu1  ;;  %v4523_v13 = vpop.permute.xlu0 %4522  ;;  %v4336_v34 = vadd.f32 %v8320_v33, %v8962_v52 }
 0x589   :  { %v8510_v42 = vadd.f32 %v4523_v13, %v4490_v61  ;;  %4628 = vrot.lane.b32.xlu1 %v4062_v20, %s7672_s18  ;;  %v4064_v36 = vpop.f32.mrb[15].mxu1  ;;  %v4417_v20 = vadd.f32 %v8383_v56, %v4337_v55  ;;  %v4339_v56 = vadd.f32 %v8322_v50, %v8965_v48 }
 0x58a   :  { %v4525_v38 = vpop.permute.xlu1 %4524  ;;  %v4416_v61 = vadd.f32 %v8380_v25, %v4336_v34  ;;  %v4338_v25 = vadd.f32 %v8332_v39, %v8964_v8 }
 0x58b   :  { %v8515_v37 = vadd.f32 %v4525_v38, %v4491_v21  ;;  %v4497_v33 = vadd.f32 %v8448_v44, %v4417_v20 }
 0x58c   :  { %v4496_v13 = vadd.f32 %v8443_v23, %v4416_v61  ;;  %v4418_v23 = vadd.f32 %v8388_v35, %v4338_v25 }
 0x58e   :  { %v4067_v1 = vpop.f32.mrb[16].mxu1  ;;  %v4498_v44 = vadd.f32 %v8452_v54, %v4418_v23 }
 0x58f   :  { %4630 = vrot.lane.b32.xlu0 %v4067_v1, %s7672_s18  ;;  %v4069_v63 = vpop.f32.mrb[17].mxu1 }
 0x590   :  { %v4070_v43 = vpop.f32.mrb[18].mxu1  ;;  %v4527_v11 = vpop.permute.xlu0 %4526 }
 0x591   :  { %v8524_v46 = vadd.f32 %v4527_v11, %v4492_v32  ;;  %4632 = vrot.lane.b32.xlu1 %v4070_v43, %s7672_s18  ;;  %v4072_v2 = vpop.f32.mrb[19].mxu1  ;;  %v4419_v32 = vadd.f32 %v8966_v30, %v4339_v56 }
 0x592   :  { %v4529_v47 = vpop.permute.xlu1 %4528 }
 0x593   :  { %v8529_v60 = vadd.f32 %v4529_v47, %v4493_v26  ;;  %v4499_v11 = vadd.f32 %v8457_v59, %v4419_v32 }
 0x596   :  { %v4075_v7 = vpop.f32.mrb[20].mxu1 }
 0x597   :  { %4682 = vrot.lane.b32.xlu0 %v4075_v7, %s7673_s6  ;;  %v4077_v19 = vpop.f32.mrb[21].mxu1 }
 0x598   :  { %v4078_v14 = vpop.f32.mrb[22].mxu1  ;;  %v4531_v5 = vpop.permute.xlu0 %4530 }
 0x599   :  { %v8538_v41 = vadd.f32 %v4531_v5, %v4494_v4  ;;  %4684 = vrot.lane.b32.xlu1 %v4078_v14, %s7673_s6  ;;  %v4080_v16 = vpop.f32.mrb[23].mxu1 }
 0x59a   :  { %v4533_v28 = vpop.permute.xlu1 %4532 }
 0x59b   :  { %v8541_v40 = vadd.f32 %v4533_v28, %v4495_v27 }
 0x59e   :  { %v4083_v12 = vpop.f32.mrb[24].mxu1 }
 0x59f   :  { %4686 = vrot.lane.b32.xlu0 %v4083_v12, %s7673_s6  ;;  %v4085_v57 = vpop.f32.mrb[25].mxu1 }
 0x5a0   :  { %v4086_v21 = vpop.f32.mrb[26].mxu1 }
 0x5a1   :  { %v4535_v36 = vpop.permute.xlu0 %4534  ;;  %4688 = vrot.lane.b32.xlu1 %v4086_v21, %s7673_s6  ;;  %v4088_v38 = vpop.f32.mrb[27].mxu1 }
 0x5a2   :  { %v8553_v3 = vadd.f32 %v4535_v36, %v4496_v13 }
 0x5a3   :  { %v4537_v29 = vpop.permute.xlu1 %4536 }
 0x5a4   :  { %v8557_v24 = vadd.f32 %v4537_v29, %v4497_v33 }
 0x5a6   :  { %v4091_v22 = vpop.f32.mrb[28].mxu1 }
 0x5a7   :  { %4690 = vrot.lane.b32.xlu0 %v4091_v22, %s7673_s6  ;;  %v4093_v1 = vpop.f32.mrb[29].mxu1 }
 0x5a8   :  { %v4094_v63 = vpop.f32.mrb[30].mxu1 }
 0x5a9   :  { %v4539_v43 = vpop.permute.xlu0 %4538  ;;  %4692 = vrot.lane.b32.xlu1 %v4094_v63, %s7673_s6  ;;  %v4096_v39 = vpop.f32.mrb[31].mxu1 }
 0x5aa   :  { %v8567_v26 = vadd.f32 %v4539_v43, %v4498_v44 }
 0x5ab   :  { %v4541_v50 = vpop.permute.xlu1 %4540 }
 0x5ac   :  { %v8569_v2 = vadd.f32 %v4541_v50, %v4499_v11 }
 0x5af   :  { %v4099_v35 = vpop.f32.mrb[32].mxu1 }
 0x5b0   :  { %4694 = vrot.lane.b32.xlu0 %v4099_v35, %s7673_s6  ;;  %v4101_v47 = vpop.f32.mrb[33].mxu1 }
 0x5b1   :  { %v4543_v31 = vpop.permute.xlu0 %4542  ;;  %v4102_v6 = vpop.f32.mrb[34].mxu1 }
 0x5b2   :  { %v8573_v54 = vadd.f32 %v4543_v31, %v8467_v15  ;;  %4696 = vrot.lane.b32.xlu1 %v4102_v6, %s7673_s6  ;;  %v4104_v62 = vpop.f32.mrb[35].mxu1 }
 0x5b3   :  { %v4545_v18 = vpop.permute.xlu1 %4544 }
 0x5b4   :  { %v8577_v59 = vadd.f32 %v4545_v18, %v8470_v58 }
 0x5b7   :  { %v4107_v10 = vpop.f32.mrb[36].mxu1 }
 0x5b8   :  { %4698 = vrot.lane.b32.xlu0 %v4107_v10, %s7673_s6  ;;  %v4109_v7 = vpop.f32.mrb[37].mxu1 }
 0x5b9   :  { %v4547_v49 = vpop.permute.xlu0 %4546  ;;  %v4110_v4 = vpop.f32.mrb[38].mxu1 }
 0x5ba   :  { %v8581_v19 = vadd.f32 %v4547_v49, %v8483_v45  ;;  %4700 = vrot.lane.b32.xlu1 %v4110_v4, %s7673_s6  ;;  %v4112_v15 = vpop.f32.mrb[39].mxu1 }
 0x5bb   :  { %v4549_v14 = vpop.permute.xlu1 %4548 }
 0x5bc   :  { %v8585_v5 = vadd.f32 %v4549_v14, %v8486_v51 }
 0x5bf   :  { %v4115_v27 = vpop.f32.mrb[40].mxu1 }
 0x5c0   :  { %4702 = vrot.lane.b32.xlu0 %v4115_v27, %s7673_s6  ;;  %v4117_v58 = vpop.f32.mrb[41].mxu1 }
 0x5c1   :  { %v4551_v16 = vpop.permute.xlu0 %4550  ;;  %v4118_v28 = vpop.f32.mrb[42].mxu1 }
 0x5c2   :  { %v8589_v52 = vadd.f32 %v4551_v16, %v8496_v17  ;;  %4704 = vrot.lane.b32.xlu1 %v4118_v28, %s7673_s6  ;;  %v4120_v45 = vpop.f32.mrb[43].mxu1 }
 0x5c3   :  { %v4553_v34 = vpop.permute.xlu1 %4552 }
 0x5c4   :  { %v8593_v53 = vadd.f32 %v4553_v34, %v8501_v9 }
 0x5c7   :  { %v4123_v55 = vpop.f32.mrb[44].mxu1 }
 0x5c8   :  { %4706 = vrot.lane.b32.xlu0 %v4123_v55, %s7673_s6  ;;  %v4125_v51 = vpop.f32.mrb[45].mxu1 }
 0x5c9   :  { %v4126_v61 = vpop.f32.mrb[46].mxu1  ;;  %v8597_v57 = vpop.permute.xlu0 %4602 }
 0x5ca   :  { %4708 = vrot.lane.b32.xlu1 %v4126_v61, %s7673_s6  ;;  %v4128_v12 = vpop.f32.mrb[47].mxu1 }
 0x5cb   :  { %v8599_v20 = vpop.permute.xlu1 %4604 }
 0x5cf   :  { %v4131_v17 = vpop.f32.mrb[48].mxu1 }
 0x5d0   :  { %4710 = vrot.lane.b32.xlu0 %v4131_v17, %s7673_s6  ;;  %v4133_v13 = vpop.f32.mrb[49].mxu1 }
 0x5d1   :  { %v4607_v21 = vpop.permute.xlu0 %4606  ;;  %v4134_v36 = vpop.f32.mrb[50].mxu1 }
 0x5d2   :  { %v8603_v9 = vadd.f32 %v4607_v21, %v8524_v46  ;;  %4712 = vrot.lane.b32.xlu1 %v4134_v36, %s7673_s6  ;;  %v4136_v38 = vpop.f32.mrb[51].mxu1 }
 0x5d3   :  { %v4609_v33 = vpop.permute.xlu1 %4608 }
 0x5d4   :  { %v8607_v29 = vadd.f32 %v4609_v33, %v8529_v60 }
 0x5d7   :  { %v4139_v8 = vpop.f32.mrb[52].mxu1 }
 0x5d8   :  { %4762 = vrot.lane.b32.xlu0 %v4139_v8, %s7663_s15  ;;  %v4141_v25 = vpop.f32.mrb[53].mxu1 }
 0x5d9   :  { %v4611_v48 = vpop.permute.xlu0 %4610  ;;  %v4142_v56 = vpop.f32.mrb[54].mxu1 }
 0x5da   :  { %v8611_v23 = vadd.f32 %v4611_v48, %v8538_v41  ;;  %4764 = vrot.lane.b32.xlu1 %v4142_v56, %s7663_s15  ;;  %v4144_v46 = vpop.f32.mrb[55].mxu1 }
 0x5db   :  { %v4613_v22 = vpop.permute.xlu1 %4612 }
 0x5dc   :  { %v8615_v1 = vadd.f32 %v4613_v22, %v8541_v40 }
 0x5df   :  { %v4147_v30 = vpop.f32.mrb[56].mxu1 }
 0x5e0   :  { %4766 = vrot.lane.b32.xlu0 %v4147_v30, %s7663_s15  ;;  %v4149_v60 = vpop.f32.mrb[57].mxu1 }
 0x5e1   :  { %v4615_v32 = vpop.permute.xlu0 %4614  ;;  %v4150_v44 = vpop.f32.mrb[58].mxu1 }
 0x5e2   :  { %v8619_v63 = vadd.f32 %v4615_v32, %v8553_v3  ;;  %4768 = vrot.lane.b32.xlu1 %v4150_v44, %s7663_s15  ;;  %v4152_v41 = vpop.f32.mrb[59].mxu1 }
 0x5e3   :  { %v4617_v43 = vpop.permute.xlu1 %4616 }
 0x5e4   :  { %v8623_v39 = vadd.f32 %v4617_v43, %v8557_v24 }
 0x5e7   :  { %v4155_v11 = vpop.f32.mrb[60].mxu1 }
 0x5e8   :  { %4770 = vrot.lane.b32.xlu0 %v4155_v11, %s7663_s15  ;;  %v4157_v40 = vpop.f32.mrb[61].mxu1  ;;  %v7308_v11 = vld [vmem:[#allocation7] sm:$0xff]  }
 0x5e9   :  { %v4619_v50 = vpop.permute.xlu0 %4618  ;;  %v4158_v35 = vpop.f32.mrb[62].mxu1  ;;  %6495 = vmatprep.mubr.bf16.mxu1 %v7308_v11 }
 0x5ea   :  { %v8627_v47 = vadd.f32 %v4619_v50, %v8567_v26  ;;  %4772 = vrot.lane.b32.xlu1 %v4158_v35, %s7663_s15  ;;  %v4160_v3 = vpop.f32.mrb[63].mxu1 }
 0x5eb   :  { %v4621_v31 = vpop.permute.xlu1 %4620 }
 0x5ec   :  { %v8631_v6 = vadd.f32 %v4621_v31, %v8569_v2 }
 0x5ef   :  { %v4163_v62 = vpop.f32.mrb[64].mxu1 }
 0x5f0   :  { %4774 = vrot.lane.b32.xlu0 %v4163_v62, %s7663_s15  ;;  %v4165_v24 = vpop.f32.mrb[65].mxu1 }
 0x5f1   :  { %v4623_v18 = vpop.permute.xlu0 %4622  ;;  %v4166_v10 = vpop.f32.mrb[66].mxu1 }
 0x5f2   :  { %v8635_v7 = vadd.f32 %v4623_v18, %v8573_v54  ;;  %4776 = vrot.lane.b32.xlu1 %v4166_v10, %s7663_s15  ;;  %v4168_v26 = vpop.f32.mrb[67].mxu1 }
 0x5f3   :  { %v4625_v49 = vpop.permute.xlu1 %4624 }
 0x5f4   :  { %v8639_v4 = vadd.f32 %v4625_v49, %v8577_v59 }
 0x5f7   :  { %v4171_v15 = vpop.f32.mrb[68].mxu1 }
 0x5f8   :  { %4778 = vrot.lane.b32.xlu0 %v4171_v15, %s7663_s15  ;;  %v4173_v2 = vpop.f32.mrb[69].mxu1 }
 0x5f9   :  { %v4627_v14 = vpop.permute.xlu0 %4626  ;;  %v4174_v27 = vpop.f32.mrb[70].mxu1 }
 0x5fa   :  { %v8643_v58 = vadd.f32 %v4627_v14, %v8581_v19  ;;  %4780 = vrot.lane.b32.xlu1 %v4174_v27, %s7663_s15  ;;  %v4176_v54 = vpop.f32.mrb[71].mxu1 }
 0x5fb   :  { %v4629_v16 = vpop.permute.xlu1 %4628 }
 0x5fc   :  { %v8647_v28 = vadd.f32 %v4629_v16, %v8585_v5 }
 0x5ff   :  { %v4179_v45 = vpop.f32.mrb[72].mxu1 }
 0x600   :  { %4782 = vrot.lane.b32.xlu0 %v4179_v45, %s7663_s15  ;;  %v4181_v59 = vpop.f32.mrb[73].mxu1 }
 0x601   :  { %v4631_v34 = vpop.permute.xlu0 %4630  ;;  %v4182_v55 = vpop.f32.mrb[74].mxu1 }
 0x602   :  { %v8651_v51 = vadd.f32 %v4631_v34, %v8589_v52  ;;  %4784 = vrot.lane.b32.xlu1 %v4182_v55, %s7663_s15  ;;  %v4184_v19 = vpop.f32.mrb[75].mxu1  ;;  %v4842_v34 = vlaneseq }
 0x603   :  { %v4633_v61 = vpop.permute.xlu1 %4632 }
 0x604   :  { %v8655_v12 = vadd.f32 %v4633_v61, %v8593_v53 }
 0x607   :  { %v4187_v17 = vpop.f32.mrb[76].mxu1 }
 0x608   :  { %4786 = vrot.lane.b32.xlu0 %v4187_v17, %s7663_s15  ;;  %v4189_v5 = vpop.f32.mrb[77].mxu1 }
 0x609   :  { %v4190_v13 = vpop.f32.mrb[78].mxu1  ;;  %v4683_v41 = vpop.permute.xlu0 %4682 }
 0x60a   :  { %4788 = vrot.lane.b32.xlu1 %v4190_v13, %s7663_s15  ;;  %v4192_v21 = vpop.f32.mrb[79].mxu1  ;;  %v8695_v13 = vshrl.u32 %v4842_v34, 7 }
 0x60b   :  { %v4685_v40 = vpop.permute.xlu1 %4684 }
 0x60f   :  { %v4195_v36 = vpop.f32.mrb[80].mxu1 }
 0x610   :  { %4790 = vrot.lane.b32.xlu0 %v4195_v36, %s7663_s15  ;;  %v4197_v52 = vpop.f32.mrb[81].mxu1 }
 0x611   :  { %v4198_v38 = vpop.f32.mrb[82].mxu1  ;;  %v4687_v50 = vpop.permute.xlu0 %4686  ;;  %v4650_v52 = vadd.f32 %v8597_v57, %v8510_v42 }
 0x612   :  { %4792 = vrot.lane.b32.xlu1 %v4198_v38, %s7663_s15  ;;  %v4200_v33 = vpop.f32.mrb[83].mxu1 }
 0x613   :  { %v4689_v3 = vpop.permute.xlu1 %4688  ;;  %v4844_v33 = vsub.s32 0, %v8695_v13 }
 0x617   :  { %v4203_v8 = vpop.f32.mrb[84].mxu1 }
 0x618   :  { %v4204_v25 = vpop.f32.mrb[85].mxu1 }
 0x619   :  { %v4206_v53 = vpop.f32.mrb[86].mxu1  ;;  %v4691_v24 = vpop.permute.xlu0 %4690 }
 0x61a   :  { %v4207_v48 = vpop.f32.mrb[87].mxu1 }
 0x61b   :  { %v4693_v10 = vpop.permute.xlu1 %4692 }
 0x61f   :  { %v4211_v56 = vpop.f32.mrb[88].mxu1 }
 0x620   :  { %v8661_v46 = vpop.f32.mrb[89].mxu1  ;;  %v8708_v56 = vld [vmem:[#allocation13] sm:$0xff] }
 0x621   :  { %v4214_v22 = vpop.f32.mrb[90].mxu1  ;;  %v8717_v42 = vrot.slane %v8708_v56, %v4844_v33 }
 0x622   :  { %v8663_v30 = vpop.f32.mrb[91].mxu1  ;;  %v8673_v26 = vpop.permute.xlu0 %4694  ;;  %v4651_v22 = vadd.f32 %v8599_v20, %v8515_v37 }
 0x624   :  { %v8675_v15 = vpop.permute.xlu1 %4696 }
 0x627   :  { %v4219_v60 = vpop.f32.mrb[92].mxu1 }
 0x628   :  { %v8665_v32 = vpop.f32.mrb[93].mxu1  ;;  %v4730_v60 = vadd.f32 %v4683_v41, %v4650_v52  ;;  %v4732_v41 = vadd.f32 %v4687_v50, %v8603_v9 }
 0x629   :  { %v4222_v44 = vpop.f32.mrb[94].mxu1 }
 0x62a   :  { %v8667_v43 = vpop.f32.mrb[95].mxu1  ;;  %v8679_v27 = vpop.permute.xlu0 %4698 }
 0x62c   :  { %v8683_v16 = vpop.permute.xlu1 %4700 }
 0x62f   :  { %v4227_v35 = vpop.f32.mrb[96].mxu1 }
 0x630   :  { %v8669_v31 = vpop.f32.mrb[97].mxu1 }
 0x631   :  { %v4230_v62 = vpop.f32.mrb[98].mxu1 }
 0x632   :  { %v8671_v18 = vpop.f32.mrb[99].mxu1  ;;  %v8685_v45 = vpop.permute.xlu0 %4702  ;;  %v4731_v62 = vadd.f32 %v4685_v40, %v4651_v22 }
 0x634   :  { %v8687_v55 = vpop.permute.xlu1 %4704 }
 0x637   :  { %v4235_v49 = vpop.f32.mrb[100].mxu1 }
 0x638   :  { %v8677_v2 = vpop.f32.mrb[101].mxu1 }
 0x639   :  { %v4238_v14 = vpop.f32.mrb[102].mxu1 }
 0x63a   :  { %v8681_v54 = vpop.f32.mrb[103].mxu1  ;;  %v8691_v17 = vpop.permute.xlu0 %4706 }
 0x63c   :  { %v8697_v21 = vpop.permute.xlu1 %4708 }
 0x63f   :  { %v4243_v59 = vpop.f32.mrb[104].mxu1 }
 0x640   :  { %v8689_v19 = vpop.f32.mrb[105].mxu1 }
 0x641   :  { %v4246_v61 = vpop.f32.mrb[106].mxu1 }
 0x642   :  { %v8693_v5 = vpop.f32.mrb[107].mxu1  ;;  %v8699_v36 = vpop.permute.xlu0 %4710 }
 0x644   :  { %v8704_v8 = vpop.permute.xlu1 %4712 }
 0x647   :  { %v4251_v38 = vpop.f32.mrb[108].mxu1 }
 0x648   :  { %v8706_v53 = vpop.f32.mrb[109].mxu1 }
 0x649   :  { %v4254_v44 = vpop.f32.mrb[110].mxu1 }
 0x64a   :  { %v4763_v11 = vpop.permute.xlu0 %4762  ;;  %v8712_v35 = vpop.f32.mrb[111].mxu1 }
 0x64b   :  { %v4810_v49 = vadd.f32 %v4763_v11, %v4730_v60 }
 0x64c   :  { %v4765_v57 = vpop.permute.xlu1 %4764 }
 0x64d   :  { %v4826_v14 = vadd.f32 %v4810_v49, %v4204_v25  ;;  %v4811_v59 = vadd.f32 %v4765_v57, %v4731_v62  ;;  %v4733_v25 = vadd.f32 %v4689_v3, %v8607_v29  ;;  %v4734_v57 = vadd.f32 %v4691_v24, %v8611_v23 }
 0x64f   :  { %v8720_v34 = vadd.f32 %v8717_v42, %v4826_v14  ;;  %v4827_v61 = vadd.f32 %v4811_v59, %v4207_v48  ;;  %v4259_v37 = vpop.f32.mrb[112].mxu1  ;;  %v4735_v59 = vadd.f32 %v4693_v10, %v8615_v1  ;;  %v4736_v1 = vadd.f32 %v8673_v26, %v8619_v63 }
 0x650   :  { %v8722_v20 = vpop.f32.mrb[113].mxu1 }
 0x651   :  { %v6375_v40 = vmul.f32 -1.442695, %v8720_v34  ;;  %v8727_v52 = vadd.f32 %v8717_v42, %v4827_v61  ;;  %v4262_v38 = vpop.f32.mrb[114].mxu1 }
 0x652   :  { %v4767_v22 = vpop.permute.xlu0 %4766  ;;  %v8729_v60 = vpop.f32.mrb[115].mxu1 }
 0x653   :  { %7331 = vpow2.f32 %v6375_v40  ;;  %v6376_v44 = vmul.f32 -1.442695, %v8727_v52  ;;  %v4812_v48 = vadd.f32 %v4767_v22, %v4732_v41 }
 0x654   :  { %v4769_v11 = vpop.permute.xlu1 %4768 }
 0x655   :  { %7333 = vpow2.f32 %v6376_v44  ;;  %v4828_v62 = vadd.f32 %v4812_v48, %v8661_v46  ;;  %v4813_v9 = vadd.f32 %v4769_v11, %v4733_v25  ;;  %v4737_v48 = vadd.f32 %v8675_v15, %v8623_v39 }
 0x656   :  { %v4738_v39 = vadd.f32 %v8679_v27, %v8627_v47 }
 0x657   :  { %v8735_v50 = vadd.f32 %v8717_v42, %v4828_v62  ;;  %v4829_v49 = vadd.f32 %v4813_v9, %v8663_v30 }
 0x659   :  { %v6377_v14 = vmul.f32 -1.442695, %v8735_v50  ;;  %v8741_v29 = vadd.f32 %v8717_v42, %v4829_v49 }
 0x65a   :  { %v4771_v3 = vpop.permute.xlu0 %4770 }
 0x65b   :  { %7335 = vpow2.f32 %v6377_v14  ;;  %v6378_v61 = vmul.f32 -1.442695, %v8741_v29  ;;  %v4814_v46 = vadd.f32 %v4771_v3, %v4734_v57 }
 0x65c   :  { %v4773_v37 = vpop.permute.xlu1 %4772 }
 0x65d   :  { %v7332_v41 = vpop.eup %7331  ;;  %7337 = vpow2.f32 %v6378_v61  ;;  %v4830_v40 = vadd.f32 %v4814_v46, %v8665_v32  ;;  %v4815_v30 = vadd.f32 %v4773_v37, %v4735_v59  ;;  %v4739_v37 = vadd.f32 %v8683_v16, %v8631_v6 }
 0x65e   :  { %v4910_v38 = vadd.f32 1.0, %v7332_v41 }
 0x65f   :  { %v7334_v23 = vpop.eup %7333  ;;  %v8747_v24 = vadd.f32 %v8717_v42, %v4830_v40  ;;  %v4831_v22 = vadd.f32 %v4815_v30, %v8667_v43 }
 0x660   :  { %7339 = vrcp.f32 %v4910_v38  ;;  %v4911_v25 = vadd.f32 1.0, %v7334_v23 }
 0x661   :  { %v6379_v10 = vmul.f32 -1.442695, %v8747_v24  ;;  %v8754_v44 = vadd.f32 %v8717_v42, %v4831_v22 }
 0x662   :  { %7341 = vrcp.f32 %v4911_v25  ;;  %v4775_v32 = vpop.permute.xlu0 %4774 }
 0x663   :  { %7343 = vpow2.f32 %v6379_v10  ;;  %v6380_v11 = vmul.f32 -1.442695, %v8754_v44  ;;  %v4816_v62 = vadd.f32 %v4775_v32, %v4736_v1 }
 0x664   :  { %v4777_v43 = vpop.permute.xlu1 %4776 }
 0x665   :  { %v7336_v9 = vpop.eup %7335  ;;  %7345 = vpow2.f32 %v6380_v11  ;;  %v4832_v49 = vadd.f32 %v4816_v62, %v8669_v31  ;;  %v4817_v63 = vadd.f32 %v4777_v43, %v4737_v48  ;;  %v4741_v62 = vadd.f32 %v8687_v55, %v8639_v4 }
 0x666   :  { %v4912_v26 = vadd.f32 1.0, %v7336_v9 }
 0x667   :  { %v7338_v57 = vpop.eup %7337  ;;  %v8761_v14 = vadd.f32 %v8717_v42, %v4832_v49  ;;  %v4833_v3 = vadd.f32 %v4817_v63, %v8671_v18 }
 0x668   :  { %7347 = vrcp.f32 %v4912_v26  ;;  %v4913_v59 = vadd.f32 1.0, %v7338_v57 }
 0x669   :  { %v6381_v15 = vmul.f32 -1.442695, %v8761_v14  ;;  %v8768_v61 = vadd.f32 %v8717_v42, %v4833_v3 }
 0x66a   :  { %v7340_v46 = vpop.eup %7339  ;;  %7349 = vrcp.f32 %v4913_v59  ;;  %v4779_v31 = vpop.permute.xlu0 %4778 }
 0x66b   :  { %7351 = vpow2.f32 %v6381_v15  ;;  %v6382_v41 = vmul.f32 -1.442695, %v8768_v61  ;;  %v4818_v18 = vadd.f32 %v4779_v31, %v4738_v39  ;;  %v4958_v38 = vmul.f32 %v7340_v46, %v8720_v34 }
 0x66c   :  { %v7342_v40 = vpop.eup %7341  ;;  %v4781_v30 = vpop.permute.xlu1 %4780  ;;  %v4740_v34 = vadd.f32 %v8685_v45, %v8635_v7 }
 0x66d   :  { %v7344_v47 = vpop.eup %7343  ;;  %7353 = vpow2.f32 %v6382_v41  ;;  %v4834_v27 = vadd.f32 %v4818_v18, %v8677_v2  ;;  %v4819_v23 = vadd.f32 %v4781_v30, %v4739_v37  ;;  %v4959_v22 = vmul.f32 %v7342_v40, %v8727_v52 }
 0x66e   :  { %v4914_v25 = vadd.f32 1.0, %v7344_v47  ;;  %v4743_v37 = vadd.f32 %v8697_v21, %v8647_v28 }
 0x66f   :  { %v7346_v1 = vpop.eup %7345  ;;  %v8777_v10 = vadd.f32 %v8717_v42, %v4834_v27  ;;  %v4835_v6 = vadd.f32 %v4819_v23, %v8681_v54  ;;  %v4974_v16 = vpack.c.bf16 %v4959_v22, %v4958_v38 }
 0x670   :  { %7355 = vrcp.f32 %v4914_v25  ;;  %v4915_v32 = vadd.f32 1.0, %v7346_v1 }
 0x671   :  { %v6383_v48 = vmul.f32 -1.442695, %v8777_v10  ;;  %v8784_v2 = vadd.f32 %v8717_v42, %v4835_v6  ;;  %6479 = vmatprep.subr.bf16.mxu1 %v4974_v16 }
 0x672   :  { %v7348_v52 = vpop.eup %7347  ;;  %7357 = vrcp.f32 %v4915_v32  ;;  %v4783_v11 = vpop.permute.xlu0 %4782  ;;  %6480 = vmatpush3.bf16.msra.mxu1 %v4974_v16  ;;  %v4745_v16 = vadd.f32 %v8704_v8, %v8655_v12 }
 0x673   :  { %7359 = vpow2.f32 %v6383_v48  ;;  %v6384_v54 = vmul.f32 -1.442695, %v8784_v2  ;;  %v4820_v43 = vadd.f32 %v4783_v11, %v4740_v34  ;;  %v4960_v7 = vmul.f32 %v7348_v52, %v8735_v50 }
 0x674   :  { %v7350_v9 = vpop.eup %7349  ;;  %v4785_v49 = vpop.permute.xlu1 %4784  ;;  %v4742_v50 = vadd.f32 %v8691_v17, %v8643_v58 }
 0x675   :  { %v7352_v45 = vpop.eup %7351  ;;  %7361 = vpow2.f32 %v6384_v54  ;;  %v4836_v63 = vadd.f32 %v4820_v43, %v8689_v19  ;;  %v4821_v26 = vadd.f32 %v4785_v49, %v4741_v62  ;;  %v4961_v57 = vmul.f32 %v7350_v9, %v8741_v29 }
 0x676   :  { %v4916_v3 = vadd.f32 1.0, %v7352_v45 }
 0x677   :  { %v7354_v59 = vpop.eup %7353  ;;  %v8793_v39 = vadd.f32 %v8717_v42, %v4836_v63  ;;  %v4837_v4 = vadd.f32 %v4821_v26, %v8693_v5  ;;  %v4975_v55 = vpack.c.bf16 %v4961_v57, %v4960_v7 }
 0x678   :  { %7363 = vrcp.f32 %v4916_v3  ;;  %v4917_v15 = vadd.f32 1.0, %v7354_v59 }
 0x679   :  { %v6385_v46 = vmul.f32 -1.442695, %v8793_v39  ;;  %v8800_v19 = vadd.f32 %v8717_v42, %v4837_v4  ;;  %6481 = vmatprep.subr.bf16.mxu1 %v4975_v55 }
 0x67a   :  { %v7356_v29 = vpop.eup %7355  ;;  %7365 = vrcp.f32 %v4917_v15  ;;  %v4787_v31 = vpop.permute.xlu0 %4786  ;;  %6482 = vmatpush3.bf16.msra.mxu1 %v4975_v55 }
 0x67b   :  { %7367 = vpow2.f32 %v6385_v46  ;;  %v6386_v5 = vmul.f32 -1.442695, %v8800_v19  ;;  %v4822_v41 = vadd.f32 %v4787_v31, %v4742_v50  ;;  %v4962_v58 = vmul.f32 %v7356_v29, %v8747_v24 }
 0x67c   :  { %v7358_v18 = vpop.eup %7357  ;;  %v4789_v40 = vpop.permute.xlu1 %4788  ;;  %v4744_v24 = vadd.f32 %v8699_v36, %v8651_v51 }
 0x67d   :  { %v7360_v17 = vpop.eup %7359  ;;  %7369 = vpow2.f32 %v6386_v5  ;;  %v4838_v30 = vadd.f32 %v4822_v41, %v8706_v53  ;;  %v4823_v38 = vadd.f32 %v4789_v40, %v4743_v37  ;;  %v4963_v47 = vmul.f32 %v7358_v18, %v8754_v44 }
 0x67e   :  { %v4918_v27 = vadd.f32 1.0, %v7360_v17 }
 0x67f   :  { %v7362_v23 = vpop.eup %7361  ;;  %v8809_v22 = vadd.f32 %v8717_v42, %v4838_v30  ;;  %v4839_v28 = vadd.f32 %v4823_v38, %v8712_v35  ;;  %v4976_v21 = vpack.c.bf16 %v4963_v47, %v4962_v58  ;;  %v7309_v38 = vld [vmem:[#allocation7 + $0x8] sm:$0xff]   ;;  %v7310_v47 = vld [vmem:[#allocation7 + $0x10] sm:$0xff]  }
 0x680   :  { %7371 = vrcp.f32 %v4918_v27  ;;  %v4919_v25 = vadd.f32 1.0, %v7362_v23  ;;  %v7311_v27 = vld [vmem:[#allocation7 + $0x18] sm:$0xff]   ;;  %v7312_v23 = vld [vmem:[#allocation7 + $0x20] sm:$0xff]  }
 0x681   :  { %v6387_v1 = vmul.f32 -1.442695, %v8809_v22  ;;  %v4859_v53 = vadd.f32 %v8717_v42, %v4839_v28  ;;  %6483 = vmatprep.subr.bf16.mxu1 %v4976_v21  ;;  %v7314_v28 = vld [vmem:[#allocation7 + $0x30] sm:$0xff]  }
 0x682   :  { %v7364_v6 = vpop.eup %7363  ;;  %7373 = vrcp.f32 %v4919_v25  ;;  %v4791_v44 = vpop.permute.xlu0 %4790  ;;  %6484 = vmatpush3.bf16.msra.mxu1 %v4976_v21  ;;  %v7315_v21 = vld [vmem:[#allocation7 + $0x38] sm:$0xff]   ;;  %v7316_v25 = vld [vmem:[#allocation7 + $0x40] sm:$0xff]  }
 0x683   :  { %7375 = vpow2.f32 %v6387_v1  ;;  %v6388_v35 = vmul.f32 -1.442695, %v4859_v53  ;;  %v4824_v32 = vadd.f32 %v4791_v44, %v4744_v24  ;;  %v4964_v52 = vmul.f32 %v7364_v6, %v8761_v14  ;;  %v7317_v24 = vld [vmem:[#allocation7 + $0x48] sm:$0xff]   ;;  %v7318_v1 = vld [vmem:[#allocation7 + $0x50] sm:$0xff]   ;;  %v7320_v6 = vld [vmem:[#allocation7 + $0x60] sm:$0xff]  }
 0x684   :  { %v7366_v34 = vpop.eup %7365  ;;  %v4793_v48 = vpop.permute.xlu1 %4792  ;;  %v7321_v44 = vld [vmem:[#allocation7 + $0x68] sm:$0xff]  }
 0x685   :  { %v7368_v51 = vpop.eup %7367  ;;  %7377 = vpow2.f32 %v6388_v35  ;;  %v4840_v36 = vadd.f32 %v4824_v32, %v8722_v20  ;;  %v4825_v11 = vadd.f32 %v4793_v48, %v4745_v16  ;;  %v4965_v62 = vmul.f32 %v7366_v34, %v8768_v61  ;;  %v7322_v16 = vld [vmem:[#allocation7 + $0x70] sm:$0xff]   ;;  %v7323_v35 = vld [vmem:[#allocation7 + $0x78] sm:$0xff]   ;;  %v7324_v32 = vld [vmem:[#allocation7 + $0x80] sm:$0xff]  }
 0x686   :  { %v4920_v54 = vadd.f32 1.0, %v7368_v51  ;;  %v7325_v34 = vld [vmem:[#allocation7 + $0x88] sm:$0xff]   ;;  %v7328_v48 = vld [vmem:[#allocation8 + $0x4] ss:$8 sps:$4 sm:$0xff]  }
 0x687   :  { %v7370_v43 = vpop.eup %7369  ;;  %v4860_v9 = vadd.f32 %v8717_v42, %v4840_v36  ;;  %v4841_v12 = vadd.f32 %v4825_v11, %v8729_v60  ;;  %v4977_v8 = vpack.c.bf16 %v4965_v62, %v4964_v52  ;;  %v7326_v52 = vld [vmem:[#allocation8] ss:$8 sps:$4 sm:$0xff]  }
 0x688   :  { %7379 = vrcp.f32 %v4920_v54  ;;  %v4921_v49 = vadd.f32 1.0, %v7370_v43 }
 0x689   :  { %v6389_v7 = vmul.f32 -1.442695, %v4860_v9  ;;  %v4861_v45 = vadd.f32 %v8717_v42, %v4841_v12  ;;  %6485 = vmatprep.subr.bf16.mxu1 %v4977_v8 }
 0x68a   :  { %v7372_v14 = vpop.eup %7371  ;;  %7381 = vrcp.f32 %v4921_v49  ;;  %6486 = vmatpush3.bf16.msra.mxu1 %v4977_v8 }
 0x68b   :  { %7383 = vpow2.f32 %v6389_v7  ;;  %v6390_v20 = vmul.f32 -1.442695, %v4861_v45  ;;  %v4966_v26 = vmul.f32 %v7372_v14, %v8777_v10 }
 0x68c   :  { %v7374_v63 = vpop.eup %7373 }
 0x68d   :  { %v7376_v61 = vpop.eup %7375  ;;  %7385 = vpow2.f32 %v6390_v20  ;;  %v4967_v57 = vmul.f32 %v7374_v63, %v8784_v2 }
 0x68e   :  { %v4922_v60 = vadd.f32 1.0, %v7376_v61 }
 0x68f   :  { %v7378_v3 = vpop.eup %7377  ;;  %v4978_v59 = vpack.c.bf16 %v4967_v57, %v4966_v26 }
 0x690   :  { %7387 = vrcp.f32 %v4922_v60  ;;  %v4923_v4 = vadd.f32 1.0, %v7378_v3 }
 0x691   :  { %6487 = vmatprep.subr.bf16.mxu1 %v4978_v59 }
 0x692   :  { %v7380_v42 = vpop.eup %7379  ;;  %7389 = vrcp.f32 %v4923_v4  ;;  %6488 = vmatpush3.bf16.msra.mxu1 %v4978_v59 }
 0x693   :  { %v4968_v50 = vmul.f32 %v7380_v42, %v8793_v39 }
 0x694   :  { %v7382_v55 = vpop.eup %7381 }
 0x695   :  { %v7384_v15 = vpop.eup %7383  ;;  %v4969_v46 = vmul.f32 %v7382_v55, %v8800_v19 }
 0x696   :  { %v4924_v29 = vadd.f32 1.0, %v7384_v15 }
 0x697   :  { %v7386_v31 = vpop.eup %7385  ;;  %v4979_v10 = vpack.c.bf16 %v4969_v46, %v4968_v50 }
 0x698   :  { %7391 = vrcp.f32 %v4924_v29  ;;  %v4925_v2 = vadd.f32 1.0, %v7386_v31 }
 0x699   :  { %6489 = vmatprep.subr.bf16.mxu1 %v4979_v10 }
 0x69a   :  { %v7388_v37 = vpop.eup %7387  ;;  %7393 = vrcp.f32 %v4925_v2  ;;  %6490 = vmatpush3.bf16.msra.mxu1 %v4979_v10 }
 0x69b   :  { %v4970_v41 = vmul.f32 %v7388_v37, %v8809_v22  ;;  %v7313_v22 = vld [vmem:[#allocation7 + $0x28] sm:$0xff]  }
 0x69c   :  { %v7390_v5 = vpop.eup %7389 }
 0x69d   :  { %v4971_v18 = vmul.f32 %v7390_v5, %v4859_v53  ;;  %v7319_v53 = vld [vmem:[#allocation7 + $0x58] sm:$0xff]  }
 0x69f   :  { %v4980_v40 = vpack.c.bf16 %v4971_v18, %v4970_v41 }
 0x6a1   :  { %6491 = vmatprep.subr.bf16.mxu1 %v4980_v40 }
 0x6a2   :  { %v7392_v58 = vpop.eup %7391  ;;  %6492 = vmatpush3.bf16.msra.mxu1 %v4980_v40 }
 0x6a3   :  { %v4972_v17 = vmul.f32 %v7392_v58, %v4860_v9 }
 0x6a4   :  { %v7394_v39 = vpop.eup %7393 }
 0x6a5   :  { %v4973_v19 = vmul.f32 %v7394_v39, %v4861_v45 }
 0x6a7   :  { %v4981_v30 = vpack.c.bf16 %v4973_v19, %v4972_v17 }
 0x6a9   :  { %6493 = vmatprep.subr.bf16.mxu1 %v4981_v30 }
 0x6aa   :  { %6494 = vmatpush3.bf16.msra.mxu1 %v4981_v30 }
 0x6ab   :  { %5388 = vmatprep.subr.bf16.mxu1 %v7328_v48 }
 0x6ad   :  { %6496 = vmatmul.mubr.bf16.vlgmr.msra.gmra.mrb[116].mxu1 %v7309_v38 }
 0x6ae   :  { %6499 = vmatprep.mubr.bf16.mxu1 %v7310_v47  ;;  %5389 = vmatpush1.bf16.msra.mxu1 %v7326_v52 }
 0x6b5   :  { %6500 = vmatmul.mubr.bf16.gmra.mrb[120].mxu1 %v7311_v27 }
 0x6b6   :  { %6503 = vmatprep.mubr.bf16.mxu1 %v7312_v23 }
 0x6bd   :  { %6504 = vmatmul.mubr.bf16.gmra.mrb[124].mxu1 %v7313_v22 }
 0x6be   :  { %6507 = vmatprep.mubr.bf16.mxu1 %v7314_v28 }
 0x6c5   :  { %6508 = vmatmul.mubr.bf16.gmra.mrb[128].mxu1 %v7315_v21 }
 0x6c6   :  { %6511 = vmatprep.mubr.bf16.mxu1 %v7316_v25 }
 0x6cd   :  { %6512 = vmatmul.mubr.bf16.gmra.mrb[132].mxu1 %v7317_v24 }
 0x6ce   :  { %6515 = vmatprep.mubr.bf16.mxu1 %v7318_v1 }
 0x6d5   :  { %6516 = vmatmul.mubr.bf16.gmra.mrb[136].mxu1 %v7319_v53 }
 0x6d6   :  { %6519 = vmatprep.mubr.bf16.mxu1 %v7320_v6 }
 0x6dd   :  { %6520 = vmatmul.mubr.bf16.gmra.mrb[140].mxu1 %v7321_v44 }
 0x6de   :  { %6523 = vmatprep.mubr.bf16.mxu1 %v7322_v16 }
 0x6e5   :  { %6524 = vmatmul.mubr.bf16.gmra.mrb[144].mxu1 %v7323_v35 }
 0x6e6   :  { %6527 = vmatprep.mubr.bf16.mxu1 %v7324_v32 }
 0x6ed   :  { %6528 = vmatmul.mubr.bf16.gmra.mrb[148].mxu1 %v7325_v34 }
 0x6ee   :  { %5420 = vmatprep.mubr.bf16.mxu1 %v7668_v0 }
 0x780   :  { %v6497_v51 = vpop.f32.mrb[116].mxu1 }
 0x781   :  { %v5160_v36 = vpop.f32.mrb[117].mxu1 }
 0x782   :  { %v6498_v11 = vpop.f32.mrb[118].mxu1 }
 0x783   :  { %v5304_v62 = vpack.c.bf16 %v6498_v11, %v6497_v51  ;;  %v5163_v54 = vpop.f32.mrb[119].mxu1 }
 0x784   :  { %v5303_v43 = vpack.c.bf16 %v5163_v54, %v5160_v36 }
 0x786   :  { %6411 = vmatmul.mubr.msk.bf16.vlgmr.msra.gmra.mrb[152].mxu1 %vm5333_vm2, %v5303_v43 }
 0x787   :  { %5428 = vmatprep.mubr.bf16.mxu1 %v7668_v0 }
 0x788   :  { %v6501_v9 = vpop.f32.mrb[120].mxu1 }
 0x789   :  { %v5176_v12 = vpop.f32.mrb[121].mxu1 }
 0x78a   :  { %v6502_v8 = vpop.f32.mrb[122].mxu1 }
 0x78b   :  { %v5306_v49 = vpack.c.bf16 %v6502_v8, %v6501_v9  ;;  %v5179_v7 = vpop.f32.mrb[123].mxu1 }
 0x78c   :  { %v5305_v45 = vpack.c.bf16 %v5179_v7, %v5176_v12 }
 0x78e   :  { %6412 = vmatmul.mubr.msk.bf16.gmra.mrb[156].mxu1 %vm5333_vm2, %v5304_v62 }
 0x78f   :  { %5436 = vmatprep.mubr.bf16.mxu1 %v7668_v0 }
 0x790   :  { %v6505_v14 = vpop.f32.mrb[124].mxu1 }
 0x791   :  { %v5192_v20 = vpop.f32.mrb[125].mxu1 }
 0x792   :  { %v6506_v63 = vpop.f32.mrb[126].mxu1 }
 0x793   :  { %v5308_v61 = vpack.c.bf16 %v6506_v63, %v6505_v14  ;;  %v5195_v26 = vpop.f32.mrb[127].mxu1 }
 0x794   :  { %v5307_v57 = vpack.c.bf16 %v5195_v26, %v5192_v20 }
 0x796   :  { %6413 = vmatmul.mubr.msk.bf16.gmra.mrb[160].mxu1 %vm5333_vm2, %v5305_v45 }
 0x797   :  { %5444 = vmatprep.mubr.bf16.mxu1 %v7668_v0 }
 0x798   :  { %v6509_v60 = vpop.f32.mrb[128].mxu1 }
 0x799   :  { %v5208_v3 = vpop.f32.mrb[129].mxu1 }
 0x79a   :  { %v6510_v59 = vpop.f32.mrb[130].mxu1 }
 0x79b   :  { %v5310_v4 = vpack.c.bf16 %v6510_v59, %v6509_v60  ;;  %v5211_v42 = vpop.f32.mrb[131].mxu1 }
 0x79c   :  { %v5309_v55 = vpack.c.bf16 %v5211_v42, %v5208_v3 }
 0x79e   :  { %6414 = vmatmul.mubr.msk.bf16.gmra.mrb[164].mxu1 %vm5333_vm2, %v5306_v49 }
 0x79f   :  { %5452 = vmatprep.mubr.bf16.mxu1 %v7668_v0 }
 0x7a0   :  { %v6513_v15 = vpop.f32.mrb[132].mxu1 }
 0x7a1   :  { %v5224_v50 = vpop.f32.mrb[133].mxu1 }
 0x7a2   :  { %v6514_v46 = vpop.f32.mrb[134].mxu1 }
 0x7a3   :  { %v5312_v29 = vpack.c.bf16 %v6514_v46, %v6513_v15  ;;  %v5227_v31 = vpop.f32.mrb[135].mxu1 }
 0x7a4   :  { %v5311_v10 = vpack.c.bf16 %v5227_v31, %v5224_v50 }
 0x7a6   :  { %6415 = vmatmul.mubr.msk.bf16.gmra.mrb[168].mxu1 %vm5333_vm2, %v5307_v57 }
 0x7a7   :  { %5460 = vmatprep.mubr.bf16.mxu1 %v7668_v0 }
 0x7a8   :  { %v6517_v2 = vpop.f32.mrb[136].mxu1 }
 0x7a9   :  { %v5240_v37 = vpop.f32.mrb[137].mxu1 }
 0x7aa   :  { %v6518_v5 = vpop.f32.mrb[138].mxu1 }
 0x7ab   :  { %v5314_v41 = vpack.c.bf16 %v6518_v5, %v6517_v2  ;;  %v5243_v18 = vpop.f32.mrb[139].mxu1 }
 0x7ac   :  { %v5313_v40 = vpack.c.bf16 %v5243_v18, %v5240_v37 }
 0x7ae   :  { %6416 = vmatmul.mubr.msk.bf16.gmra.mrb[172].mxu1 %vm5333_vm2, %v5308_v61 }
 0x7af   :  { %5468 = vmatprep.mubr.bf16.mxu1 %v7668_v0 }
 0x7b0   :  { %v6521_v58 = vpop.f32.mrb[140].mxu1 }
 0x7b1   :  { %v5256_v39 = vpop.f32.mrb[141].mxu1 }
 0x7b2   :  { %v6522_v17 = vpop.f32.mrb[142].mxu1 }
 0x7b3   :  { %v5316_v19 = vpack.c.bf16 %v6522_v17, %v6521_v58  ;;  %v5259_v30 = vpop.f32.mrb[143].mxu1 }
 0x7b4   :  { %v5315_v38 = vpack.c.bf16 %v5259_v30, %v5256_v39 }
 0x7b6   :  { %6417 = vmatmul.mubr.msk.bf16.gmra.mrb[176].mxu1 %vm5333_vm2, %v5309_v55 }
 0x7b7   :  { %5476 = vmatprep.mubr.bf16.mxu1 %v7668_v0 }
 0x7b8   :  { %v6525_v47 = vpop.f32.mrb[144].mxu1 }
 0x7b9   :  { %v5272_v27 = vpop.f32.mrb[145].mxu1 }
 0x7ba   :  { %v6526_v23 = vpop.f32.mrb[146].mxu1 }
 0x7bb   :  { %v5318_v22 = vpack.c.bf16 %v6526_v23, %v6525_v47  ;;  %v5275_v28 = vpop.f32.mrb[147].mxu1 }
 0x7bc   :  { %v5317_v21 = vpack.c.bf16 %v5275_v28, %v5272_v27 }
 0x7be   :  { %6418 = vmatmul.mubr.msk.bf16.gmra.mrb[180].mxu1 %vm5333_vm2, %v5310_v4 }
 0x7bf   :  { %5484 = vmatprep.mubr.bf16.mxu1 %v7668_v0 }
 0x7c0   :  { %v6529_v25 = vpop.f32.mrb[148].mxu1 }
 0x7c1   :  { %v5288_v24 = vpop.f32.mrb[149].mxu1 }
 0x7c2   :  { %v6530_v1 = vpop.f32.mrb[150].mxu1 }
 0x7c3   :  { %v5320_v53 = vpack.c.bf16 %v6530_v1, %v6529_v25  ;;  %v5291_v6 = vpop.f32.mrb[151].mxu1 }
 0x7c4   :  { %v5319_v44 = vpack.c.bf16 %v5291_v6, %v5288_v24 }
 0x7c6   :  { %6419 = vmatmul.mubr.msk.bf16.gmra.mrb[184].mxu1 %vm5333_vm2, %v5311_v10 }
 0x7c7   :  { %5492 = vmatprep.mubr.bf16.mxu1 %v7668_v0 }
 0x7ce   :  { %6420 = vmatmul.mubr.msk.bf16.gmra.mrb[188].mxu1 %vm5333_vm2, %v5312_v29 }
 0x7cf   :  { %5500 = vmatprep.mubr.bf16.mxu1 %v7668_v0 }
 0x7d6   :  { %6421 = vmatmul.mubr.msk.bf16.gmra.mrb[192].mxu1 %vm5333_vm2, %v5313_v40 }
 0x7d7   :  { %5508 = vmatprep.mubr.bf16.mxu1 %v7668_v0 }
 0x7de   :  { %6422 = vmatmul.mubr.msk.bf16.gmra.mrb[196].mxu1 %vm5333_vm2, %v5314_v41 }
 0x7df   :  { %5516 = vmatprep.mubr.bf16.mxu1 %v7668_v0 }
 0x7e6   :  { %6423 = vmatmul.mubr.msk.bf16.gmra.mrb[200].mxu1 %vm5333_vm2, %v5315_v38 }
 0x7e7   :  { %5524 = vmatprep.mubr.bf16.mxu1 %v7668_v0 }
 0x7ee   :  { %6424 = vmatmul.mubr.msk.bf16.gmra.mrb[204].mxu1 %vm5333_vm2, %v5316_v19 }
 0x7ef   :  { %5532 = vmatprep.mubr.bf16.mxu1 %v7668_v0 }
 0x7f6   :  { %6425 = vmatmul.mubr.msk.bf16.gmra.mrb[208].mxu1 %vm5333_vm2, %v5317_v21 }
 0x7f7   :  { %5540 = vmatprep.mubr.bf16.mxu1 %v7668_v0 }
 0x7fe   :  { %6426 = vmatmul.mubr.msk.bf16.gmra.mrb[212].mxu1 %vm5333_vm2, %v5318_v22 }
 0x7ff   :  { %5548 = vmatprep.mubr.bf16.mxu1 %v7668_v0 }
 0x806   :  { %6427 = vmatmul.mubr.msk.bf16.gmra.mrb[216].mxu1 %vm5333_vm2, %v5319_v44 }
 0x807   :  { %5556 = vmatprep.mubr.bf16.mxu1 %v7668_v0 }
 0x80e   :  { %6428 = vmatmul.mubr.msk.bf16.gmra.mrb[220].mxu1 %vm5333_vm2, %v5320_v53 }
 0x859   :  { %v8865_v16 = vpop.f32.mrb[152].mxu1 }
 0x85a   :  { %v5424_v35 = vpop.f32.mrb[153].mxu1 }
 0x85b   :  { %v8867_v32 = vpop.f32.mrb[154].mxu1 }
 0x85c   :  { %v5427_v34 = vpop.f32.mrb[155].mxu1 }
 0x861   :  { %v8869_v48 = vpop.f32.mrb[156].mxu1 }
 0x862   :  { %v5432_v52 = vpop.f32.mrb[157].mxu1 }
 0x863   :  { %v8871_v51 = vpop.f32.mrb[158].mxu1 }
 0x864   :  { %v5435_v36 = vpop.f32.mrb[159].mxu1 }
 0x869   :  { %v5438_v11 = vpop.f32.mrb[160].mxu1 }
 0x86a   :  { %v5440_v62 = vpop.f32.mrb[161].mxu1  ;;  %5569 = vrot.lane.b32.xlu0 %v5438_v11, %s7669_s0 }
 0x86b   :  { %v5441_v54 = vpop.f32.mrb[162].mxu1 }
 0x86c   :  { %5571 = vrot.lane.b32.xlu1 %v5441_v54, %s7669_s0  ;;  %v5443_v0 = vpop.f32.mrb[163].mxu1 }
 0x871   :  { %v5446_v43 = vpop.f32.mrb[164].mxu1 }
 0x872   :  { %v5448_v9 = vpop.f32.mrb[165].mxu1  ;;  %5573 = vrot.lane.b32.xlu0 %v5446_v43, %s7669_s0 }
 0x873   :  { %v5449_v12 = vpop.f32.mrb[166].mxu1 }
 0x874   :  { %5575 = vrot.lane.b32.xlu1 %v5449_v12, %s7669_s0  ;;  %v5451_v8 = vpop.f32.mrb[167].mxu1 }
 0x875   :  { %v7329_v8 = vld [vmem:[#allocation10] sm:$0xff]  }
 0x876   :  { %6531 = vmatprep.subr.bf16.mxu1 %v7329_v8 }
 0x877   :  { %6532 = vmatpush3.bf16.msra.mxu1 %v7329_v8 }
 0x879   :  { %v5454_v49 = vpop.f32.mrb[168].mxu1 }
 0x87a   :  { %v5456_v7 = vpop.f32.mrb[169].mxu1  ;;  %5589 = vrot.lane.b32.xlu0 %v5454_v49, %s7670_s24 }
 0x87b   :  { %v5457_v45 = vpop.f32.mrb[170].mxu1 }
 0x87c   :  { %5591 = vrot.lane.b32.xlu1 %v5457_v45, %s7670_s24  ;;  %v5459_v14 = vpop.f32.mrb[171].mxu1 }
 0x881   :  { %v5462_v20 = vpop.f32.mrb[172].mxu1 }
 0x882   :  { %v5464_v63 = vpop.f32.mrb[173].mxu1  ;;  %5593 = vrot.lane.b32.xlu0 %v5462_v20, %s7670_s24 }
 0x883   :  { %v5465_v61 = vpop.f32.mrb[174].mxu1 }
 0x884   :  { %5595 = vrot.lane.b32.xlu1 %v5465_v61, %s7670_s24  ;;  %v5467_v26 = vpop.f32.mrb[175].mxu1 }
 0x889   :  { %v5470_v57 = vpop.f32.mrb[176].mxu1 }
 0x88a   :  { %v5472_v60 = vpop.f32.mrb[177].mxu1  ;;  %5609 = vrot.lane.b32.xlu0 %v5470_v57, %s7671_s16 }
 0x88b   :  { %v5473_v3 = vpop.f32.mrb[178].mxu1 }
 0x88c   :  { %5611 = vrot.lane.b32.xlu1 %v5473_v3, %s7671_s16  ;;  %v5475_v59 = vpop.f32.mrb[179].mxu1 }
 0x891   :  { %v5478_v4 = vpop.f32.mrb[180].mxu1 }
 0x892   :  { %v5480_v42 = vpop.f32.mrb[181].mxu1  ;;  %5613 = vrot.lane.b32.xlu0 %v5478_v4, %s7671_s16 }
 0x893   :  { %v5481_v55 = vpop.f32.mrb[182].mxu1 }
 0x894   :  { %5615 = vrot.lane.b32.xlu1 %v5481_v55, %s7671_s16  ;;  %v5483_v15 = vpop.f32.mrb[183].mxu1 }
 0x899   :  { %v5486_v50 = vpop.f32.mrb[184].mxu1 }
 0x89a   :  { %v5488_v46 = vpop.f32.mrb[185].mxu1  ;;  %5629 = vrot.lane.b32.xlu0 %v5486_v50, %s7660_s12 }
 0x89b   :  { %v5489_v29 = vpop.f32.mrb[186].mxu1 }
 0x89c   :  { %5631 = vrot.lane.b32.xlu1 %v5489_v29, %s7660_s12  ;;  %v5491_v31 = vpop.f32.mrb[187].mxu1 }
 0x8a1   :  { %v5494_v10 = vpop.f32.mrb[188].mxu1 }
 0x8a2   :  { %v5496_v2 = vpop.f32.mrb[189].mxu1  ;;  %5633 = vrot.lane.b32.xlu0 %v5494_v10, %s7660_s12 }
 0x8a3   :  { %v5497_v37 = vpop.f32.mrb[190].mxu1 }
 0x8a4   :  { %5635 = vrot.lane.b32.xlu1 %v5497_v37, %s7660_s12  ;;  %v5499_v5 = vpop.f32.mrb[191].mxu1  ;;  %s7674_s12 = smov [#allocation16]  }
 0x8a9   :  { %v5502_v41 = vpop.f32.mrb[192].mxu1 }
 0x8aa   :  { %v5504_v18 = vpop.f32.mrb[193].mxu1  ;;  %5649 = vrot.lane.b32.xlu0 %v5502_v41, %s7672_s18 }
 0x8ab   :  { %v5505_v40 = vpop.f32.mrb[194].mxu1 }
 0x8ac   :  { %5651 = vrot.lane.b32.xlu1 %v5505_v40, %s7672_s18  ;;  %v5507_v58 = vpop.f32.mrb[195].mxu1 }
 0x8b1   :  { %v5510_v39 = vpop.f32.mrb[196].mxu1 }
 0x8b2   :  { %v5512_v17 = vpop.f32.mrb[197].mxu1  ;;  %5653 = vrot.lane.b32.xlu0 %v5510_v39, %s7672_s18 }
 0x8b3   :  { %v5513_v19 = vpop.f32.mrb[198].mxu1 }
 0x8b4   :  { %5655 = vrot.lane.b32.xlu1 %v5513_v19, %s7672_s18  ;;  %v5515_v30 = vpop.f32.mrb[199].mxu1  ;;  %v5711_v19 = vsub.s32 1, %v8695_v13 }
 0x8b9   :  { %v5518_v38 = vpop.f32.mrb[200].mxu1 }
 0x8ba   :  { %v5520_v47 = vpop.f32.mrb[201].mxu1  ;;  %5669 = vrot.lane.b32.xlu0 %v5518_v38, %s7673_s6 }
 0x8bb   :  { %v5521_v27 = vpop.f32.mrb[202].mxu1 }
 0x8bc   :  { %5671 = vrot.lane.b32.xlu1 %v5521_v27, %s7673_s6  ;;  %v5523_v23 = vpop.f32.mrb[203].mxu1 }
 0x8c1   :  { %v5526_v22 = vpop.f32.mrb[204].mxu1 }
 0x8c2   :  { %v5528_v28 = vpop.f32.mrb[205].mxu1  ;;  %5673 = vrot.lane.b32.xlu0 %v5526_v22, %s7673_s6 }
 0x8c3   :  { %v5529_v21 = vpop.f32.mrb[206].mxu1 }
 0x8c4   :  { %5675 = vrot.lane.b32.xlu1 %v5529_v21, %s7673_s6  ;;  %v5531_v25 = vpop.f32.mrb[207].mxu1  ;;  %v5712_v21 = vrot.slane %v8708_v56, %v5711_v19 }
 0x8c9   :  { %v5534_v24 = vpop.f32.mrb[208].mxu1 }
 0x8ca   :  { %v5536_v1 = vpop.f32.mrb[209].mxu1  ;;  %5689 = vrot.lane.b32.xlu0 %v5534_v24, %s7663_s15 }
 0x8cb   :  { %v5537_v53 = vpop.f32.mrb[210].mxu1 }
 0x8cc   :  { %5691 = vrot.lane.b32.xlu1 %v5537_v53, %s7663_s15  ;;  %v5539_v6 = vpop.f32.mrb[211].mxu1 }
 0x8d1   :  { %v5542_v44 = vpop.f32.mrb[212].mxu1 }
 0x8d2   :  { %v5544_v35 = vpop.f32.mrb[213].mxu1  ;;  %5693 = vrot.lane.b32.xlu0 %v5542_v44, %s7663_s15 }
 0x8d3   :  { %v5545_v34 = vpop.f32.mrb[214].mxu1 }
 0x8d4   :  { %5695 = vrot.lane.b32.xlu1 %v5545_v34, %s7663_s15  ;;  %v5547_v52 = vpop.f32.mrb[215].mxu1  ;;  %s5964_s15 = sshll.u32 %s7674_s12, 4  ;;  %s5965_s15 = int_to_ptr.vmem [resolvable:$true] %s5964_s15 }
 0x8d5   :  { %s7620_s19 = scalar_lea.vmem %s5965_s15, 512  ;;  %p7625_p9 = scmp.lt.s32.totalorder %s5965_s15, %s5965_s15 }
 0x8d6   :  { %p7621_p8 = scmp.ne.s32.totalorder %s5965_s15, %s7620_s19  ;;  %p7626_p10 = scmp.lt.s32.totalorder %s7620_s19, %s7620_s19 }
 0x8d8   :  { %p7627_p11 = por %p7626_p10, %p7625_p9 }
 0x8d9   :  { %v5550_v36 = vpop.f32.mrb[216].mxu1 }
 0x8da   :  { %v5551_v11 = vpop.f32.mrb[217].mxu1  ;;  %p7628_p12 = pnand %p7627_p11, %p7621_p8 }
 0x8db   :  { %v5553_v62 = vpop.f32.mrb[218].mxu1 }
 0x8dc   :  { %v5554_v54 = vpop.f32.mrb[219].mxu1  ;;  %v5570_v49 = vpop.permute.xlu0 %5569 }
 0x8dd   :  { %v5581_v31 = vadd.f32 %v5570_v49, %v8865_v16 }
 0x8de   :  { %v5572_v7 = vpop.permute.xlu1 %5571 }
 0x8df   :  { %v5582_v2 = vadd.f32 %v5572_v7, %v8867_v32 }
 0x8e1   :  { %v5558_v0 = vpop.f32.mrb[220].mxu1 }
 0x8e2   :  { %v8901_v43 = vpop.f32.mrb[221].mxu1 }
 0x8e3   :  { %v5561_v9 = vpop.f32.mrb[222].mxu1 }
 0x8e4   :  { %v8903_v12 = vpop.f32.mrb[223].mxu1  ;;  %v5574_v45 = vpop.permute.xlu0 %5573 }
 0x8e5   :  { %v5583_v30 = vadd.f32 %v5574_v45, %v8869_v48 }
 0x8e6   :  { %v5576_v14 = vpop.permute.xlu1 %5575 }
 0x8e7   :  { %v5584_v16 = vadd.f32 %v5576_v14, %v8871_v51 }
 0x8ec   :  { %v5590_v20 = vpop.permute.xlu0 %5589 }
 0x8ed   :  { %v5601_v37 = vadd.f32 %v5590_v20, %v5581_v31 }
 0x8ee   :  { %v5592_v63 = vpop.permute.xlu1 %5591 }
 0x8ef   :  { %v5602_v41 = vadd.f32 %v5592_v63, %v5582_v2 }
 0x8f4   :  { %v5594_v61 = vpop.permute.xlu0 %5593 }
 0x8f5   :  { %v5603_v23 = vadd.f32 %v5594_v61, %v5583_v30 }
 0x8f6   :  { %v5596_v26 = vpop.permute.xlu1 %5595 }
 0x8f7   :  { %v5604_v25 = vadd.f32 %v5596_v26, %v5584_v16 }
 0x8fc   :  { %v5610_v57 = vpop.permute.xlu0 %5609 }
 0x8fd   :  { %v5621_v18 = vadd.f32 %v5610_v57, %v5601_v37 }
 0x8fe   :  { %v5612_v60 = vpop.permute.xlu1 %5611 }
 0x8ff   :  { %v5622_v58 = vadd.f32 %v5612_v60, %v5602_v41 }
 0x904   :  { %v5614_v3 = vpop.permute.xlu0 %5613 }
 0x905   :  { %v5623_v24 = vadd.f32 %v5614_v3, %v5603_v23 }
 0x906   :  { %v5616_v59 = vpop.permute.xlu1 %5615 }
 0x907   :  { %v5624_v44 = vadd.f32 %v5616_v59, %v5604_v25 }
 0x90c   :  { %v5630_v4 = vpop.permute.xlu0 %5629 }
 0x90d   :  { %v5641_v39 = vadd.f32 %v5630_v4, %v5621_v18 }
 0x90e   :  { %v5632_v42 = vpop.permute.xlu1 %5631 }
 0x90f   :  { %v5642_v38 = vadd.f32 %v5632_v42, %v5622_v58  ;;  %v5751_v58 = vsub.s32 2, %v8695_v13 }
 0x914   :  { %v5634_v55 = vpop.permute.xlu0 %5633 }
 0x915   :  { %v5643_v35 = vadd.f32 %v5634_v55, %v5623_v24 }
 0x916   :  { %v5636_v15 = vpop.permute.xlu1 %5635 }
 0x917   :  { %v5644_v52 = vadd.f32 %v5636_v15, %v5624_v44 }
 0x91c   :  { %v5650_v50 = vpop.permute.xlu0 %5649 }
 0x91d   :  { %v5661_v47 = vadd.f32 %v5650_v50, %v5641_v39  ;;  %v7443_v39 = vld [vmem:[#allocation13] sm:$0xff] }
 0x91e   :  { %v5652_v46 = vpop.permute.xlu1 %5651 }
 0x91f   :  { %v5662_v22 = vadd.f32 %v5652_v46, %v5642_v38 }
 0x924   :  { %v5654_v29 = vpop.permute.xlu0 %5653 }
 0x925   :  { %v5663_v36 = vadd.f32 %v5654_v29, %v5643_v35 }
 0x926   :  { %v5656_v10 = vpop.permute.xlu1 %5655 }
 0x927   :  { %v5664_v51 = vadd.f32 %v5656_v10, %v5644_v52 }
 0x92c   :  { %v5670_v5 = vpop.permute.xlu0 %5669 }
 0x92d   :  { %v5681_v32 = vadd.f32 %v5670_v5, %v5661_v47 }
 0x92e   :  { %v5672_v40 = vpop.permute.xlu1 %5671 }
 0x92f   :  { %v5682_v1 = vadd.f32 %v5672_v40, %v5662_v22  ;;  %v7330_v40 = vld [vmem:[#allocation11] sm:$0xff]  }
 0x930   :  { %6537 = vmatprep.subr.bf16.mxu1 %v7330_v40 }
 0x934   :  { %v5674_v17 = vpop.permute.xlu0 %5673 }
 0x935   :  { %v5683_v9 = vadd.f32 %v5674_v17, %v5663_v36  ;;  %v5752_v17 = vrot.slane %v7443_v39, %v5751_v58 }
 0x936   :  { %v5676_v27 = vpop.permute.xlu1 %5675 }
 0x937   :  { %v5684_v45 = vadd.f32 %v5676_v27, %v5664_v51 }
 0x93c   :  { %v5690_v28 = vpop.permute.xlu0 %5689 }
 0x93d   :  { %v5701_v53 = vadd.f32 %v5690_v28, %v5681_v32 }
 0x93e   :  { %v5692_v6 = vpop.permute.xlu1 %5691 }
 0x93f   :  { %v5702_v34 = vadd.f32 %v5692_v6, %v5682_v1  ;;  %v5705_v48 = vadd.f32 %v5701_v53, %v5551_v11 }
 0x941   :  { %v5713_v62 = vadd.f32 %v5712_v21, %v5705_v48  ;;  %v5706_v0 = vadd.f32 %v5702_v34, %v5554_v54 }
 0x943   :  { %v6429_v8 = vmul.f32 -1.442695, %v5713_v62  ;;  %v5714_v49 = vadd.f32 %v5712_v21, %v5706_v0 }
 0x944   :  { %v5694_v7 = vpop.permute.xlu0 %5693 }
 0x945   :  { %7395 = vpow2.f32 %v6429_v8  ;;  %v6430_v56 = vmul.f32 -1.442695, %v5714_v49  ;;  %v5703_v14 = vadd.f32 %v5694_v7, %v5683_v9 }
 0x946   :  { %v5696_v20 = vpop.permute.xlu1 %5695 }
 0x947   :  { %7397 = vpow2.f32 %v6430_v56  ;;  %v5704_v63 = vadd.f32 %v5696_v20, %v5684_v45  ;;  %v5707_v61 = vadd.f32 %v5703_v14, %v8901_v43 }
 0x949   :  { %v5715_v26 = vadd.f32 %v5712_v21, %v5707_v61  ;;  %v5708_v11 = vadd.f32 %v5704_v63, %v8903_v12  ;;  %v152_v61 = vld [vmem:[#allocation14 + $0x60] sm:$0xff] }
 0x94b   :  { %v6431_v57 = vmul.f32 -1.442695, %v5715_v26  ;;  %v5716_v60 = vadd.f32 %v5712_v21, %v5708_v11 }
 0x94d   :  { %7399 = vpow2.f32 %v6431_v57  ;;  %v6432_v54 = vmul.f32 -1.442695, %v5716_v60 }
 0x94f   :  { %v7396_v3 = vpop.eup %7395  ;;  %7401 = vpow2.f32 %v6432_v54 }
 0x950   :  { %v5729_v59 = vadd.f32 1.0, %v7396_v3 }
 0x951   :  { %v7398_v4 = vpop.eup %7397 }
 0x952   :  { %7403 = vrcp.f32 %v5729_v59  ;;  %v5730_v42 = vadd.f32 1.0, %v7398_v4 }
 0x954   :  { %7405 = vrcp.f32 %v5730_v42 }
 0x957   :  { %v7400_v55 = vpop.eup %7399 }
 0x958   :  { %v5731_v15 = vadd.f32 1.0, %v7400_v55 }
 0x959   :  { %v7402_v50 = vpop.eup %7401 }
 0x95a   :  { %7407 = vrcp.f32 %v5731_v15  ;;  %v5732_v46 = vadd.f32 1.0, %v7402_v50 }
 0x95c   :  { %v7404_v43 = vpop.eup %7403  ;;  %7409 = vrcp.f32 %v5732_v46 }
 0x95d   :  { %v5741_v12 = vmul.f32 %v7404_v43, %v5713_v62 }
 0x95e   :  { %v7406_v29 = vpop.eup %7405 }
 0x95f   :  { %v5742_v31 = vmul.f32 %v7406_v29, %v5714_v49 }
 0x961   :  { %v5745_v10 = vpack.c.bf16 %v5742_v31, %v5741_v12 }
 0x963   :  { %6533 = vmatprep.mubr.msk.bf16.mxu1 %vm5333_vm2, %v5745_v10 }
 0x964   :  { %v7408_v2 = vpop.eup %7407 }
 0x965   :  { %v5743_v5 = vmul.f32 %v7408_v2, %v5715_v26  ;;  %v5853_v26 = vrot.slane %v152_v61, %v4844_v33 }
 0x966   :  { %v7410_v37 = vpop.eup %7409 }
 0x967   :  { %v5744_v41 = vmul.f32 %v7410_v37, %v5716_v60  ;;  %v146_v37 = vld [vmem:[#allocation14 + $0x30] sm:$0xff] }
 0x969   :  { %v5746_v18 = vpack.c.bf16 %v5744_v41, %v5743_v5 }
 0x96b   :  { %6534 = vmatmul.mubr.msk.bf16.vlgmr.msra.gmra.mrb[224].mxu1 %vm5333_vm2, %v5746_v18  ;;  %v147_v18 = vld [vmem:[#allocation14 + $0x38] sm:$0xff] }
 0x96c   :  { %6538 = vmatpush3.bf16.msra.mxu1 %v7330_v40  ;;  %v142_v40 = vld [vmem:[#allocation14 + $0x10] sm:$0xff] }
 0xa3e   :  { %v6535_v19 = vpop.f32.mrb[224].mxu1 }
 0xa3f   :  { %v5808_v30 = vadd.f32 %v6535_v19, %v5752_v17  ;;  %v5799_v38 = vpop.f32.mrb[225].mxu1  ;;  %v140_v19 = vld [vmem:[#allocation14] sm:$0xff] }
 0xa40   :  { %v5800_v47 = vadd.f32 %v5799_v38, %v5752_v17  ;;  %v6536_v27 = vpop.f32.mrb[226].mxu1 }
 0xa41   :  { %v6438_v16 = vmul.f32 -1.442695, %v5808_v30  ;;  %v5811_v23 = vadd.f32 %v6536_v27, %v5752_v17  ;;  %v5802_v22 = vpop.f32.mrb[227].mxu1 }
 0xa42   :  { %v6436_v32 = vmul.f32 -1.442695, %v5800_v47  ;;  %v5803_v28 = vadd.f32 %v5802_v22, %v5752_v17  ;;  %v145_v17 = vld [vmem:[#allocation14 + $0x28] sm:$0xff] }
 0xa43   :  { %7411 = vpow2.f32 %v6438_v16  ;;  %v6439_v21 = vmul.f32 -1.442695, %v5811_v23 }
 0xa44   :  { %7413 = vpow2.f32 %v6436_v32  ;;  %v6437_v25 = vmul.f32 -1.442695, %v5803_v28 }
 0xa45   :  { %7415 = vpow2.f32 %v6439_v21 }
 0xa46   :  { %7417 = vpow2.f32 %v6437_v25  ;;  %v148_v25 = vld [vmem:[#allocation14 + $0x40] sm:$0xff] }
 0xa4d   :  { %v7412_v24 = vpop.eup %7411 }
 0xa4e   :  { %v7414_v1 = vpop.eup %7413  ;;  %v5828_v53 = vadd.f32 1.0, %v7412_v24 }
 0xa4f   :  { %v7416_v6 = vpop.eup %7415  ;;  %v5826_v44 = vadd.f32 1.0, %v7414_v1 }
 0xa50   :  { %v7418_v35 = vpop.eup %7417  ;;  %7419 = vrcp.f32 %v5828_v53  ;;  %v5829_v34 = vadd.f32 1.0, %v7416_v6  ;;  %v151_v53 = vld [vmem:[#allocation14 + $0x58] sm:$0xff] }
 0xa51   :  { %7421 = vrcp.f32 %v5826_v44  ;;  %v5827_v48 = vadd.f32 1.0, %v7418_v35  ;;  %v149_v35 = vld [vmem:[#allocation14 + $0x48] sm:$0xff] }
 0xa52   :  { %7423 = vrcp.f32 %v5829_v34 }
 0xa53   :  { %7425 = vrcp.f32 %v5827_v48 }
 0xa5a   :  { %v7420_v52 = vpop.eup %7419 }
 0xa5b   :  { %v7422_v36 = vpop.eup %7421  ;;  %v5840_v62 = vmul.f32 %v7420_v52, %v5808_v30 }
 0xa5c   :  { %v7424_v0 = vpop.eup %7423  ;;  %v5838_v51 = vmul.f32 %v7422_v36, %v5800_v47  ;;  %v143_v47 = vld [vmem:[#allocation14 + $0x18] sm:$0xff] }
 0xa5d   :  { %v7426_v9 = vpop.eup %7425  ;;  %v5841_v8 = vmul.f32 %v7424_v0, %v5811_v23  ;;  %v5844_v7 = vadd.f32 %v5840_v62, %v5743_v5  ;;  %v144_v5 = vld [vmem:[#allocation14 + $0x20] sm:$0xff]  ;;  %v141_v23 = vld [vmem:[#allocation14 + $0x8] sm:$0xff] }
 0xa5e   :  { %v5839_v49 = vmul.f32 %v7426_v9, %v5803_v28  ;;  %v5842_v56 = vadd.f32 %v5838_v51, %v5741_v12  ;;  %v150_v28 = vld [vmem:[#allocation14 + $0x50] sm:$0xff] }
 0xa5f   :  { %v5845_v45 = vadd.f32 %v5841_v8, %v5744_v41 }
 0xa60   :  { %v5843_v14 = vadd.f32 %v5839_v49, %v5742_v31 }
 0xa61   :  { %v5847_v20 = vpack.c.bf16 %v5845_v45, %v5844_v7 }
 0xa62   :  { %v5846_v63 = vpack.c.bf16 %v5843_v14, %v5842_v56 }
 0xa64   :  { %6539 = vmatprep.mubr.msk.bf16.mxu1 %vm5333_vm2, %v5846_v63 }
 0xa65   :  { %6540 = vmatmul.mubr.msk.bf16.vlgmr.msra.gmra.mrb[228].mxu1 %vm5333_vm2, %v5847_v20 }
 0xb38   :  { %v6541_v11 = vpop.f32.mrb[228].mxu1 }
 0xb39   :  { %v5909_v57 = vadd.f32 %v6541_v11, %v5853_v26  ;;  %v5900_v60 = vpop.f32.mrb[229].mxu1 }
 0xb3a   :  { %v5901_v54 = vadd.f32 %v5900_v60, %v5853_v26  ;;  %v6542_v3 = vpop.f32.mrb[230].mxu1 }
 0xb3b   :  { %v6445_v59 = vmul.f32 -1.442695, %v5909_v57  ;;  %v5912_v4 = vadd.f32 %v6542_v3, %v5853_v26  ;;  %v5903_v42 = vpop.f32.mrb[231].mxu1 }
 0xb3c   :  { %v6443_v55 = vmul.f32 -1.442695, %v5901_v54  ;;  %v5904_v15 = vadd.f32 %v5903_v42, %v5853_v26 }
 0xb3d   :  { %7427 = vpow2.f32 %v6445_v59  ;;  %v6446_v50 = vmul.f32 -1.442695, %v5912_v4 }
 0xb3e   :  { %7429 = vpow2.f32 %v6443_v55  ;;  %v6444_v46 = vmul.f32 -1.442695, %v5904_v15 }
 0xb3f   :  { %7431 = vpow2.f32 %v6446_v50 }
 0xb40   :  { %7433 = vpow2.f32 %v6444_v46 }
 0xb47   :  { %v7428_v43 = vpop.eup %7427 }
 0xb48   :  { %v7430_v29 = vpop.eup %7429  ;;  %v5929_v13 = vadd.f32 1.0, %v7428_v43 }
 0xb49   :  { %v7432_v33 = vpop.eup %7431  ;;  %v5927_v12 = vadd.f32 1.0, %v7430_v29 }
 0xb4a   :  { %v7434_v31 = vpop.eup %7433  ;;  %7435 = vrcp.f32 %v5929_v13  ;;  %v5930_v10 = vadd.f32 1.0, %v7432_v33 }
 0xb4b   :  { %7437 = vrcp.f32 %v5927_v12  ;;  %v5928_v2 = vadd.f32 1.0, %v7434_v31 }
 0xb4c   :  { %7439 = vrcp.f32 %v5930_v10 }
 0xb4d   :  { %7441 = vrcp.f32 %v5928_v2 }
 0xb54   :  { %v7436_v41 = vpop.eup %7435 }
 0xb55   :  { %v7438_v58 = vpop.eup %7437  ;;  %v5941_v39 = vmul.f32 %v7436_v41, %v146_v37 }
 0xb56   :  { %v7440_v30 = vpop.eup %7439  ;;  %v5939_v38 = vmul.f32 %v7438_v58, %v144_v5 }
 0xb57   :  { %v7442_v27 = vpop.eup %7441  ;;  %v5942_v16 = vmul.f32 %v7440_v30, %v147_v18  ;;  %v5945_v22 = vadd.f32 %v5941_v39, %v142_v40 }
 0xb58   :  { %v5940_v32 = vmul.f32 %v7442_v27, %v145_v17  ;;  %v5943_v21 = vadd.f32 %v5939_v38, %v140_v19 }
 0xb59   :  { %v5946_v24 = vadd.f32 %v5942_v16, %v143_v47  ;;  %v5949_v1 = vmul.f32 %v7436_v41, %v5945_v22 }
 0xb5a   :  { %v5944_v6 = vadd.f32 %v5940_v32, %v141_v23  ;;  %v5947_v44 = vmul.f32 %v7438_v58, %v5943_v21 }
 0xb5b   :  { %v5950_v34 = vmul.f32 %v7440_v30, %v5946_v24  ;;  %v5953_v48 = vadd.f32 %v5949_v1, %v150_v28 }
 0xb5c   :  { %v5948_v52 = vmul.f32 %v7442_v27, %v5944_v6  ;;  %v5951_v36 = vadd.f32 %v5947_v44, %v148_v25 }
 0xb5d   :  { %v5954_v62 = vadd.f32 %v5950_v34, %v151_v53  ;;  %5957 = vst [vmem:[#allocation16 + $0x10] sm:$0xff] %v5953_v48 }
 0xb5e   :  { %v5952_v0 = vadd.f32 %v5948_v52, %v149_v35  ;;  %5955 = vst [vmem:[#allocation16] sm:$0xff] %v5951_v36 }
 0xb5f   :  { %5958 = vst [vmem:[#allocation16 + $0x18] sm:$0xff] %v5954_v62 }
 0xb60   :  { %5956 = vst [vmem:[#allocation16 + $0x8] sm:$0xff] %v5952_v0 }
 0xb61   :  { %7631 = shalt.err (!%p7628_p12)
}
 0xb62   :  { %s7632_s23 = scalar_lea.hbm %s8944_s9, 512 }
 0xb63   :  { %p7633_p13 = scmp.ne.s32.totalorder %s8944_s9, %s7632_s23  ;;  %p7636_p0 = scmp.lt.u32.totalorder %s7632_s23, %s8944_s9 }
 0xb65   :  { %p7638_p1 = pnand %p7636_p0, %p7633_p13 }
 0xb67   :  { %7641 = shalt.err (!%p7638_p1)
}
 0xb68   :  { %5970 = dma.vmem_to_hbm [thread:$0]  %s5965_s15, 512, %s8944_s9, [#allocation4], %s7656_s2, %s7656_s2, %s7657_s10  }
 0xb69   :  { %7652 = dma.done.wait [#allocation4], 512  }
 0xb6a   :  { %7653 = vsyncadd [#allocation4], 4294966784 }
 0xb6b   :  { %5974 = vsyncpa [#allocation3], 1 }
 0xb6c   :  { %5975 = vsyncpa [#allocation6], 1 }
 0xb6d   :  { %5976 = vsyncpa [#allocation9], 1 }
 0xb6e   :  { %5977 = vsyncpa [#allocation12], 1 }
 0xb6f   :  { %5978 = vsyncpa [#allocation15], 1 }
 0xb70   :  { %5979 = vsyncpa [#allocation4], 1 }

</bundles_post_ra>
